<compile_context>
chip_gen: v7x
topology: tpu7x:2x2x1
jax: 0.10.0
libtpu: 0.0.40
codegen_flags: <defaults>
</compile_context>

<pallas_src>
import jax
import jax.numpy as jnp
from jax.experimental import pallas as pl
from jax.experimental.pallas import tpu as pltpu

_MAX_BATCH_TILE = 512   # rows per grid step cap (VMEM-safe on v5e/v6e/v7x)
_MIN_SPLIT_BATCH = 128  # above this, force >=2 grid steps (v7x megacore)


# ------------------------------ Pallas kernel --------------------------------

def _silu(z):
    # x * sigmoid(x) with sigmoid(x) = 0.5*(tanh(x/2)+1): one EUP op/element.
    return z * (0.5 * jnp.tanh(0.5 * z) + 0.5)


def _digit_encoder_kernel(x_ref,
                          d1_ref, b1_ref,   # conv1 as dense (784,784) + (1,784)
                          d2_ref, b2_ref,   # conv2 as dense (784,512) + (1,512)
                          w1_ref, c1_ref,   # Linear(392->512 pad, 256)
                          w2_ref, c2_ref,   # Linear(256,128)
                          w3_ref, c3_ref,   # Linear(128,64) zero-padded to 128
                          o_ref):
    def dotw(a, w_ref):
        # bf16 x bf16 operands -> single-pass MXU; f32 accumulation.
        return jnp.dot(a.astype(jnp.bfloat16), w_ref[...],
                       preferred_element_type=jnp.float32)

    h = _silu(dotw(x_ref[...], d1_ref) + b1_ref[...])   # conv1 + SiLU  (B,784)
    h = _silu(dotw(h, d2_ref) + b2_ref[...])            # conv2 + SiLU  (B,512)
    h = _silu(dotw(h, w1_ref) + c1_ref[...])            # fc1   + SiLU  (B,256)
    h = _silu(dotw(h, w2_ref) + c2_ref[...])            # fc2   + SiLU  (B,128)
    o_ref[...] = (dotw(h, w3_ref) + c3_ref[...]).astype(o_ref.dtype)  # (B,128)


# ------------------------ conv -> dense-matrix folding -----------------------

def _selection(k, stride, pad, in_size, out_size):
    """S[kk, i, o] = 1 iff i == stride*o + kk - pad (out-of-range == zero pad)."""
    i = jnp.arange(in_size)[None, :, None]
    o = jnp.arange(out_size)[None, None, :]
    kk = jnp.arange(k)[:, None, None]
    return (i == stride * o + kk - pad).astype(jnp.float32)


def conv_to_dense(w, b, h, wdt, stride=2, pad=1):
    """w: (Cout,Cin,k,k), b: (Cout,)  ->  (Cin*H*W, Cout*Ho*Wo), (1, Cout*Ho*Wo).
    Row index = ci*H*W + ih*W + iw (PyTorch CHW flatten order);
    col index = co*Ho*Wo + oh*Wo + ow (so the next layer / Flatten line up)."""
    cout, cin, kh, kw = w.shape
    ho = (h + 2 * pad - kh) // stride + 1
    wo = (wdt + 2 * pad - kw) // stride + 1
    sh = _selection(kh, stride, pad, h, ho)       # (kh, H, Ho)
    sw = _selection(kw, stride, pad, wdt, wo)     # (kw, W, Wo)
    dense = jnp.einsum("ocij,iam,jbn->cabomn", w, sh, sw)
    dense = dense.reshape(cin * h * wdt, cout * ho * wo)
    bias = jnp.repeat(b, ho * wo).reshape(1, cout * ho * wo)
    return dense, bias


def pack_params(params):
    """One-time weight transformation (pure JAX, outside the kernel).
    Weights -> bf16 (halves weight DMA, single-pass MXU); biases stay f32.
    conv2/fc1 interface zero-padded 392 -> 512 (exact); final Linear padded
    to 128 output lanes (wrapper slices [:, :64])."""
    bf16 = jnp.bfloat16
    # TODO(synk): on v5e (197 TF/s MXU) an in-VMEM K=36 im2col for conv2 would
    # avoid the ~6x FLOP inflation of the dense unfold; on v6e/v7x the
    # lane-dense unfold is the better trade, so it is kept here.
    d1, b1 = conv_to_dense(params["cw1"], params["cb1"], 28, 28)    # (784,784)
    d2, b2 = conv_to_dense(params["cw2"], params["cb2"], 14, 14)    # (784,392)
    d2 = jnp.pad(d2, ((0, 0), (0, 512 - 392)))                      # (784,512)
    b2 = jnp.pad(b2, ((0, 0), (0, 512 - 392)))                      # (1,512)
    w1 = jnp.pad(params["lw1"], ((0, 512 - 392), (0, 0)))           # (512,256)
    w3 = jnp.pad(params["lw3"], ((0, 0), (0, 64)))                  # (128,128)
    c3 = jnp.pad(params["lb3"], ((0, 0), (0, 64)))                  # (1,128)
    return (d1.astype(bf16), b1,
            d2.astype(bf16), b2,
            w1.astype(bf16), params["lb1"],
            params["lw2"].astype(bf16), params["lb2"],
            w3.astype(bf16), c3)


# --------------------------------- forward -----------------------------------

def _round_up(x, m):
    return ((x + m - 1) // m) * m


def _choose_batch_tile(b):
    """Balanced batch tiles (minimal pad), capped, >=2 grid steps when large."""
    n_steps = pl.cdiv(b, _MAX_BATCH_TILE)
    if b >= _MIN_SPLIT_BATCH:
        n_steps = max(n_steps, 2)     # use both TensorCores on v7x
    return _round_up(pl.cdiv(b, n_steps), 8)


def digit_encoder_forward(x, packed):
    """x: (B, 1, 28, 28) float32 -> (B, 64) float32."""
    b = x.shape[0]
    xf = x.reshape(b, 28 * 28).astype(jnp.bfloat16)

    tb = _choose_batch_tile(b)
    pad_rows = (-b) % tb
    if pad_rows:
        xf = jnp.pad(xf, ((0, pad_rows), (0, 0)))
    bp = b + pad_rows

    def const_spec(a):
        return pl.BlockSpec(a.shape, lambda i: (0, 0))

    matmul_flops = 2 * (784 * 784 + 784 * 512 + 512 * 256 + 256 * 128 + 128 * 128)
    weight_bytes = sum(int(a.size) * jnp.dtype(a.dtype).itemsize for a in packed)
    cost = pl.CostEstimate(
        flops=bp * matmul_flops,
        transcendentals=bp * (784 + 512 + 256 + 128),
        bytes_accessed=weight_bytes + bp * (784 * 2 + 128 * 4),
    )

    out = pl.pallas_call(
        _digit_encoder_kernel,
        out_shape=jax.ShapeDtypeStruct((bp, 128), jnp.float32),
        grid=(bp // tb,),
        in_specs=[pl.BlockSpec((tb, 28 * 28), lambda i: (i, 0))]
                 + [const_spec(a) for a in packed],
        out_specs=pl.BlockSpec((tb, 128), lambda i: (i, 0)),
        compiler_params=pltpu.CompilerParams(
            dimension_semantics=("parallel",),
            vmem_limit_bytes=32 * 1024 * 1024,
        ),
        cost_estimate=cost,
    )(xf, *packed)
    return out[:b, :64]


# ------------------------------ init & reference -----------------------------

def init_params(key):
    ks = jax.random.split(key, 10)

    def w(k, shape, fan_in):
        return jax.random.normal(k, shape, jnp.float32) * (1.0 / fan_in) ** 0.5

    return {
        "cw1": w(ks[0], (4, 1, 3, 3), 1 * 9),
        "cb1": w(ks[1], (4,), 1 * 9),
        "cw2": w(ks[2], (8, 4, 3, 3), 4 * 9),
        "cb2": w(ks[3], (8,), 4 * 9),
        # Linear weights stored already transposed: (in, out); biases as (1, out)
        "lw1": w(ks[4], (392, 256), 392),
        "lb1": w(ks[5], (1, 256), 392),
        "lw2": w(ks[6], (256, 128), 256),
        "lb2": w(ks[7], (1, 128), 256),
        "lw3": w(ks[8], (128, 64), 128),
        "lb3": w(ks[9], (1, 64), 128),
    }


def reference_forward(x, params):
    """Plain-JAX reference mirroring the PyTorch module (for a sanity check)."""
    hp = jax.lax.Precision.HIGHEST
    silu = lambda z: z * jax.nn.sigmoid(z)
    dn = ("NCHW", "OIHW", "NCHW")
    h = jax.lax.conv_general_dilated(
        x, params["cw1"], window_strides=(2, 2), padding=((1, 1), (1, 1)),
        dimension_numbers=dn, precision=hp)
    h = silu(h + params["cb1"][None, :, None, None])
    h = jax.lax.conv_general_dilated(
        h, params["cw2"], window_strides=(2, 2), padding=((1, 1), (1, 1)),
        dimension_numbers=dn, precision=hp)
    h = silu(h + params["cb2"][None, :, None, None])
    h = h.reshape(h.shape[0], -1)
    h = silu(jnp.dot(h, params["lw1"], precision=hp) + params["lb1"])
    h = silu(jnp.dot(h, params["lw2"], precision=hp) + params["lb2"])
    return jnp.dot(h, params["lw3"], precision=hp) + params["lb3"]


if __name__ == "__main__":
    key = jax.random.PRNGKey(0)
    kx, kx2, kp = jax.random.split(key, 3)
    params = init_params(kp)
    packed = pack_params(params)
    fwd = jax.jit(digit_encoder_forward)

    # Small batch (grid = 1 step; batch padded 2 -> 8).
    x = jax.random.normal(kx, (2, 1, 28, 28), jnp.float32)
    out = jax.block_until_ready(fwd(x, packed))
    assert out.shape == (2, 64), out.shape
    ref = jax.block_until_ready(reference_forward(x, params))
    max_err = float(jnp.max(jnp.abs(out - ref)))
    assert bool(jnp.allclose(out, ref, atol=5e-2, rtol=5e-2)), max_err

    # Larger batch exercises the multi-step "parallel" grid (2 steps of 80).
    x2 = jax.random.normal(kx2, (160, 1, 28, 28), jnp.float32)
    out2 = jax.block_until_ready(fwd(x2, packed))
    ref2 = jax.block_until_ready(reference_forward(x2, params))
    max_err2 = float(jnp.max(jnp.abs(out2 - ref2)))
    assert bool(jnp.allclose(out2, ref2, atol=5e-2, rtol=5e-2)), max_err2

    print("KERNEL_OK")
</pallas_src>

<mosaic_0001>
module attributes {stable_mosaic.version = 11 : i64} {
  func.func @_digit_encoder_kernel(%arg0: i32, %arg1: memref<8x784xbf16, #tpu.memory_space<vmem>>, %arg2: memref<784x784xbf16, #tpu.memory_space<vmem>>, %arg3: memref<1x784xf32, #tpu.memory_space<vmem>>, %arg4: memref<784x512xbf16, #tpu.memory_space<vmem>>, %arg5: memref<1x512xf32, #tpu.memory_space<vmem>>, %arg6: memref<512x256xbf16, #tpu.memory_space<vmem>>, %arg7: memref<1x256xf32, #tpu.memory_space<vmem>>, %arg8: memref<256x128xbf16, #tpu.memory_space<vmem>>, %arg9: memref<1x128xf32, #tpu.memory_space<vmem>>, %arg10: memref<128x128xbf16, #tpu.memory_space<vmem>>, %arg11: memref<1x128xf32, #tpu.memory_space<vmem>>, %arg12: memref<8x128xf32, #tpu.memory_space<vmem>>) attributes {dimension_semantics = [#tpu.dimension_semantics<parallel>], iteration_bounds = array<i64: 1>, scalar_prefetch = 0 : i64, scratch_operands = 0 : i64, tpu.core_type = #tpu.core_type<tc>, window_params = [{transform_indices = @transform_0, window_bounds = array<i64: 8, 784>}, {pipeline_mode = #tpu.pipeline_mode<synchronous>, transform_indices = @transform_1, window_bounds = array<i64: 784, 784>}, {pipeline_mode = #tpu.pipeline_mode<synchronous>, transform_indices = @transform_2, window_bounds = array<i64: 1, 784>}, {pipeline_mode = #tpu.pipeline_mode<synchronous>, transform_indices = @transform_3, window_bounds = array<i64: 784, 512>}, {pipeline_mode = #tpu.pipeline_mode<synchronous>, transform_indices = @transform_4, window_bounds = array<i64: 1, 512>}, {pipeline_mode = #tpu.pipeline_mode<synchronous>, transform_indices = @transform_5, window_bounds = array<i64: 512, 256>}, {pipeline_mode = #tpu.pipeline_mode<synchronous>, transform_indices = @transform_6, window_bounds = array<i64: 1, 256>}, {pipeline_mode = #tpu.pipeline_mode<synchronous>, transform_indices = @transform_7, window_bounds = array<i64: 256, 128>}, {pipeline_mode = #tpu.pipeline_mode<synchronous>, transform_indices = @transform_8, window_bounds = array<i64: 1, 128>}, {pipeline_mode = #tpu.pipeline_mode<synchronous>, transform_indices = @transform_9, window_bounds = array<i64: 128, 128>}, {pipeline_mode = #tpu.pipeline_mode<synchronous>, transform_indices = @transform_10, window_bounds = array<i64: 1, 128>}, {transform_indices = @transform_11, window_bounds = array<i64: 8, 128>}]} {
    %c0 = arith.constant 0 : index
    %c0_0 = arith.constant 0 : index
    %0 = vector.load %arg1[%c0, %c0_0] : memref<8x784xbf16, #tpu.memory_space<vmem>>, vector<8x784xbf16>
    %c0_1 = arith.constant 0 : index
    %c0_2 = arith.constant 0 : index
    %1 = vector.load %arg2[%c0_1, %c0_2] : memref<784x784xbf16, #tpu.memory_space<vmem>>, vector<784x784xbf16>
    %cst = arith.constant dense<0.000000e+00> : vector<8x784xf32>
    %2 = tpu.matmul %0, %1, %cst {dimension_numbers = #tpu.dot_dimension_numbers<[1], [0], [0], [1], [0, 0, 1, 1], [], []>} : vector<8x784xbf16>, vector<784x784xbf16>, vector<8x784xf32> -> vector<8x784xf32>
    %c0_3 = arith.constant 0 : index
    %c0_4 = arith.constant 0 : index
    %3 = vector.load %arg3[%c0_3, %c0_4] : memref<1x784xf32, #tpu.memory_space<vmem>>, vector<1x784xf32>
    %4 = vector.broadcast %3 : vector<1x784xf32> to vector<8x784xf32>
    %5 = arith.addf %2, %4 : vector<8x784xf32>
    %cst_5 = arith.constant 5.000000e-01 : f32
    %6 = vector.broadcast %cst_5 : f32 to vector<8x784xf32>
    %7 = arith.mulf %6, %5 : vector<8x784xf32>
    %8 = math.tanh %7 : vector<8x784xf32>
    %cst_6 = arith.constant 5.000000e-01 : f32
    %9 = vector.broadcast %cst_6 : f32 to vector<8x784xf32>
    %10 = arith.mulf %9, %8 : vector<8x784xf32>
    %cst_7 = arith.constant 5.000000e-01 : f32
    %11 = vector.broadcast %cst_7 : f32 to vector<8x784xf32>
    %12 = arith.addf %10, %11 : vector<8x784xf32>
    %13 = arith.mulf %5, %12 : vector<8x784xf32>
    %14 = arith.truncf %13 : vector<8x784xf32> to vector<8x784xbf16>
    %c0_8 = arith.constant 0 : index
    %c0_9 = arith.constant 0 : index
    %15 = vector.load %arg4[%c0_8, %c0_9] : memref<784x512xbf16, #tpu.memory_space<vmem>>, vector<784x512xbf16>
    %cst_10 = arith.constant dense<0.000000e+00> : vector<8x512xf32>
    %16 = tpu.matmul %14, %15, %cst_10 {dimension_numbers = #tpu.dot_dimension_numbers<[1], [0], [0], [1], [0, 0, 1, 1], [], []>} : vector<8x784xbf16>, vector<784x512xbf16>, vector<8x512xf32> -> vector<8x512xf32>
    %c0_11 = arith.constant 0 : index
    %c0_12 = arith.constant 0 : index
    %17 = vector.load %arg5[%c0_11, %c0_12] : memref<1x512xf32, #tpu.memory_space<vmem>>, vector<1x512xf32>
    %18 = vector.broadcast %17 : vector<1x512xf32> to vector<8x512xf32>
    %19 = arith.addf %16, %18 : vector<8x512xf32>
    %cst_13 = arith.constant 5.000000e-01 : f32
    %20 = vector.broadcast %cst_13 : f32 to vector<8x512xf32>
    %21 = arith.mulf %20, %19 : vector<8x512xf32>
    %22 = math.tanh %21 : vector<8x512xf32>
    %cst_14 = arith.constant 5.000000e-01 : f32
    %23 = vector.broadcast %cst_14 : f32 to vector<8x512xf32>
    %24 = arith.mulf %23, %22 : vector<8x512xf32>
    %cst_15 = arith.constant 5.000000e-01 : f32
    %25 = vector.broadcast %cst_15 : f32 to vector<8x512xf32>
    %26 = arith.addf %24, %25 : vector<8x512xf32>
    %27 = arith.mulf %19, %26 : vector<8x512xf32>
    %28 = arith.truncf %27 : vector<8x512xf32> to vector<8x512xbf16>
    %c0_16 = arith.constant 0 : index
    %c0_17 = arith.constant 0 : index
    %29 = vector.load %arg6[%c0_16, %c0_17] : memref<512x256xbf16, #tpu.memory_space<vmem>>, vector<512x256xbf16>
    %cst_18 = arith.constant dense<0.000000e+00> : vector<8x256xf32>
    %30 = tpu.matmul %28, %29, %cst_18 {dimension_numbers = #tpu.dot_dimension_numbers<[1], [0], [0], [1], [0, 0, 1, 1], [], []>} : vector<8x512xbf16>, vector<512x256xbf16>, vector<8x256xf32> -> vector<8x256xf32>
    %c0_19 = arith.constant 0 : index
    %c0_20 = arith.constant 0 : index
    %31 = vector.load %arg7[%c0_19, %c0_20] : memref<1x256xf32, #tpu.memory_space<vmem>>, vector<1x256xf32>
    %32 = vector.broadcast %31 : vector<1x256xf32> to vector<8x256xf32>
    %33 = arith.addf %30, %32 : vector<8x256xf32>
    %cst_21 = arith.constant 5.000000e-01 : f32
    %34 = vector.broadcast %cst_21 : f32 to vector<8x256xf32>
    %35 = arith.mulf %34, %33 : vector<8x256xf32>
    %36 = math.tanh %35 : vector<8x256xf32>
    %cst_22 = arith.constant 5.000000e-01 : f32
    %37 = vector.broadcast %cst_22 : f32 to vector<8x256xf32>
    %38 = arith.mulf %37, %36 : vector<8x256xf32>
    %cst_23 = arith.constant 5.000000e-01 : f32
    %39 = vector.broadcast %cst_23 : f32 to vector<8x256xf32>
    %40 = arith.addf %38, %39 : vector<8x256xf32>
    %41 = arith.mulf %33, %40 : vector<8x256xf32>
    %42 = arith.truncf %41 : vector<8x256xf32> to vector<8x256xbf16>
    %c0_24 = arith.constant 0 : index
    %c0_25 = arith.constant 0 : index
    %43 = vector.load %arg8[%c0_24, %c0_25] : memref<256x128xbf16, #tpu.memory_space<vmem>>, vector<256x128xbf16>
    %cst_26 = arith.constant dense<0.000000e+00> : vector<8x128xf32>
    %44 = tpu.matmul %42, %43, %cst_26 {dimension_numbers = #tpu.dot_dimension_numbers<[1], [0], [0], [1], [0, 0, 1, 1], [], []>} : vector<8x256xbf16>, vector<256x128xbf16>, vector<8x128xf32> -> vector<8x128xf32>
    %c0_27 = arith.constant 0 : index
    %c0_28 = arith.constant 0 : index
    %45 = vector.load %arg9[%c0_27, %c0_28] : memref<1x128xf32, #tpu.memory_space<vmem>>, vector<1x128xf32>
    %46 = vector.broadcast %45 : vector<1x128xf32> to vector<8x128xf32>
    %47 = arith.addf %44, %46 : vector<8x128xf32>
    %cst_29 = arith.constant 5.000000e-01 : f32
    %48 = vector.broadcast %cst_29 : f32 to vector<8x128xf32>
    %49 = arith.mulf %48, %47 : vector<8x128xf32>
    %50 = math.tanh %49 : vector<8x128xf32>
    %cst_30 = arith.constant 5.000000e-01 : f32
    %51 = vector.broadcast %cst_30 : f32 to vector<8x128xf32>
    %52 = arith.mulf %51, %50 : vector<8x128xf32>
    %cst_31 = arith.constant 5.000000e-01 : f32
    %53 = vector.broadcast %cst_31 : f32 to vector<8x128xf32>
    %54 = arith.addf %52, %53 : vector<8x128xf32>
    %55 = arith.mulf %47, %54 : vector<8x128xf32>
    %56 = arith.truncf %55 : vector<8x128xf32> to vector<8x128xbf16>
    %c0_32 = arith.constant 0 : index
    %c0_33 = arith.constant 0 : index
    %57 = vector.load %arg10[%c0_32, %c0_33] : memref<128x128xbf16, #tpu.memory_space<vmem>>, vector<128x128xbf16>
    %cst_34 = arith.constant dense<0.000000e+00> : vector<8x128xf32>
    %58 = tpu.matmul %56, %57, %cst_34 {dimension_numbers = #tpu.dot_dimension_numbers<[1], [0], [0], [1], [0, 0, 1, 1], [], []>} : vector<8x128xbf16>, vector<128x128xbf16>, vector<8x128xf32> -> vector<8x128xf32>
    %c0_35 = arith.constant 0 : index
    %c0_36 = arith.constant 0 : index
    %59 = vector.load %arg11[%c0_35, %c0_36] : memref<1x128xf32, #tpu.memory_space<vmem>>, vector<1x128xf32>
    %60 = vector.broadcast %59 : vector<1x128xf32> to vector<8x128xf32>
    %61 = arith.addf %58, %60 : vector<8x128xf32>
    %c0_37 = arith.constant 0 : index
    %c0_38 = arith.constant 0 : index
    %62 = vector.load %arg12[%c0_37, %c0_38] : memref<8x128xf32, #tpu.memory_space<vmem>>, vector<8x128xf32>
    tpu.vector_store %arg12[%c0_37, %c0_38], %61 {strides = array<i32>} : memref<8x128xf32, #tpu.memory_space<vmem>>, vector<8x128xf32>,
    return
  }
  func.func @transform_0(%arg0: i32) -> (i32, i32) {
    %c0_i32 = arith.constant 0 : i32
    %c0_i32_0 = arith.constant 0 : i32
    return %arg0, %c0_i32 : i32, i32
  }
  func.func @transform_1(%arg0: i32) -> (i32, i32) {
    %c0_i32 = arith.constant 0 : i32
    %c0_i32_0 = arith.constant 0 : i32
    %c0_i32_1 = arith.constant 0 : i32
    return %c0_i32, %c0_i32_0 : i32, i32
  }
  func.func @transform_2(%arg0: i32) -> (i32, i32) {
    %c0_i32 = arith.constant 0 : i32
    %c0_i32_0 = arith.constant 0 : i32
    %c0_i32_1 = arith.constant 0 : i32
    return %c0_i32, %c0_i32_0 : i32, i32
  }
  func.func @transform_3(%arg0: i32) -> (i32, i32) {
    %c0_i32 = arith.constant 0 : i32
    %c0_i32_0 = arith.constant 0 : i32
    %c0_i32_1 = arith.constant 0 : i32
    return %c0_i32, %c0_i32_0 : i32, i32
  }
  func.func @transform_4(%arg0: i32) -> (i32, i32) {
    %c0_i32 = arith.constant 0 : i32
    %c0_i32_0 = arith.constant 0 : i32
    %c0_i32_1 = arith.constant 0 : i32
    return %c0_i32, %c0_i32_0 : i32, i32
  }
  func.func @transform_5(%arg0: i32) -> (i32, i32) {
    %c0_i32 = arith.constant 0 : i32
    %c0_i32_0 = arith.constant 0 : i32
    %c0_i32_1 = arith.constant 0 : i32
    return %c0_i32, %c0_i32_0 : i32, i32
  }
  func.func @transform_6(%arg0: i32) -> (i32, i32) {
    %c0_i32 = arith.constant 0 : i32
    %c0_i32_0 = arith.constant 0 : i32
    %c0_i32_1 = arith.constant 0 : i32
    return %c0_i32, %c0_i32_0 : i32, i32
  }
  func.func @transform_7(%arg0: i32) -> (i32, i32) {
    %c0_i32 = arith.constant 0 : i32
    %c0_i32_0 = arith.constant 0 : i32
    %c0_i32_1 = arith.constant 0 : i32
    return %c0_i32, %c0_i32_0 : i32, i32
  }
  func.func @transform_8(%arg0: i32) -> (i32, i32) {
    %c0_i32 = arith.constant 0 : i32
    %c0_i32_0 = arith.constant 0 : i32
    %c0_i32_1 = arith.constant 0 : i32
    return %c0_i32, %c0_i32_0 : i32, i32
  }
  func.func @transform_9(%arg0: i32) -> (i32, i32) {
    %c0_i32 = arith.constant 0 : i32
    %c0_i32_0 = arith.constant 0 : i32
    %c0_i32_1 = arith.constant 0 : i32
    return %c0_i32, %c0_i32_0 : i32, i32
  }
  func.func @transform_10(%arg0: i32) -> (i32, i32) {
    %c0_i32 = arith.constant 0 : i32
    %c0_i32_0 = arith.constant 0 : i32
    %c0_i32_1 = arith.constant 0 : i32
    return %c0_i32, %c0_i32_0 : i32, i32
  }
  func.func @transform_11(%arg0: i32) -> (i32, i32) {
    %c0_i32 = arith.constant 0 : i32
    %c0_i32_0 = arith.constant 0 : i32
    return %arg0, %c0_i32 : i32, i32
  }
}

</mosaic_0001>

<bundles_post_ra>
// kernel: digit_encoder_forward.1
= control target key start
LH: loop header
LB: loop body
LE: loop exit
PB: predicated region body
PF: predicated region fallthrough
CT: control target
= control target key end

     0   :  { %16 = vsyncpa [#allocation3], 0  ;;  %s7832_s0 = inlined_call_operand.vmem [shape: bf16[8,784], index: 0, kind: input, shape index: {}]   ;;  %s7833_s1 = inlined_call_operand.hbm [shape: bf16[784,784], index: 1, kind: input, shape index: {}]   ;;  %s7834_s2 = inlined_call_operand.hbm [shape: f32[1,784], index: 2, kind: input, shape index: {}]   ;;  %s7835_s3 = inlined_call_operand.hbm [shape: bf16[784,512], index: 3, kind: input, shape index: {}]   ;;  %s7836_s4 = inlined_call_operand.hbm [shape: f32[1,512], index: 4, kind: input, shape index: {}]   ;;  %s7837_s5 = inlined_call_operand.hbm [shape: bf16[512,256], index: 5, kind: input, shape index: {}]   ;;  %s7838_s6 = inlined_call_operand.hbm [shape: f32[1,256], index: 6, kind: input, shape index: {}]   ;;  %s7839_s7 = inlined_call_operand.hbm [shape: bf16[256,128], index: 7, kind: input, shape index: {}]   ;;  %s7840_s8 = inlined_call_operand.hbm [shape: f32[1,128], index: 8, kind: input, shape index: {}]   ;;  %s7841_s9 = inlined_call_operand.hbm [shape: bf16[128,128], index: 9, kind: input, shape index: {}]   ;;  %s7842_s10 = inlined_call_operand.hbm [shape: f32[1,128], index: 10, kind: input, shape index: {}]   ;;  %s7843_s11 = inlined_call_operand.vmem [shape: f32[8,128], index: 11, kind: output, shape index: {}]  }
   0x1   :  { %17 = vsyncpa [#allocation5], 0 }
   0x2   :  { %18 = vsyncpa [#allocation8], 0 }
   0x3   :  { %19 = vsyncpa [#allocation11], 0 }
   0x4   :  { %20 = vsyncpa [#allocation14], 0 }
   0x5   :  { %21 = vsyncpa [#allocation17], 0  ;;  %s7462_s17 = smov [#allocation4]   ;;  %s7463_s19 = smov [#allocation7]  }
   0x6   :  { %s42_s18 = sshll.u32 %s7462_s17, 4  ;;  %s64_s20 = sshll.u32 %s7463_s19, 4  ;;  %s43_s18 = int_to_ptr.vmem [resolvable:$true] %s42_s18  ;;  %s65_s20 = int_to_ptr.vmem [resolvable:$true] %s64_s20 }
   0x7   :  { %s7230_s23 = scalar_lea.hbm %s7834_s2, 112 }
   0x8   :  { %p7231_p0 = scmp.ne.s32.totalorder %s7834_s2, %s7230_s23  ;;  %p7234_p1 = scmp.lt.u32.totalorder %s7230_s23, %s7834_s2 }
   0xa   :  { %p7236_p2 = pnand %p7234_p1, %p7231_p0 }
   0xc   :  { %7239 = shalt.err (!%p7236_p2)
}
   0xd   :  { %s7240_s28 = scalar_lea.vmem %s43_s18, 112  ;;  %s7244_s29 = scalar_lea.vmem %s43_s18, 128 }
   0xe   :  { %p7241_p3 = scmp.ne.s32.totalorder %s43_s18, %s7240_s28  ;;  %p7245_p4 = scmp.lt.s32.totalorder %s43_s18, %s43_s18 }
   0xf   :  { %p7246_p5 = scmp.lt.s32.totalorder %s7244_s29, %s7240_s28 }
  0x11   :  { %p7247_p6 = por %p7246_p5, %p7245_p4 }
  0x13   :  { %p7248_p7 = pnand %p7247_p6, %p7241_p3 }
  0x15   :  { %7251 = shalt.err (!%p7248_p7)
}
  0x16   :  { %45 = dma.hbm_to_vmem [thread:$0]  %s7834_s2, 112, %s43_s18, [#allocation5]  }
  0x17   :  { %s7252_s15 = scalar_lea.hbm %s7836_s4, 64 }
  0x18   :  { %p7253_p8 = scmp.ne.s32.totalorder %s7836_s4, %s7252_s15  ;;  %p7256_p9 = scmp.lt.u32.totalorder %s7252_s15, %s7836_s4 }
  0x1a   :  { %p7258_p10 = pnand %p7256_p9, %p7253_p8 }
  0x1c   :  { %7261 = shalt.err (!%p7258_p10)
}
  0x1d   :  { %s7262_s22 = scalar_lea.vmem %s65_s20, 64  ;;  %p7267_p12 = scmp.lt.s32.totalorder %s65_s20, %s65_s20 }
  0x1e   :  { %p7263_p11 = scmp.ne.s32.totalorder %s65_s20, %s7262_s22  ;;  %p7268_p13 = scmp.lt.s32.totalorder %s7262_s22, %s7262_s22 }
  0x20   :  { %p7269_p0 = por %p7268_p13, %p7267_p12 }
  0x22   :  { %p7270_p1 = pnand %p7269_p0, %p7263_p11 }
  0x24   :  { %7273 = shalt.err (!%p7270_p1)
}
  0x25   :  { %67 = dma.hbm_to_vmem [thread:$0]  %s7836_s4, 64, %s65_s20, [#allocation8]  }
  0x26   :  { %s7464_s23 = smov [#allocation10]   ;;  %s7465_s25 = smov [#allocation13]  }
  0x27   :  { %s86_s24 = sshll.u32 %s7464_s23, 4  ;;  %s108_s26 = sshll.u32 %s7465_s25, 4  ;;  %s87_s24 = int_to_ptr.vmem [resolvable:$true] %s86_s24  ;;  %s109_s26 = int_to_ptr.vmem [resolvable:$true] %s108_s26 }
  0x28   :  { %s7274_s29 = scalar_lea.hbm %s7838_s6, 32 }
  0x29   :  { %p7275_p2 = scmp.ne.s32.totalorder %s7838_s6, %s7274_s29  ;;  %p7278_p3 = scmp.lt.u32.totalorder %s7274_s29, %s7838_s6 }
  0x2b   :  { %p7280_p4 = pnand %p7278_p3, %p7275_p2 }
  0x2d   :  { %7283 = shalt.err (!%p7280_p4)
}
  0x2e   :  { %s7284_s4 = scalar_lea.vmem %s87_s24, 32  ;;  %p7289_p6 = scmp.lt.s32.totalorder %s87_s24, %s87_s24 }
  0x2f   :  { %p7285_p5 = scmp.ne.s32.totalorder %s87_s24, %s7284_s4  ;;  %p7290_p7 = scmp.lt.s32.totalorder %s7284_s4, %s7284_s4 }
  0x31   :  { %p7291_p8 = por %p7290_p7, %p7289_p6 }
  0x33   :  { %p7292_p9 = pnand %p7291_p8, %p7285_p5 }
  0x35   :  { %7295 = shalt.err (!%p7292_p9)
}
  0x36   :  { %89 = dma.hbm_to_vmem [thread:$0]  %s7838_s6, 32, %s87_s24, [#allocation11]  }
  0x37   :  { %s7296_s19 = scalar_lea.hbm %s7840_s8, 16 }
  0x38   :  { %p7297_p10 = scmp.ne.s32.totalorder %s7840_s8, %s7296_s19  ;;  %p7300_p11 = scmp.lt.u32.totalorder %s7296_s19, %s7840_s8 }
  0x3a   :  { %p7302_p12 = pnand %p7300_p11, %p7297_p10 }
  0x3c   :  { %7305 = shalt.err (!%p7302_p12)
}
  0x3d   :  { %s7306_s23 = scalar_lea.vmem %s109_s26, 16  ;;  %s7310_s25 = scalar_lea.vmem %s109_s26, 32 }
  0x3e   :  { %p7307_p13 = scmp.ne.s32.totalorder %s109_s26, %s7306_s23  ;;  %p7311_p0 = scmp.lt.s32.totalorder %s109_s26, %s109_s26 }
  0x3f   :  { %p7312_p1 = scmp.lt.s32.totalorder %s7310_s25, %s7306_s23 }
  0x41   :  { %p7313_p2 = por %p7312_p1, %p7311_p0 }
  0x43   :  { %p7314_p3 = pnand %p7313_p2, %p7307_p13 }
  0x45   :  { %7317 = shalt.err (!%p7314_p3)
}
  0x46   :  { %111 = dma.hbm_to_vmem [thread:$0]  %s7840_s8, 16, %s109_s26, [#allocation14]  }
  0x47   :  { %s7466_s27 = smov [#allocation2]   ;;  %s7318_s12 = scalar_lea.hbm %s7833_s1, 43904 }
  0x48   :  { %s29_s28 = sshll.u32 %s7466_s27, 4  ;;  %p7319_p4 = scmp.ne.s32.totalorder %s7833_s1, %s7318_s12  ;;  %s30_s28 = int_to_ptr.vmem [resolvable:$true] %s29_s28 }
  0x49   :  { %p7322_p5 = scmp.lt.u32.totalorder %s7318_s12, %s7833_s1 }
  0x4b   :  { %p7324_p6 = pnand %p7322_p5, %p7319_p4 }
  0x4d   :  { %7327 = shalt.err (!%p7324_p6)
}
  0x4e   :  { %s7328_s15 = scalar_lea.vmem %s30_s28, 43904  ;;  %p7333_p8 = scmp.lt.s32.totalorder %s30_s28, %s30_s28 }
  0x4f   :  { %p7329_p7 = scmp.ne.s32.totalorder %s30_s28, %s7328_s15  ;;  %p7334_p9 = scmp.lt.s32.totalorder %s7328_s15, %s7328_s15 }
  0x51   :  { %p7335_p10 = por %p7334_p9, %p7333_p8 }
  0x53   :  { %p7336_p11 = pnand %p7335_p10, %p7329_p7 }
  0x55   :  { %7339 = shalt.err (!%p7336_p11)
}
  0x56   :  { %s7467_s8 = smov 448   ;;  %s7468_s26 = smov 28  }
  0x57   :  { %35 = dma.hbm_to_vmem [thread:$0]  %s7833_s1, 43904, %s30_s28, [#allocation3], %s7467_s8, %s7467_s8, %s7468_s26  }
  0x58   :  { %s7469_s19 = smov [#allocation6]   ;;  %s7340_s18 = scalar_lea.hbm %s7835_s3, 25088 }
  0x59   :  { %s51_s21 = sshll.u32 %s7469_s19, 4  ;;  %p7341_p12 = scmp.ne.s32.totalorder %s7835_s3, %s7340_s18  ;;  %s52_s21 = int_to_ptr.vmem [resolvable:$true] %s51_s21 }
  0x5a   :  { %p7344_p13 = scmp.lt.u32.totalorder %s7340_s18, %s7835_s3 }
  0x5c   :  { %p7346_p0 = pnand %p7344_p13, %p7341_p12 }
  0x5e   :  { %7349 = shalt.err (!%p7346_p0)
}
  0x5f   :  { %s7350_s27 = scalar_lea.vmem %s52_s21, 25088  ;;  %p7355_p2 = scmp.lt.s32.totalorder %s52_s21, %s52_s21 }
  0x60   :  { %p7351_p1 = scmp.ne.s32.totalorder %s52_s21, %s7350_s27  ;;  %p7356_p3 = scmp.lt.s32.totalorder %s7350_s27, %s7350_s27 }
  0x62   :  { %p7357_p4 = por %p7356_p3, %p7355_p2 }
  0x64   :  { %p7358_p5 = pnand %p7357_p4, %p7351_p1 }
  0x66   :  { %7361 = shalt.err (!%p7358_p5)
}
  0x67   :  { %s7470_s1 = smov 256   ;;  %s7471_s28 = smov 16  }
  0x68   :  { %57 = dma.hbm_to_vmem [thread:$0]  %s7835_s3, 25088, %s52_s21, [#allocation5], %s7470_s1, %s7470_s1, %s7471_s28  }
  0x69   :  { %s7472_s12 = smov [#allocation9]   ;;  %s7362_s20 = scalar_lea.hbm %s7837_s5, 8192 }
  0x6a   :  { %s73_s13 = sshll.u32 %s7472_s12, 4  ;;  %p7363_p6 = scmp.ne.s32.totalorder %s7837_s5, %s7362_s20  ;;  %s74_s13 = int_to_ptr.vmem [resolvable:$true] %s73_s13 }
  0x6b   :  { %p7366_p7 = scmp.lt.u32.totalorder %s7362_s20, %s7837_s5 }
  0x6d   :  { %p7368_p8 = pnand %p7366_p7, %p7363_p6 }
  0x6f   :  { %7371 = shalt.err (!%p7368_p8)
}
  0x70   :  { %s7372_s17 = scalar_lea.vmem %s74_s13, 8192  ;;  %p7377_p10 = scmp.lt.s32.totalorder %s74_s13, %s74_s13 }
  0x71   :  { %p7373_p9 = scmp.ne.s32.totalorder %s74_s13, %s7372_s17  ;;  %p7378_p11 = scmp.lt.s32.totalorder %s7372_s17, %s7372_s17 }
  0x73   :  { %p7379_p12 = por %p7378_p11, %p7377_p10 }
  0x75   :  { %p7380_p13 = pnand %p7379_p12, %p7373_p9 }
  0x77   :  { %7383 = shalt.err (!%p7380_p13)
}
  0x78   :  { %s7473_s3 = smov 128   ;;  %s7474_s19 = smov 8  }
  0x79   :  { %79 = dma.hbm_to_vmem [thread:$0]  %s7837_s5, 8192, %s74_s13, [#allocation8], %s7473_s3, %s7473_s3, %s7474_s19  }
  0x7a   :  { %s7475_s2 = smov [#allocation12]   ;;  %s7384_s6 = scalar_lea.hbm %s7839_s7, 2048 }
  0x7b   :  { %s95_s18 = sshll.u32 %s7475_s2, 4  ;;  %p7385_p0 = scmp.ne.s32.totalorder %s7839_s7, %s7384_s6  ;;  %s96_s18 = int_to_ptr.vmem [resolvable:$true] %s95_s18 }
  0x7c   :  { %p7388_p1 = scmp.lt.u32.totalorder %s7384_s6, %s7839_s7 }
  0x7e   :  { %p7390_p2 = pnand %p7388_p1, %p7385_p0 }
  0x80   :  { %7393 = shalt.err (!%p7390_p2)
}
  0x81   :  { %s7394_s29 = scalar_lea.vmem %s96_s18, 2048  ;;  %p7399_p4 = scmp.lt.s32.totalorder %s96_s18, %s96_s18 }
  0x82   :  { %p7395_p3 = scmp.ne.s32.totalorder %s96_s18, %s7394_s29  ;;  %p7400_p5 = scmp.lt.s32.totalorder %s7394_s29, %s7394_s29 }
  0x84   :  { %p7401_p6 = por %p7400_p5, %p7399_p4 }
  0x86   :  { %p7402_p7 = pnand %p7401_p6, %p7395_p3 }
  0x88   :  { %7405 = shalt.err (!%p7402_p7)
}
  0x89   :  { %s7476_s5 = smov 64   ;;  %s7477_s30 = smov 4  }
  0x8a   :  { %101 = dma.hbm_to_vmem [thread:$0]  %s7839_s7, 2048, %s96_s18, [#allocation11], %s7476_s5, %s7476_s5, %s7477_s30  }
  0x8b   :  { %s7478_s14 = smov [#allocation15]   ;;  %s7479_s20 = smov [#allocation16]  }
  0x8c   :  { %s117_s4 = sshll.u32 %s7478_s14, 4  ;;  %s130_s15 = sshll.u32 %s7479_s20, 4  ;;  %s118_s4 = int_to_ptr.vmem [resolvable:$true] %s117_s4  ;;  %s131_s15 = int_to_ptr.vmem [resolvable:$true] %s130_s15 }
  0x8d   :  { %s7406_s16 = scalar_lea.hbm %s7841_s9, 1024 }
  0x8e   :  { %p7407_p8 = scmp.ne.s32.totalorder %s7841_s9, %s7406_s16  ;;  %p7410_p9 = scmp.lt.u32.totalorder %s7406_s16, %s7841_s9 }
  0x90   :  { %p7412_p10 = pnand %p7410_p9, %p7407_p8 }
  0x92   :  { %7415 = shalt.err (!%p7412_p10)
}
  0x93   :  { %s7416_s7 = scalar_lea.vmem %s118_s4, 1024  ;;  %p7421_p12 = scmp.lt.s32.totalorder %s118_s4, %s118_s4 }
  0x94   :  { %p7417_p11 = scmp.ne.s32.totalorder %s118_s4, %s7416_s7  ;;  %p7422_p13 = scmp.lt.s32.totalorder %s7416_s7, %s7416_s7 }
  0x96   :  { %p7423_p0 = por %p7422_p13, %p7421_p12 }
  0x98   :  { %p7424_p1 = pnand %p7423_p0, %p7417_p11 }
  0x9a   :  { %7427 = shalt.err (!%p7424_p1)
}
  0x9b   :  { %123 = dma.hbm_to_vmem [thread:$0]  %s7841_s9, 1024, %s118_s4, [#allocation14], %s7476_s5, %s7476_s5, %s7477_s30  }
  0x9c   :  { %s7428_s25 = scalar_lea.hbm %s7842_s10, 16 }
  0x9d   :  { %p7429_p2 = scmp.ne.s32.totalorder %s7842_s10, %s7428_s25  ;;  %p7432_p3 = scmp.lt.u32.totalorder %s7428_s25, %s7842_s10 }
  0x9f   :  { %p7434_p4 = pnand %p7432_p3, %p7429_p2 }
  0xa1   :  { %7437 = shalt.err (!%p7434_p4)
}
  0xa2   :  { %s7438_s28 = scalar_lea.vmem %s131_s15, 16  ;;  %s7442_s29 = scalar_lea.vmem %s131_s15, 32 }
  0xa3   :  { %p7439_p5 = scmp.ne.s32.totalorder %s131_s15, %s7438_s28  ;;  %p7443_p6 = scmp.lt.s32.totalorder %s131_s15, %s131_s15 }
  0xa4   :  { %p7444_p7 = scmp.lt.s32.totalorder %s7442_s29, %s7438_s28 }
  0xa6   :  { %p7445_p8 = por %p7444_p7, %p7443_p6 }
  0xa8   :  { %p7446_p9 = pnand %p7445_p8, %p7439_p5 }
  0xaa   :  { %7449 = shalt.err (!%p7446_p9)
}
  0xab   :  { %133 = dma.hbm_to_vmem [thread:$0]  %s7842_s10, 16, %s131_s15, [#allocation17]  }
  0xac   :  { %7450 = dma.done.wait [#allocation3], 43904  }
  0xad   :  { %7451 = vsyncadd [#allocation3], 4294923392 }
  0xae   :  { %7452 = dma.done.wait [#allocation5], 25200  }
  0xaf   :  { %7453 = vsyncadd [#allocation5], 4294942096 }
  0xb0   :  { %7454 = dma.done.wait [#allocation8], 8256  }
  0xb1   :  { %7455 = vsyncadd [#allocation8], 4294959040 }
  0xb2   :  { %7456 = dma.done.wait [#allocation11], 2080  }
  0xb3   :  { %7457 = vsyncadd [#allocation11], 4294965216 }
  0xb4   :  { %7458 = dma.done.wait [#allocation14], 1040  }
  0xb5   :  { %7459 = vsyncadd [#allocation14], 4294966256 }
  0xb6   :  { %7460 = dma.done.wait [#allocation17], 16  }
  0xb7   :  { %7461 = vsyncadd [#allocation17], 4294967280  ;;  %v7480_v0 = vmov 0   ;;  %v6290_v1 = vld [vmem:[#allocation2 + $0x4] ss:$28 sps:$4 sm:$0xff]   ;;  %vm2386_vm0 = vcmask 130048  }
  0xb8   :  { %2545 = vmatprep.mubr.bf16.mxu1 %v7480_v0  ;;  %v6292_v2 = vld [vmem:[#allocation2 + $0xa84] ss:$28 sps:$4 sm:$0xff]   ;;  %2390 = vmatprep.subr.bf16.mxu0 %v6290_v1  ;;  %v6296_v5 = vld [vmem:[#allocation2 + $0x3c] ss:$28 sps:$4 sm:$0xff]   ;;  %v6300_v7 = vld [vmem:[#allocation2 + $0xc] ss:$28 sps:$4 sm:$0xff]  }
  0xb9   :  { %v6294_v3 = vld [vmem:[#allocation2] ss:$28 sps:$4 sm:$0xff]   ;;  %2513 = vmatprep.subr.bf16.mxu1 %v6292_v2  ;;  %v6298_v6 = vld [vmem:[#allocation2 + $0x8] ss:$28 sps:$4 sm:$0xff]   ;;  %v6301_v8 = vld [vmem:[#allocation2 + $0x38] ss:$28 sps:$4 sm:$0xff]  }
  0xba   :  { %v6295_v4 = vld [vmem:[#allocation2 + $0xa80] ss:$28 sps:$4 sm:$0xff]   ;;  %2391 = vmatpush1.bf16.msra.mxu0 %v6294_v3  ;;  %v6302_v9 = vld [vmem:[%s7832_s0 + $0x18] ss:$0 sps:$4 sm:$0xff]   ;;  %v6303_v10 = vld [vmem:[#allocation2 + $0x74] ss:$28 sps:$4 sm:$0xff]  }
  0xbb   :  { %2514 = vmatpush1.bf16.msra.mxu1 %v6295_v4  ;;  %2392 = vmatprep.subr.bf16.mxu0 %v6296_v5  ;;  %v6305_v11 = vld [vmem:[#allocation2 + $0x40] ss:$28 sps:$4 sm:$0xff]   ;;  %v6308_v13 = vld [vmem:[#allocation2 + $0x70] ss:$28 sps:$4 sm:$0xff]   ;;  %v6311_v16 = vld [vmem:[#allocation2 + $0x78] ss:$28 sps:$4 sm:$0xff]  }
  0xbc   :  { %2554 = vmatprep.subr.bf16.mxu1 %v6300_v7  ;;  %v6307_v12 = vld [vmem:[#allocation2 + $0x44] ss:$28 sps:$4 sm:$0xff]   ;;  %v6309_v14 = vld [vmem:[#allocation2 + $0xac] ss:$28 sps:$4 sm:$0xff]   ;;  %v6313_v15 = vld [vmem:[#allocation2 + $0x7c] ss:$28 sps:$4 sm:$0xff]  }
  0xbd   :  { %v6314_v17 = vld [vmem:[#allocation2 + $0xa8] ss:$28 sps:$4 sm:$0xff]   ;;  %v6319_v19 = vld [vmem:[#allocation2 + $0xb4] ss:$28 sps:$4 sm:$0xff]   ;;  %v6320_v21 = vld [vmem:[#allocation2 + $0xe0] ss:$28 sps:$4 sm:$0xff]  }
  0xbe   :  { %5780 = vmatmul.mubr.msk.bf16.vlgmr.msra.gmra.mrb[0].mxu1 %vm2386_vm0, %v6302_v9  ;;  %2393 = vmatpush1.bf16.msra.mxu0 %v6301_v8  ;;  %v6315_v18 = vld [vmem:[#allocation2 + $0xe4] ss:$28 sps:$4 sm:$0xff]   ;;  %v6317_v20 = vld [vmem:[#allocation2 + $0xb0] ss:$28 sps:$4 sm:$0xff]   ;;  %v6321_v22 = vld [vmem:[#allocation2 + $0x11c] ss:$28 sps:$4 sm:$0xff]  }
  0xbf   :  { %2555 = vmatpush1.bf16.msra.mxu1 %v6298_v6  ;;  %2394 = vmatprep.subr.bf16.mxu0 %v6303_v10  ;;  %v6325_v23 = vld [vmem:[#allocation2 + $0xec] ss:$28 sps:$4 sm:$0xff]   ;;  %v6326_v25 = vld [vmem:[#allocation2 + $0x118] ss:$28 sps:$4 sm:$0xff]   ;;  %v6331_v27 = vld [vmem:[#allocation2 + $0x124] ss:$28 sps:$4 sm:$0xff]  }
  0xc0   :  { %2556 = vmatprep.subr.bf16.mxu1 %v6307_v12  ;;  %v6323_v24 = vld [vmem:[#allocation2 + $0xe8] ss:$28 sps:$4 sm:$0xff]   ;;  %v6327_v26 = vld [vmem:[#allocation2 + $0x154] ss:$28 sps:$4 sm:$0xff]   ;;  %v6329_v28 = vld [vmem:[#allocation2 + $0x120] ss:$28 sps:$4 sm:$0xff]  }
  0xc1   :  { %v6332_v29 = vld [vmem:[#allocation2 + $0x150] ss:$28 sps:$4 sm:$0xff]   ;;  %v6337_v31 = vld [vmem:[#allocation2 + $0x15c] ss:$28 sps:$4 sm:$0xff]   ;;  %v6338_v33 = vld [vmem:[#allocation2 + $0x188] ss:$28 sps:$4 sm:$0xff]  }
  0xc2   :  { %2395 = vmatpush1.bf16.msra.mxu0 %v6308_v13  ;;  %v6333_v30 = vld [vmem:[#allocation2 + $0x18c] ss:$28 sps:$4 sm:$0xff]   ;;  %v6335_v32 = vld [vmem:[#allocation2 + $0x158] ss:$28 sps:$4 sm:$0xff]   ;;  %v6339_v34 = vld [vmem:[#allocation2 + $0x1c4] ss:$28 sps:$4 sm:$0xff]  }
  0xc3   :  { %2557 = vmatpush1.bf16.msra.mxu1 %v6305_v11  ;;  %2396 = vmatprep.subr.bf16.mxu0 %v6309_v14  ;;  %v6343_v35 = vld [vmem:[#allocation2 + $0x194] ss:$28 sps:$4 sm:$0xff]   ;;  %v6344_v37 = vld [vmem:[#allocation2 + $0x1c0] ss:$28 sps:$4 sm:$0xff]   ;;  %v6349_v39 = vld [vmem:[#allocation2 + $0x1cc] ss:$28 sps:$4 sm:$0xff]  }
  0xc4   :  { %2558 = vmatprep.subr.bf16.mxu1 %v6313_v15  ;;  %v6341_v36 = vld [vmem:[#allocation2 + $0x190] ss:$28 sps:$4 sm:$0xff]   ;;  %v6345_v38 = vld [vmem:[#allocation2 + $0x1fc] ss:$28 sps:$4 sm:$0xff]   ;;  %v6347_v40 = vld [vmem:[#allocation2 + $0x1c8] ss:$28 sps:$4 sm:$0xff]  }
  0xc5   :  { %v6350_v41 = vld [vmem:[#allocation2 + $0x1f8] ss:$28 sps:$4 sm:$0xff]   ;;  %v6355_v43 = vld [vmem:[#allocation2 + $0x204] ss:$28 sps:$4 sm:$0xff]   ;;  %v6356_v45 = vld [vmem:[#allocation2 + $0x230] ss:$28 sps:$4 sm:$0xff]  }
  0xc6   :  { %2397 = vmatpush1.bf16.msra.mxu0 %v6314_v17  ;;  %v6351_v42 = vld [vmem:[#allocation2 + $0x234] ss:$28 sps:$4 sm:$0xff]   ;;  %v6353_v44 = vld [vmem:[#allocation2 + $0x200] ss:$28 sps:$4 sm:$0xff]   ;;  %v6357_v46 = vld [vmem:[#allocation2 + $0x26c] ss:$28 sps:$4 sm:$0xff]  }
  0xc7   :  { %2559 = vmatpush1.bf16.msra.mxu1 %v6311_v16  ;;  %2398 = vmatprep.subr.bf16.mxu0 %v6315_v18  ;;  %v6361_v47 = vld [vmem:[#allocation2 + $0x23c] ss:$28 sps:$4 sm:$0xff]   ;;  %v165_v49 = vld [vmem:[%s7832_s0] sm:$0xff]  ;;  %v6367_v53 = vld [vmem:[#allocation2 + $0x274] ss:$28 sps:$4 sm:$0xff]   ;;  %vm7482_vm1 = vmmov 0  }
  0xc8   :  { %2560 = vmatprep.subr.bf16.mxu1 %v6319_v19  ;;  %v6359_v48 = vld [vmem:[#allocation2 + $0x238] ss:$28 sps:$4 sm:$0xff]   ;;  %v6362_v50 = vld [vmem:[#allocation2 + $0x268] ss:$28 sps:$4 sm:$0xff]   ;;  %v7671_v52 = vcombine.high %v165_v49, %v165_v49  ;;  %v6365_v54 = vld [vmem:[#allocation2 + $0x270] ss:$28 sps:$4 sm:$0xff]   ;;  %v7675_v8 = vcombine.low %v165_v49, %v165_v49 }
  0xc9   :  { %v6363_v51 = vld [vmem:[#allocation2 + $0x2a4] ss:$28 sps:$4 sm:$0xff]   ;;  %v6369_v56 = vld [vmem:[#allocation2 + $0x2dc] ss:$28 sps:$4 sm:$0xff]   ;;  %v6373_v57 = vld [vmem:[#allocation2 + $0x2ac] ss:$28 sps:$4 sm:$0xff]  }
  0xca   :  { %2399 = vmatpush1.bf16.msra.mxu0 %v6320_v21  ;;  %2422 = vmatprep.mubr.bf16.mxu0 %v7671_v52  ;;  %v6368_v55 = vld [vmem:[#allocation2 + $0x2a0] ss:$28 sps:$4 sm:$0xff]   ;;  %v6371_v58 = vld [vmem:[#allocation2 + $0x2a8] ss:$28 sps:$4 sm:$0xff]   ;;  %v6374_v59 = vld [vmem:[#allocation2 + $0x2d8] ss:$28 sps:$4 sm:$0xff]  }
  0xcb   :  { %2561 = vmatpush1.bf16.msra.mxu1 %v6317_v20  ;;  %2400 = vmatprep.subr.bf16.mxu0 %v6321_v22  ;;  %v6375_v60 = vld [vmem:[#allocation2 + $0x314] ss:$28 sps:$4 sm:$0xff]   ;;  %v6379_v61 = vld [vmem:[#allocation2 + $0x2e4] ss:$28 sps:$4 sm:$0xff]   ;;  %v6381_v1 = vld [vmem:[#allocation2 + $0x34c] ss:$28 sps:$4 sm:$0xff]  }
  0xcc   :  { %2562 = vmatprep.subr.bf16.mxu1 %v6325_v23  ;;  %2586 = vmatprep.mubr.bf16.mxu1 %v7671_v52  ;;  %v6377_v62 = vld [vmem:[#allocation2 + $0x2e0] ss:$28 sps:$4 sm:$0xff]   ;;  %v6380_v63 = vld [vmem:[#allocation2 + $0x310] ss:$28 sps:$4 sm:$0xff]   ;;  %v6383_v3 = vld [vmem:[#allocation2 + $0x318] ss:$28 sps:$4 sm:$0xff]  }
  0xcd   :  { %v6385_v2 = vld [vmem:[#allocation2 + $0x31c] ss:$28 sps:$4 sm:$0xff]   ;;  %v6386_v4 = vld [vmem:[#allocation2 + $0x348] ss:$28 sps:$4 sm:$0xff]   ;;  %v6393_v6 = vld [vmem:[#allocation2 + $0x354] ss:$28 sps:$4 sm:$0xff]  }
  0xce   :  { %2401 = vmatpush1.bf16.msra.mxu0 %v6326_v25  ;;  %v6390_v5 = vld [vmem:[#allocation2 + $0x384] ss:$28 sps:$4 sm:$0xff]   ;;  %v6391_v9 = vld [vmem:[#allocation2 + $0x350] ss:$28 sps:$4 sm:$0xff]   ;;  %v6397_v10 = vld [vmem:[#allocation2 + $0x3bc] ss:$28 sps:$4 sm:$0xff]  }
  0xcf   :  { %2563 = vmatpush1.bf16.msra.mxu1 %v6323_v24  ;;  %2402 = vmatprep.subr.bf16.mxu0 %v6327_v26  ;;  %v6388_v7 = vld [vmem:[#allocation2 + $0x380] ss:$28 sps:$4 sm:$0xff]   ;;  %v6400_v11 = vld [vmem:[#allocation2 + $0x38c] ss:$28 sps:$4 sm:$0xff]   ;;  %v6395_v12 = vld [vmem:[#allocation2 + $0x3b8] ss:$28 sps:$4 sm:$0xff]  }
  0xd0   :  { %2564 = vmatprep.subr.bf16.mxu1 %v6331_v27  ;;  %v6398_v13 = vld [vmem:[#allocation2 + $0x388] ss:$28 sps:$4 sm:$0xff]   ;;  %v6403_v14 = vld [vmem:[#allocation2 + $0x3f4] ss:$28 sps:$4 sm:$0xff]   ;;  %v6404_v17 = vld [vmem:[#allocation2 + $0x3c0] ss:$28 sps:$4 sm:$0xff]  }
  0xd1   :  { %v6406_v15 = vld [vmem:[#allocation2 + $0x3c4] ss:$28 sps:$4 sm:$0xff]   ;;  %v6401_v16 = vld [vmem:[#allocation2 + $0x3f0] ss:$28 sps:$4 sm:$0xff]   ;;  %v6412_v19 = vld [vmem:[#allocation2 + $0x3fc] ss:$28 sps:$4 sm:$0xff]  }
  0xd2   :  { %2403 = vmatpush1.bf16.msra.mxu0 %v6332_v29  ;;  %v6409_v18 = vld [vmem:[#allocation2 + $0x42c] ss:$28 sps:$4 sm:$0xff]   ;;  %v6410_v21 = vld [vmem:[#allocation2 + $0x3f8] ss:$28 sps:$4 sm:$0xff]   ;;  %v6415_v22 = vld [vmem:[#allocation2 + $0x464] ss:$28 sps:$4 sm:$0xff]  }
  0xd3   :  { %2565 = vmatpush1.bf16.msra.mxu1 %v6329_v28  ;;  %2404 = vmatprep.subr.bf16.mxu0 %v6333_v30  ;;  %v6407_v20 = vld [vmem:[#allocation2 + $0x428] ss:$28 sps:$4 sm:$0xff]   ;;  %v6418_v23 = vld [vmem:[#allocation2 + $0x434] ss:$28 sps:$4 sm:$0xff]   ;;  %v6413_v24 = vld [vmem:[#allocation2 + $0x460] ss:$28 sps:$4 sm:$0xff]  }
  0xd4   :  { %2566 = vmatprep.subr.bf16.mxu1 %v6337_v31  ;;  %v6416_v25 = vld [vmem:[#allocation2 + $0x430] ss:$28 sps:$4 sm:$0xff]   ;;  %v6421_v26 = vld [vmem:[#allocation2 + $0x49c] ss:$28 sps:$4 sm:$0xff]   ;;  %v6422_v29 = vld [vmem:[#allocation2 + $0x468] ss:$28 sps:$4 sm:$0xff]  }
  0xd5   :  { %v6424_v27 = vld [vmem:[#allocation2 + $0x46c] ss:$28 sps:$4 sm:$0xff]   ;;  %v6419_v28 = vld [vmem:[#allocation2 + $0x498] ss:$28 sps:$4 sm:$0xff]   ;;  %v6430_v31 = vld [vmem:[#allocation2 + $0x4a4] ss:$28 sps:$4 sm:$0xff]  }
  0xd6   :  { %2405 = vmatpush1.bf16.msra.mxu0 %v6338_v33  ;;  %v6427_v30 = vld [vmem:[#allocation2 + $0x4d4] ss:$28 sps:$4 sm:$0xff]   ;;  %v6454_v49 = vld [vmem:[#allocation2 + $0x584] ss:$28 sps:$4 sm:$0xff]  }
  0xd7   :  { %2567 = vmatpush1.bf16.msra.mxu1 %v6335_v32  ;;  %2406 = vmatprep.subr.bf16.mxu0 %v6339_v34  ;;  %v7682_v32 = vld [vmem:[%s7832_s0 + $0x8] sm:$0xff]  ;;  %v6428_v34 = vld [vmem:[#allocation2 + $0x4a0] ss:$28 sps:$4 sm:$0xff]  }
  0xd8   :  { %2568 = vmatprep.subr.bf16.mxu1 %v6343_v35  ;;  %v6425_v33 = vld [vmem:[#allocation2 + $0x4d0] ss:$28 sps:$4 sm:$0xff]   ;;  %v7686_v35 = vcombine.high %v7682_v32, %v7682_v32 }
  0xda   :  { %2407 = vmatpush1.bf16.msra.mxu0 %v6344_v37  ;;  %v6436_v37 = vld [vmem:[#allocation2 + $0x4dc] ss:$28 sps:$4 sm:$0xff]  }
  0xdb   :  { %2569 = vmatpush1.bf16.msra.mxu1 %v6341_v36  ;;  %2408 = vmatprep.subr.bf16.mxu0 %v6345_v38  ;;  %v6433_v36 = vld [vmem:[#allocation2 + $0x50c] ss:$28 sps:$4 sm:$0xff]  }
  0xdc   :  { %2570 = vmatprep.subr.bf16.mxu1 %v6349_v39  ;;  %v6431_v38 = vld [vmem:[#allocation2 + $0x508] ss:$28 sps:$4 sm:$0xff]   ;;  %v6434_v39 = vld [vmem:[#allocation2 + $0x4d8] ss:$28 sps:$4 sm:$0xff]  }
  0xde   :  { %2409 = vmatpush1.bf16.msra.mxu0 %v6350_v41  ;;  %v6442_v41 = vld [vmem:[#allocation2 + $0x514] ss:$28 sps:$4 sm:$0xff]  }
  0xdf   :  { %2571 = vmatpush1.bf16.msra.mxu1 %v6347_v40  ;;  %2410 = vmatprep.subr.bf16.mxu0 %v6351_v42  ;;  %v6439_v40 = vld [vmem:[#allocation2 + $0x544] ss:$28 sps:$4 sm:$0xff]  }
  0xe0   :  { %2572 = vmatprep.subr.bf16.mxu1 %v6355_v43  ;;  %v6437_v42 = vld [vmem:[#allocation2 + $0x540] ss:$28 sps:$4 sm:$0xff]   ;;  %v6440_v43 = vld [vmem:[#allocation2 + $0x510] ss:$28 sps:$4 sm:$0xff]  }
  0xe2   :  { %2411 = vmatpush1.bf16.msra.mxu0 %v6356_v45  ;;  %v6448_v45 = vld [vmem:[#allocation2 + $0x54c] ss:$28 sps:$4 sm:$0xff]  }
  0xe3   :  { %2573 = vmatpush1.bf16.msra.mxu1 %v6353_v44  ;;  %2412 = vmatprep.subr.bf16.mxu0 %v6357_v46  ;;  %v6445_v44 = vld [vmem:[#allocation2 + $0x57c] ss:$28 sps:$4 sm:$0xff]  }
  0xe4   :  { %2574 = vmatprep.subr.bf16.mxu1 %v6361_v47  ;;  %v6443_v46 = vld [vmem:[#allocation2 + $0x578] ss:$28 sps:$4 sm:$0xff]   ;;  %v6446_v47 = vld [vmem:[#allocation2 + $0x548] ss:$28 sps:$4 sm:$0xff]  }
  0xe6   :  { %2413 = vmatpush1.bf16.msra.mxu0 %v6362_v50  ;;  %v6449_v50 = vld [vmem:[#allocation2 + $0x5b0] ss:$28 sps:$4 sm:$0xff]  }
  0xe7   :  { %2575 = vmatpush1.bf16.msra.mxu1 %v6359_v48  ;;  %2414 = vmatprep.subr.bf16.mxu0 %v6363_v51  ;;  %v6451_v48 = vld [vmem:[#allocation2 + $0x5b4] ss:$28 sps:$4 sm:$0xff]   ;;  %v6452_v51 = vld [vmem:[#allocation2 + $0x580] ss:$28 sps:$4 sm:$0xff]  }
  0xe8   :  { %2576 = vmatprep.subr.bf16.mxu1 %v6367_v53  ;;  %v6457_v53 = vld [vmem:[#allocation2 + $0x5ec] ss:$28 sps:$4 sm:$0xff]  }
  0xea   :  { %2415 = vmatpush1.bf16.msra.mxu0 %v6368_v55  ;;  %v6455_v55 = vld [vmem:[#allocation2 + $0x5e8] ss:$28 sps:$4 sm:$0xff]  }
  0xeb   :  { %2577 = vmatpush1.bf16.msra.mxu1 %v6365_v54  ;;  %2416 = vmatprep.subr.bf16.mxu0 %v6369_v56  ;;  %v6460_v54 = vld [vmem:[#allocation2 + $0x5bc] ss:$28 sps:$4 sm:$0xff]  }
  0xec   :  { %2578 = vmatprep.subr.bf16.mxu1 %v6373_v57  ;;  %v6458_v56 = vld [vmem:[#allocation2 + $0x5b8] ss:$28 sps:$4 sm:$0xff]   ;;  %v6463_v57 = vld [vmem:[#allocation2 + $0x624] ss:$28 sps:$4 sm:$0xff]  }
  0xee   :  { %2417 = vmatpush1.bf16.msra.mxu0 %v6374_v59  ;;  %v6461_v59 = vld [vmem:[#allocation2 + $0x620] ss:$28 sps:$4 sm:$0xff]  }
  0xef   :  { %2579 = vmatpush1.bf16.msra.mxu1 %v6371_v58  ;;  %2418 = vmatprep.subr.bf16.mxu0 %v6375_v60  ;;  %v6466_v58 = vld [vmem:[#allocation2 + $0x5f4] ss:$28 sps:$4 sm:$0xff]  }
  0xf0   :  { %2580 = vmatprep.subr.bf16.mxu1 %v6379_v61  ;;  %v6464_v60 = vld [vmem:[#allocation2 + $0x5f0] ss:$28 sps:$4 sm:$0xff]   ;;  %v6469_v61 = vld [vmem:[#allocation2 + $0x65c] ss:$28 sps:$4 sm:$0xff]  }
  0xf2   :  { %2419 = vmatpush1.bf16.msra.mxu0 %v6380_v63  ;;  %v6467_v63 = vld [vmem:[#allocation2 + $0x658] ss:$28 sps:$4 sm:$0xff]  }
  0xf3   :  { %2581 = vmatpush1.bf16.msra.mxu1 %v6377_v62  ;;  %2420 = vmatprep.subr.bf16.mxu0 %v6381_v1  ;;  %v6472_v62 = vld [vmem:[#allocation2 + $0x62c] ss:$28 sps:$4 sm:$0xff]  }
  0xf4   :  { %2582 = vmatprep.subr.bf16.mxu1 %v6385_v2  ;;  %v6470_v1 = vld [vmem:[#allocation2 + $0x628] ss:$28 sps:$4 sm:$0xff]   ;;  %v6475_v2 = vld [vmem:[#allocation2 + $0x694] ss:$28 sps:$4 sm:$0xff]  }
  0xf6   :  { %2421 = vmatpush1.bf16.msra.mxu0 %v6386_v4  ;;  %v6473_v4 = vld [vmem:[#allocation2 + $0x690] ss:$28 sps:$4 sm:$0xff]  }
  0xf7   :  { %2583 = vmatpush1.bf16.msra.mxu1 %v6383_v3  ;;  %2431 = vmatprep.subr.bf16.mxu0 %v6390_v5  ;;  %v6478_v3 = vld [vmem:[#allocation2 + $0x664] ss:$28 sps:$4 sm:$0xff]  }
  0xf8   :  { %2584 = vmatprep.subr.bf16.mxu1 %v6393_v6  ;;  %v6476_v5 = vld [vmem:[#allocation2 + $0x660] ss:$28 sps:$4 sm:$0xff]   ;;  %v6481_v6 = vld [vmem:[#allocation2 + $0x6cc] ss:$28 sps:$4 sm:$0xff]  }
  0xf9   :  { %2423 = vmatmul.mubr.bf16.vlgmr.msra.gmra.mrb[0].mxu0 %v7675_v8 }
  0xfa   :  { %2432 = vmatpush1.bf16.msra.mxu0 %v6388_v7  ;;  %2463 = vmatprep.mubr.bf16.mxu0 %v7686_v35  ;;  %v6484_v7 = vld [vmem:[#allocation2 + $0x69c] ss:$28 sps:$4 sm:$0xff]  }
  0xfb   :  { %2585 = vmatpush1.bf16.msra.mxu1 %v6391_v9  ;;  %2433 = vmatprep.subr.bf16.mxu0 %v6397_v10  ;;  %v6479_v9 = vld [vmem:[#allocation2 + $0x6c8] ss:$28 sps:$4 sm:$0xff]   ;;  %v6482_v10 = vld [vmem:[#allocation2 + $0x698] ss:$28 sps:$4 sm:$0xff]  }
  0xfc   :  { %2595 = vmatprep.subr.bf16.mxu1 %v6400_v11  ;;  %v6488_v11 = vld [vmem:[#allocation2 + $0x704] ss:$28 sps:$4 sm:$0xff]  }
  0xfe   :  { %2587 = vmatmul.mubr.bf16.vlgmr.msra.gmra.mrb[4].mxu1 %v7675_v8  ;;  %2434 = vmatpush1.bf16.msra.mxu0 %v6395_v12  ;;  %v6491_v12 = vld [vmem:[#allocation2 + $0x6d4] ss:$28 sps:$4 sm:$0xff]  }
  0xff   :  { %2596 = vmatpush1.bf16.msra.mxu1 %v6398_v13  ;;  %2435 = vmatprep.subr.bf16.mxu0 %v6403_v14  ;;  %v6486_v13 = vld [vmem:[#allocation2 + $0x700] ss:$28 sps:$4 sm:$0xff]   ;;  %v6489_v14 = vld [vmem:[#allocation2 + $0x6d0] ss:$28 sps:$4 sm:$0xff]  }
 0x100   :  { %2597 = vmatprep.subr.bf16.mxu1 %v6406_v15  ;;  %2627 = vmatprep.mubr.bf16.mxu1 %v7686_v35  ;;  %v7692_v15 = vcombine.low %v7682_v32, %v7682_v32  ;;  %v6511_v32 = vld [vmem:[#allocation2 + $0x7e0] ss:$28 sps:$4 sm:$0xff]  }
 0x102   :  { %2436 = vmatpush1.bf16.msra.mxu0 %v6401_v16  ;;  %v6495_v16 = vld [vmem:[#allocation2 + $0x73c] ss:$28 sps:$4 sm:$0xff]  }
 0x103   :  { %2598 = vmatpush1.bf16.msra.mxu1 %v6404_v17  ;;  %2437 = vmatprep.subr.bf16.mxu0 %v6409_v18  ;;  %v6498_v17 = vld [vmem:[#allocation2 + $0x70c] ss:$28 sps:$4 sm:$0xff]   ;;  %v7697_v18 = vld [vmem:[%s7832_s0 + $0x10] sm:$0xff] }
 0x104   :  { %2599 = vmatprep.subr.bf16.mxu1 %v6412_v19  ;;  %v7701_v19 = vcombine.high %v7697_v18, %v7697_v18 }
 0x106   :  { %2438 = vmatpush1.bf16.msra.mxu0 %v6407_v20  ;;  %v6493_v20 = vld [vmem:[#allocation2 + $0x738] ss:$28 sps:$4 sm:$0xff]  }
 0x107   :  { %2600 = vmatpush1.bf16.msra.mxu1 %v6410_v21  ;;  %2439 = vmatprep.subr.bf16.mxu0 %v6415_v22  ;;  %v6496_v21 = vld [vmem:[#allocation2 + $0x708] ss:$28 sps:$4 sm:$0xff]   ;;  %v6501_v22 = vld [vmem:[#allocation2 + $0x774] ss:$28 sps:$4 sm:$0xff]  }
 0x108   :  { %2601 = vmatprep.subr.bf16.mxu1 %v6418_v23  ;;  %v6504_v23 = vld [vmem:[#allocation2 + $0x744] ss:$28 sps:$4 sm:$0xff]  }
 0x10a   :  { %2440 = vmatpush1.bf16.msra.mxu0 %v6413_v24  ;;  %v6499_v24 = vld [vmem:[#allocation2 + $0x770] ss:$28 sps:$4 sm:$0xff]  }
 0x10b   :  { %2602 = vmatpush1.bf16.msra.mxu1 %v6416_v25  ;;  %2441 = vmatprep.subr.bf16.mxu0 %v6421_v26  ;;  %v6502_v25 = vld [vmem:[#allocation2 + $0x740] ss:$28 sps:$4 sm:$0xff]   ;;  %v6507_v26 = vld [vmem:[#allocation2 + $0x7ac] ss:$28 sps:$4 sm:$0xff]  }
 0x10c   :  { %2603 = vmatprep.subr.bf16.mxu1 %v6424_v27  ;;  %v6510_v27 = vld [vmem:[#allocation2 + $0x77c] ss:$28 sps:$4 sm:$0xff]  }
 0x10e   :  { %2442 = vmatpush1.bf16.msra.mxu0 %v6419_v28  ;;  %v6505_v28 = vld [vmem:[#allocation2 + $0x7a8] ss:$28 sps:$4 sm:$0xff]  }
 0x10f   :  { %2604 = vmatpush1.bf16.msra.mxu1 %v6422_v29  ;;  %2443 = vmatprep.subr.bf16.mxu0 %v6427_v30  ;;  %v6508_v29 = vld [vmem:[#allocation2 + $0x778] ss:$28 sps:$4 sm:$0xff]   ;;  %v6513_v30 = vld [vmem:[#allocation2 + $0x7e4] ss:$28 sps:$4 sm:$0xff]  }
 0x110   :  { %2605 = vmatprep.subr.bf16.mxu1 %v6430_v31  ;;  %v6516_v31 = vld [vmem:[#allocation2 + $0x7b4] ss:$28 sps:$4 sm:$0xff]  }
 0x112   :  { %2444 = vmatpush1.bf16.msra.mxu0 %v6425_v33  ;;  %v6514_v33 = vld [vmem:[#allocation2 + $0x7b0] ss:$28 sps:$4 sm:$0xff]  }
 0x113   :  { %2606 = vmatpush1.bf16.msra.mxu1 %v6428_v34  ;;  %2445 = vmatprep.subr.bf16.mxu0 %v6433_v36  ;;  %v6519_v34 = vld [vmem:[#allocation2 + $0x81c] ss:$28 sps:$4 sm:$0xff]   ;;  %v6522_v36 = vld [vmem:[#allocation2 + $0x7ec] ss:$28 sps:$4 sm:$0xff]  }
 0x114   :  { %2607 = vmatprep.subr.bf16.mxu1 %v6436_v37  ;;  %v6517_v37 = vld [vmem:[#allocation2 + $0x818] ss:$28 sps:$4 sm:$0xff]  }
 0x116   :  { %2446 = vmatpush1.bf16.msra.mxu0 %v6431_v38  ;;  %v6520_v38 = vld [vmem:[#allocation2 + $0x7e8] ss:$28 sps:$4 sm:$0xff]  }
 0x117   :  { %2608 = vmatpush1.bf16.msra.mxu1 %v6434_v39  ;;  %2447 = vmatprep.subr.bf16.mxu0 %v6439_v40  ;;  %v6525_v39 = vld [vmem:[#allocation2 + $0x854] ss:$28 sps:$4 sm:$0xff]   ;;  %v6528_v40 = vld [vmem:[#allocation2 + $0x824] ss:$28 sps:$4 sm:$0xff]  }
 0x118   :  { %2609 = vmatprep.subr.bf16.mxu1 %v6442_v41  ;;  %v6523_v41 = vld [vmem:[#allocation2 + $0x850] ss:$28 sps:$4 sm:$0xff]  }
 0x11a   :  { %2448 = vmatpush1.bf16.msra.mxu0 %v6437_v42  ;;  %v6526_v42 = vld [vmem:[#allocation2 + $0x820] ss:$28 sps:$4 sm:$0xff]  }
 0x11b   :  { %2610 = vmatpush1.bf16.msra.mxu1 %v6440_v43  ;;  %2449 = vmatprep.subr.bf16.mxu0 %v6445_v44  ;;  %v6531_v43 = vld [vmem:[#allocation2 + $0x88c] ss:$28 sps:$4 sm:$0xff]   ;;  %v6534_v44 = vld [vmem:[#allocation2 + $0x85c] ss:$28 sps:$4 sm:$0xff]  }
 0x11c   :  { %2611 = vmatprep.subr.bf16.mxu1 %v6448_v45  ;;  %v6529_v45 = vld [vmem:[#allocation2 + $0x888] ss:$28 sps:$4 sm:$0xff]  }
 0x11e   :  { %2450 = vmatpush1.bf16.msra.mxu0 %v6443_v46  ;;  %v6532_v46 = vld [vmem:[#allocation2 + $0x858] ss:$28 sps:$4 sm:$0xff]  }
 0x11f   :  { %2612 = vmatpush1.bf16.msra.mxu1 %v6446_v47  ;;  %2451 = vmatprep.subr.bf16.mxu0 %v6451_v48  ;;  %v6537_v47 = vld [vmem:[#allocation2 + $0x8c4] ss:$28 sps:$4 sm:$0xff]   ;;  %v6540_v48 = vld [vmem:[#allocation2 + $0x894] ss:$28 sps:$4 sm:$0xff]  }
 0x120   :  { %2613 = vmatprep.subr.bf16.mxu1 %v6454_v49  ;;  %v6535_v49 = vld [vmem:[#allocation2 + $0x8c0] ss:$28 sps:$4 sm:$0xff]  }
 0x122   :  { %2452 = vmatpush1.bf16.msra.mxu0 %v6449_v50  ;;  %v6538_v50 = vld [vmem:[#allocation2 + $0x890] ss:$28 sps:$4 sm:$0xff]  }
 0x123   :  { %2614 = vmatpush1.bf16.msra.mxu1 %v6452_v51  ;;  %2453 = vmatprep.subr.bf16.mxu0 %v6457_v53  ;;  %v6543_v51 = vld [vmem:[#allocation2 + $0x8fc] ss:$28 sps:$4 sm:$0xff]   ;;  %v6546_v53 = vld [vmem:[#allocation2 + $0x8cc] ss:$28 sps:$4 sm:$0xff]  }
 0x124   :  { %2615 = vmatprep.subr.bf16.mxu1 %v6460_v54  ;;  %v6541_v54 = vld [vmem:[#allocation2 + $0x8f8] ss:$28 sps:$4 sm:$0xff]  }
 0x126   :  { %2454 = vmatpush1.bf16.msra.mxu0 %v6455_v55  ;;  %v6544_v55 = vld [vmem:[#allocation2 + $0x8c8] ss:$28 sps:$4 sm:$0xff]  }
 0x127   :  { %2616 = vmatpush1.bf16.msra.mxu1 %v6458_v56  ;;  %2455 = vmatprep.subr.bf16.mxu0 %v6463_v57  ;;  %v6549_v56 = vld [vmem:[#allocation2 + $0x934] ss:$28 sps:$4 sm:$0xff]   ;;  %v6552_v57 = vld [vmem:[#allocation2 + $0x904] ss:$28 sps:$4 sm:$0xff]  }
 0x128   :  { %2617 = vmatprep.subr.bf16.mxu1 %v6466_v58  ;;  %v6547_v58 = vld [vmem:[#allocation2 + $0x930] ss:$28 sps:$4 sm:$0xff]  }
 0x12a   :  { %2456 = vmatpush1.bf16.msra.mxu0 %v6461_v59  ;;  %v6550_v59 = vld [vmem:[#allocation2 + $0x900] ss:$28 sps:$4 sm:$0xff]  }
 0x12b   :  { %2618 = vmatpush1.bf16.msra.mxu1 %v6464_v60  ;;  %2457 = vmatprep.subr.bf16.mxu0 %v6469_v61  ;;  %v6555_v60 = vld [vmem:[#allocation2 + $0x96c] ss:$28 sps:$4 sm:$0xff]   ;;  %v6558_v61 = vld [vmem:[#allocation2 + $0x93c] ss:$28 sps:$4 sm:$0xff]  }
 0x12c   :  { %2619 = vmatprep.subr.bf16.mxu1 %v6472_v62  ;;  %v6553_v62 = vld [vmem:[#allocation2 + $0x968] ss:$28 sps:$4 sm:$0xff]  }
 0x12e   :  { %2458 = vmatpush1.bf16.msra.mxu0 %v6467_v63  ;;  %v6556_v63 = vld [vmem:[#allocation2 + $0x938] ss:$28 sps:$4 sm:$0xff]  }
 0x12f   :  { %2620 = vmatpush1.bf16.msra.mxu1 %v6470_v1  ;;  %2459 = vmatprep.subr.bf16.mxu0 %v6475_v2  ;;  %v6561_v1 = vld [vmem:[#allocation2 + $0x9a4] ss:$28 sps:$4 sm:$0xff]   ;;  %v6564_v2 = vld [vmem:[#allocation2 + $0x974] ss:$28 sps:$4 sm:$0xff]  }
 0x130   :  { %2621 = vmatprep.subr.bf16.mxu1 %v6478_v3  ;;  %v6559_v3 = vld [vmem:[#allocation2 + $0x9a0] ss:$28 sps:$4 sm:$0xff]  }
 0x132   :  { %2460 = vmatpush1.bf16.msra.mxu0 %v6473_v4  ;;  %v6562_v4 = vld [vmem:[#allocation2 + $0x970] ss:$28 sps:$4 sm:$0xff]  }
 0x133   :  { %2622 = vmatpush1.bf16.msra.mxu1 %v6476_v5  ;;  %2461 = vmatprep.subr.bf16.mxu0 %v6481_v6  ;;  %v6567_v5 = vld [vmem:[#allocation2 + $0x9dc] ss:$28 sps:$4 sm:$0xff]   ;;  %v6570_v6 = vld [vmem:[#allocation2 + $0x9ac] ss:$28 sps:$4 sm:$0xff]  }
 0x134   :  { %2623 = vmatprep.subr.bf16.mxu1 %v6484_v7  ;;  %v6565_v7 = vld [vmem:[#allocation2 + $0x9d8] ss:$28 sps:$4 sm:$0xff]  }
 0x136   :  { %2462 = vmatpush1.bf16.msra.mxu0 %v6479_v9  ;;  %v6568_v9 = vld [vmem:[#allocation2 + $0x9a8] ss:$28 sps:$4 sm:$0xff]  }
 0x137   :  { %2624 = vmatpush1.bf16.msra.mxu1 %v6482_v10  ;;  %2472 = vmatprep.subr.bf16.mxu0 %v6488_v11  ;;  %v6573_v10 = vld [vmem:[#allocation2 + $0xa14] ss:$28 sps:$4 sm:$0xff]   ;;  %v6576_v11 = vld [vmem:[#allocation2 + $0x9e4] ss:$28 sps:$4 sm:$0xff]  }
 0x138   :  { %2625 = vmatprep.subr.bf16.mxu1 %v6491_v12  ;;  %v6571_v12 = vld [vmem:[#allocation2 + $0xa10] ss:$28 sps:$4 sm:$0xff]  }
 0x139   :  { %2464 = vmatmul.mubr.bf16.vlgmr.msra.gmra.mrb[0].mxu0 %v7692_v15 }
 0x13a   :  { %2473 = vmatpush1.bf16.msra.mxu0 %v6486_v13  ;;  %2504 = vmatprep.mubr.bf16.mxu0 %v7701_v19  ;;  %v6574_v13 = vld [vmem:[#allocation2 + $0x9e0] ss:$28 sps:$4 sm:$0xff]  }
 0x13b   :  { %2626 = vmatpush1.bf16.msra.mxu1 %v6489_v14  ;;  %2474 = vmatprep.subr.bf16.mxu0 %v6495_v16  ;;  %v6579_v14 = vld [vmem:[#allocation2 + $0xa4c] ss:$28 sps:$4 sm:$0xff]   ;;  %v6582_v16 = vld [vmem:[#allocation2 + $0xa1c] ss:$28 sps:$4 sm:$0xff]  }
 0x13c   :  { %2636 = vmatprep.subr.bf16.mxu1 %v6498_v17  ;;  %v6577_v17 = vld [vmem:[#allocation2 + $0xa48] ss:$28 sps:$4 sm:$0xff]  }
 0x13e   :  { %2628 = vmatmul.mubr.bf16.vlgmr.msra.gmra.mrb[4].mxu1 %v7692_v15  ;;  %2475 = vmatpush1.bf16.msra.mxu0 %v6493_v20  ;;  %v6580_v20 = vld [vmem:[#allocation2 + $0xa18] ss:$28 sps:$4 sm:$0xff]  }
 0x13f   :  { %2637 = vmatpush1.bf16.msra.mxu1 %v6496_v21  ;;  %2476 = vmatprep.subr.bf16.mxu0 %v6501_v22  ;;  %v6587_v21 = vld [vmem:[#allocation2 + $0xa54] ss:$28 sps:$4 sm:$0xff]  }
 0x140   :  { %2638 = vmatprep.subr.bf16.mxu1 %v6504_v23  ;;  %2668 = vmatprep.mubr.bf16.mxu1 %v7701_v19  ;;  %v6590_v22 = vld [vmem:[#allocation2 + $0x14] ss:$28 sps:$4 sm:$0xff]   ;;  %v7709_v23 = vcombine.low %v7697_v18, %v7697_v18  ;;  %v6594_v18 = vld [vmem:[#allocation2 + $0x80] ss:$28 sps:$4 sm:$0xff]  }
 0x142   :  { %2477 = vmatpush1.bf16.msra.mxu0 %v6499_v24  ;;  %v6585_v24 = vld [vmem:[#allocation2 + $0xa50] ss:$28 sps:$4 sm:$0xff]  }
 0x143   :  { %2639 = vmatpush1.bf16.msra.mxu1 %v6502_v25  ;;  %2478 = vmatprep.subr.bf16.mxu0 %v6507_v26  ;;  %v6588_v25 = vld [vmem:[#allocation2 + $0x10] ss:$28 sps:$4 sm:$0xff]  }
 0x144   :  { %2640 = vmatprep.subr.bf16.mxu1 %v6510_v27  ;;  %v6593_v26 = vld [vmem:[#allocation2 + $0x4c] ss:$28 sps:$4 sm:$0xff]  }
 0x145   :  { %v6599_v27 = vld [vmem:[#allocation2 + $0xa8c] ss:$28 sps:$4 sm:$0xff]  }
 0x146   :  { %2479 = vmatpush1.bf16.msra.mxu0 %v6505_v28  ;;  %v6591_v28 = vld [vmem:[#allocation2 + $0x48] ss:$28 sps:$4 sm:$0xff]  }
 0x147   :  { %2641 = vmatpush1.bf16.msra.mxu1 %v6508_v29  ;;  %2480 = vmatprep.subr.bf16.mxu0 %v6513_v30  ;;  %v6597_v29 = vld [vmem:[#allocation2 + $0xa88] ss:$28 sps:$4 sm:$0xff]  }
 0x148   :  { %2642 = vmatprep.subr.bf16.mxu1 %v6516_v31  ;;  %v6596_v30 = vld [vmem:[#allocation2 + $0x84] ss:$28 sps:$4 sm:$0xff]   ;;  %v6608_v31 = vld [vmem:[#allocation2 + $0xa94] ss:$28 sps:$4 sm:$0xff]  }
 0x14a   :  { %2481 = vmatpush1.bf16.msra.mxu0 %v6511_v32  ;;  %v6602_v32 = vld [vmem:[#allocation2 + $0xbc] ss:$28 sps:$4 sm:$0xff]  }
 0x14b   :  { %2643 = vmatpush1.bf16.msra.mxu1 %v6514_v33  ;;  %2482 = vmatprep.subr.bf16.mxu0 %v6519_v34  ;;  %v6600_v33 = vld [vmem:[#allocation2 + $0xb8] ss:$28 sps:$4 sm:$0xff]  }
 0x14c   :  { %2644 = vmatprep.subr.bf16.mxu1 %v6522_v36  ;;  %v6605_v34 = vld [vmem:[#allocation2 + $0xf4] ss:$28 sps:$4 sm:$0xff]  }
 0x14d   :  { %v6603_v36 = vld [vmem:[#allocation2 + $0xf0] ss:$28 sps:$4 sm:$0xff]  }
 0x14e   :  { %2483 = vmatpush1.bf16.msra.mxu0 %v6517_v37  ;;  %v6606_v37 = vld [vmem:[#allocation2 + $0xa90] ss:$28 sps:$4 sm:$0xff]  }
 0x14f   :  { %2645 = vmatpush1.bf16.msra.mxu1 %v6520_v38  ;;  %2484 = vmatprep.subr.bf16.mxu0 %v6525_v39  ;;  %v6611_v38 = vld [vmem:[#allocation2 + $0x12c] ss:$28 sps:$4 sm:$0xff]   ;;  %v6612_v39 = vld [vmem:[#allocation2 + $0x1d8] ss:$28 sps:$4 sm:$0xff]  }
 0x150   :  { %2646 = vmatprep.subr.bf16.mxu1 %v6528_v40  ;;  %v7718_v40 = vld [vmem:[%s7832_s0 + $0x18] ss:$0 sps:$4 sm:$0xff]  }
 0x152   :  { %2485 = vmatpush1.bf16.msra.mxu0 %v6523_v41  ;;  %v6609_v41 = vld [vmem:[#allocation2 + $0x128] ss:$28 sps:$4 sm:$0xff]  }
 0x153   :  { %2647 = vmatpush1.bf16.msra.mxu1 %v6526_v42  ;;  %2486 = vmatprep.subr.bf16.mxu0 %v6531_v43  ;;  %v6615_v42 = vld [vmem:[#allocation2 + $0x164] ss:$28 sps:$4 sm:$0xff]  }
 0x154   :  { %2648 = vmatprep.subr.bf16.mxu1 %v6534_v44  ;;  %v6613_v43 = vld [vmem:[#allocation2 + $0x160] ss:$28 sps:$4 sm:$0xff]   ;;  %v6616_v44 = vld [vmem:[#allocation2 + $0x18] ss:$28 sps:$4 sm:$0xff]  }
 0x156   :  { %2487 = vmatpush1.bf16.msra.mxu0 %v6529_v45  ;;  %v6617_v45 = vld [vmem:[#allocation2 + $0x210] ss:$28 sps:$4 sm:$0xff]  }
 0x157   :  { %2649 = vmatpush1.bf16.msra.mxu1 %v6532_v46  ;;  %2488 = vmatprep.subr.bf16.mxu0 %v6537_v47  ;;  %v6620_v46 = vld [vmem:[#allocation2 + $0x19c] ss:$28 sps:$4 sm:$0xff]  }
 0x158   :  { %2650 = vmatprep.subr.bf16.mxu1 %v6540_v48  ;;  %v6618_v47 = vld [vmem:[#allocation2 + $0x198] ss:$28 sps:$4 sm:$0xff]  }
 0x15a   :  { %2489 = vmatpush1.bf16.msra.mxu0 %v6535_v49  ;;  %v6621_v49 = vld [vmem:[#allocation2 + $0x50] ss:$28 sps:$4 sm:$0xff]  }
 0x15b   :  { %2651 = vmatpush1.bf16.msra.mxu1 %v6538_v50  ;;  %2490 = vmatprep.subr.bf16.mxu0 %v6543_v51  ;;  %v6622_v51 = vld [vmem:[#allocation2 + $0x248] ss:$28 sps:$4 sm:$0xff]  }
 0x15c   :  { %2652 = vmatprep.subr.bf16.mxu1 %v6546_v53  ;;  %v6625_v53 = vld [vmem:[#allocation2 + $0x1d4] ss:$28 sps:$4 sm:$0xff]  }
 0x15e   :  { %2491 = vmatpush1.bf16.msra.mxu0 %v6541_v54 }
 0x15f   :  { %2653 = vmatpush1.bf16.msra.mxu1 %v6544_v55  ;;  %2492 = vmatprep.subr.bf16.mxu0 %v6549_v56  ;;  %v6623_v56 = vld [vmem:[#allocation2 + $0x1d0] ss:$28 sps:$4 sm:$0xff]  }
 0x160   :  { %2654 = vmatprep.subr.bf16.mxu1 %v6552_v57  ;;  %v6626_v57 = vld [vmem:[#allocation2 + $0x88] ss:$28 sps:$4 sm:$0xff]  }
 0x162   :  { %2493 = vmatpush1.bf16.msra.mxu0 %v6547_v58  ;;  %v6627_v58 = vld [vmem:[#allocation2 + $0x280] ss:$28 sps:$4 sm:$0xff]  }
 0x163   :  { %2655 = vmatpush1.bf16.msra.mxu1 %v6550_v59  ;;  %2494 = vmatprep.subr.bf16.mxu0 %v6555_v60  ;;  %v6630_v59 = vld [vmem:[#allocation2 + $0x20c] ss:$28 sps:$4 sm:$0xff]  }
 0x164   :  { %2656 = vmatprep.subr.bf16.mxu1 %v6558_v61  ;;  %v6628_v60 = vld [vmem:[#allocation2 + $0x208] ss:$28 sps:$4 sm:$0xff]   ;;  %v6631_v61 = vld [vmem:[#allocation2 + $0xc0] ss:$28 sps:$4 sm:$0xff]  }
 0x166   :  { %2495 = vmatpush1.bf16.msra.mxu0 %v6553_v62  ;;  %v6632_v62 = vld [vmem:[#allocation2 + $0x2b8] ss:$28 sps:$4 sm:$0xff]  }
 0x167   :  { %2657 = vmatpush1.bf16.msra.mxu1 %v6556_v63  ;;  %2496 = vmatprep.subr.bf16.mxu0 %v6561_v1  ;;  %v6635_v63 = vld [vmem:[#allocation2 + $0x244] ss:$28 sps:$4 sm:$0xff]  }
 0x168   :  { %2658 = vmatprep.subr.bf16.mxu1 %v6564_v2  ;;  %v6633_v1 = vld [vmem:[#allocation2 + $0x240] ss:$28 sps:$4 sm:$0xff]   ;;  %v6636_v2 = vld [vmem:[#allocation2 + $0xf8] ss:$28 sps:$4 sm:$0xff]  }
 0x16a   :  { %2497 = vmatpush1.bf16.msra.mxu0 %v6559_v3  ;;  %v6640_v3 = vld [vmem:[#allocation2 + $0x27c] ss:$28 sps:$4 sm:$0xff]  }
 0x16b   :  { %2659 = vmatpush1.bf16.msra.mxu1 %v6562_v4  ;;  %2498 = vmatprep.subr.bf16.mxu0 %v6567_v5  ;;  %v6638_v4 = vld [vmem:[#allocation2 + $0x278] ss:$28 sps:$4 sm:$0xff]   ;;  %v6641_v5 = vld [vmem:[#allocation2 + $0x130] ss:$28 sps:$4 sm:$0xff]  }
 0x16c   :  { %2660 = vmatprep.subr.bf16.mxu1 %v6570_v6  ;;  %v6642_v6 = vld [vmem:[#allocation2 + $0x328] ss:$28 sps:$4 sm:$0xff]  }
 0x16e   :  { %2499 = vmatpush1.bf16.msra.mxu0 %v6565_v7  ;;  %v6645_v7 = vld [vmem:[#allocation2 + $0x2b4] ss:$28 sps:$4 sm:$0xff]  }
 0x16f   :  { %2661 = vmatpush1.bf16.msra.mxu1 %v6568_v9  ;;  %2500 = vmatprep.subr.bf16.mxu0 %v6573_v10  ;;  %v6643_v9 = vld [vmem:[#allocation2 + $0x2b0] ss:$28 sps:$4 sm:$0xff]   ;;  %v6646_v10 = vld [vmem:[#allocation2 + $0x168] ss:$28 sps:$4 sm:$0xff]  }
 0x170   :  { %2662 = vmatprep.subr.bf16.mxu1 %v6576_v11  ;;  %v6647_v11 = vld [vmem:[#allocation2 + $0x360] ss:$28 sps:$4 sm:$0xff]  }
 0x172   :  { %2501 = vmatpush1.bf16.msra.mxu0 %v6571_v12  ;;  %v6650_v12 = vld [vmem:[#allocation2 + $0x2ec] ss:$28 sps:$4 sm:$0xff]  }
 0x173   :  { %2663 = vmatpush1.bf16.msra.mxu1 %v6574_v13  ;;  %2502 = vmatprep.subr.bf16.mxu0 %v6579_v14  ;;  %v6648_v13 = vld [vmem:[#allocation2 + $0x2e8] ss:$28 sps:$4 sm:$0xff]   ;;  %v6651_v14 = vld [vmem:[#allocation2 + $0x1a0] ss:$28 sps:$4 sm:$0xff]  }
 0x174   :  { %2664 = vmatprep.subr.bf16.mxu1 %v6582_v16  ;;  %v6652_v16 = vld [vmem:[#allocation2 + $0x558] ss:$28 sps:$4 sm:$0xff]  }
 0x176   :  { %2503 = vmatpush1.bf16.msra.mxu0 %v6577_v17  ;;  %v6655_v17 = vld [vmem:[#allocation2 + $0x324] ss:$28 sps:$4 sm:$0xff]  }
 0x177   :  { %2665 = vmatpush1.bf16.msra.mxu1 %v6580_v20  ;;  %2718 = vmatprep.subr.bf16.mxu0 %v6590_v22  ;;  %v6653_v20 = vld [vmem:[#allocation2 + $0x320] ss:$28 sps:$4 sm:$0xff]   ;;  %v6657_v22 = vld [vmem:[#allocation2 + $0x590] ss:$28 sps:$4 sm:$0xff]  }
 0x178   :  { %2666 = vmatprep.subr.bf16.mxu1 %v6587_v21  ;;  %v6656_v21 = vld [vmem:[#allocation2 + $0x398] ss:$28 sps:$4 sm:$0xff]  }
 0x179   :  { %2505 = vmatmul.mubr.bf16.vlgmr.msra.gmra.mrb[0].mxu0 %v7709_v23 }
 0x17a   :  { %2719 = vmatpush1.bf16.msra.mxu0 %v6588_v25  ;;  %2750 = vmatprep.mubr.bf16.mxu0 %v7671_v52  ;;  %v6658_v25 = vld [vmem:[#allocation2 + $0x358] ss:$28 sps:$4 sm:$0xff]  }
 0x17b   :  { %2667 = vmatpush1.bf16.msra.mxu1 %v6585_v24  ;;  %2720 = vmatprep.subr.bf16.mxu0 %v6593_v26  ;;  %v6660_v24 = vld [vmem:[#allocation2 + $0x35c] ss:$28 sps:$4 sm:$0xff]   ;;  %v6661_v26 = vld [vmem:[#allocation2 + $0x3d0] ss:$28 sps:$4 sm:$0xff]  }
 0x17c   :  { %2677 = vmatprep.subr.bf16.mxu1 %v6599_v27  ;;  %v6662_v27 = vld [vmem:[#allocation2 + $0x5c8] ss:$28 sps:$4 sm:$0xff]  }
 0x17e   :  { %2669 = vmatmul.mubr.bf16.vlgmr.msra.gmra.mrb[4].mxu1 %v7709_v23  ;;  %2721 = vmatpush1.bf16.msra.mxu0 %v6591_v28  ;;  %v6665_v28 = vld [vmem:[#allocation2 + $0x394] ss:$28 sps:$4 sm:$0xff]  }
 0x17f   :  { %2678 = vmatpush1.bf16.msra.mxu1 %v6597_v29  ;;  %2722 = vmatprep.subr.bf16.mxu0 %v6596_v30  ;;  %v6663_v29 = vld [vmem:[#allocation2 + $0x390] ss:$28 sps:$4 sm:$0xff]   ;;  %v6666_v30 = vld [vmem:[#allocation2 + $0x408] ss:$28 sps:$4 sm:$0xff]  }
 0x180   :  { %2709 = vmatprep.mubr.bf16.mxu1 %v7480_v0  ;;  %2841 = vmatprep.subr.bf16.mxu1 %v6608_v31  ;;  %v6667_v31 = vld [vmem:[#allocation2 + $0x600] ss:$28 sps:$4 sm:$0xff]  }
 0x182   :  { %2723 = vmatpush1.bf16.msra.mxu0 %v6594_v18  ;;  %v6670_v18 = vld [vmem:[#allocation2 + $0x3cc] ss:$28 sps:$4 sm:$0xff]  }
 0x183   :  { %2724 = vmatprep.subr.bf16.mxu0 %v6602_v32  ;;  %v6668_v32 = vld [vmem:[#allocation2 + $0x3c8] ss:$28 sps:$4 sm:$0xff]  }
 0x186   :  { %2725 = vmatpush1.bf16.msra.mxu0 %v6600_v33  ;;  %v6671_v33 = vld [vmem:[#allocation2 + $0x440] ss:$28 sps:$4 sm:$0xff]  }
 0x187   :  { %2726 = vmatprep.subr.bf16.mxu0 %v6605_v34  ;;  %v6672_v34 = vld [vmem:[#allocation2 + $0x638] ss:$28 sps:$4 sm:$0xff]  }
 0x18a   :  { %5781 = vmatmul.mubr.msk.bf16.vlgmr.msra.gmra.mrb[4].mxu1 %vm2386_vm0, %v7718_v40  ;;  %2727 = vmatpush1.bf16.msra.mxu0 %v6603_v36  ;;  %v6675_v36 = vld [vmem:[#allocation2 + $0x404] ss:$28 sps:$4 sm:$0xff]  }
 0x18b   :  { %2842 = vmatpush1.bf16.msra.mxu1 %v6606_v37  ;;  %2728 = vmatprep.subr.bf16.mxu0 %v6611_v38  ;;  %v6673_v37 = vld [vmem:[#allocation2 + $0x400] ss:$28 sps:$4 sm:$0xff]   ;;  %v6676_v38 = vld [vmem:[#allocation2 + $0x478] ss:$28 sps:$4 sm:$0xff]  }
 0x18c   :  { %2873 = vmatprep.mubr.bf16.mxu1 %v7480_v0  ;;  %6072 = vmatprep.subr.bf16.mxu1 %v6612_v39  ;;  %v6677_v39 = vld [vmem:[#allocation2 + $0x670] ss:$28 sps:$4 sm:$0xff]  }
 0x18e   :  { %2729 = vmatpush1.bf16.msra.mxu0 %v6609_v41  ;;  %v6680_v41 = vld [vmem:[#allocation2 + $0x43c] ss:$28 sps:$4 sm:$0xff]  }
 0x18f   :  { %2730 = vmatprep.subr.bf16.mxu0 %v6615_v42  ;;  %v6678_v42 = vld [vmem:[#allocation2 + $0x438] ss:$28 sps:$4 sm:$0xff]  }
 0x191   :  { %v7723_v48 = vpop.f32.mrb[0].mxu1 }
 0x192   :  { %5782 = vmatmul.mubr.msk.bf16.vlgmr.msra.gmra.mrb[8].mxu1 %vm2386_vm0, %v7718_v40  ;;  %v7727_v50 = vpop.f32.mrb[1].mxu1  ;;  %2731 = vmatpush1.bf16.msra.mxu0 %v6613_v43  ;;  %v6682_v43 = vld [vmem:[#allocation2 + $0x6a8] ss:$28 sps:$4 sm:$0xff]  }
 0x193   :  { %6073 = vmatpush3.bf16.msra.mxu1 %v6616_v44  ;;  %v2551_v54 = vpop.f32.mrb[2].mxu1  ;;  %2732 = vmatprep.subr.bf16.mxu0 %v6620_v46  ;;  %v6685_v44 = vld [vmem:[#allocation2 + $0x474] ss:$28 sps:$4 sm:$0xff]   ;;  %v6687_v46 = vld [vmem:[#allocation2 + $0x6e0] ss:$28 sps:$4 sm:$0xff]  }
 0x194   :  { %6074 = vmatprep.subr.bf16.mxu1 %v6617_v45  ;;  %v2552_v55 = vpop.f32.mrb[3].mxu1  ;;  %2914 = vmatprep.mubr.bf16.mxu1 %v7671_v52  ;;  %v6637_v52 = vld [vmem:[#allocation2 + $0x2f0] ss:$28 sps:$4 sm:$0xff]   ;;  %v6695_v54 = vld [vmem:[#allocation2 + $0x4e4] ss:$28 sps:$4 sm:$0xff]  }
 0x195   :  { %v6683_v45 = vld [vmem:[#allocation2 + $0x470] ss:$28 sps:$4 sm:$0xff]   ;;  %v6693_v55 = vld [vmem:[#allocation2 + $0x4e0] ss:$28 sps:$4 sm:$0xff]  }
 0x196   :  { %2733 = vmatpush1.bf16.msra.mxu0 %v6618_v47  ;;  %v6690_v47 = vld [vmem:[#allocation2 + $0x4ac] ss:$28 sps:$4 sm:$0xff]  }
 0x197   :  { %6075 = vmatpush3.bf16.msra.mxu1 %v6621_v49  ;;  %2734 = vmatprep.subr.bf16.mxu0 %v6625_v53  ;;  %v6688_v49 = vld [vmem:[#allocation2 + $0x4a8] ss:$28 sps:$4 sm:$0xff]   ;;  %v6692_v53 = vld [vmem:[#allocation2 + $0x8d8] ss:$28 sps:$4 sm:$0xff]  }
 0x198   :  { %6076 = vmatprep.subr.bf16.mxu1 %v6622_v51  ;;  %v6691_v51 = vld [vmem:[#allocation2 + $0x520] ss:$28 sps:$4 sm:$0xff]  }
 0x19a   :  { %2735 = vmatpush1.bf16.msra.mxu0 %v6623_v56  ;;  %v6696_v56 = vld [vmem:[#allocation2 + $0x718] ss:$28 sps:$4 sm:$0xff]  }
 0x19b   :  { %6077 = vmatpush3.bf16.msra.mxu1 %v6626_v57  ;;  %2736 = vmatprep.subr.bf16.mxu0 %v6630_v59  ;;  %v6697_v57 = vld [vmem:[#allocation2 + $0x910] ss:$28 sps:$4 sm:$0xff]   ;;  %v6698_v59 = vld [vmem:[#allocation2 + $0x518] ss:$28 sps:$4 sm:$0xff]  }
 0x19c   :  { %6078 = vmatprep.subr.bf16.mxu1 %v6627_v58  ;;  %v6700_v58 = vld [vmem:[#allocation2 + $0x51c] ss:$28 sps:$4 sm:$0xff]  }
 0x19e   :  { %2737 = vmatpush1.bf16.msra.mxu0 %v6628_v60  ;;  %v6701_v60 = vld [vmem:[#allocation2 + $0x750] ss:$28 sps:$4 sm:$0xff]  }
 0x19f   :  { %6079 = vmatpush3.bf16.msra.mxu1 %v6631_v61  ;;  %2738 = vmatprep.subr.bf16.mxu0 %v6635_v63  ;;  %v6702_v61 = vld [vmem:[#allocation2 + $0x948] ss:$28 sps:$4 sm:$0xff]   ;;  %v6703_v63 = vld [vmem:[#allocation2 + $0x550] ss:$28 sps:$4 sm:$0xff]  }
 0x1a0   :  { %6080 = vmatprep.subr.bf16.mxu1 %v6632_v62  ;;  %v6705_v62 = vld [vmem:[#allocation2 + $0x554] ss:$28 sps:$4 sm:$0xff]  }
 0x1a2   :  { %2739 = vmatpush1.bf16.msra.mxu0 %v6633_v1  ;;  %v6706_v1 = vld [vmem:[#allocation2 + $0x788] ss:$28 sps:$4 sm:$0xff]  }
 0x1a3   :  { %6081 = vmatpush3.bf16.msra.mxu1 %v6636_v2  ;;  %2740 = vmatprep.subr.bf16.mxu0 %v6640_v3  ;;  %v6707_v2 = vld [vmem:[#allocation2 + $0x980] ss:$28 sps:$4 sm:$0xff]   ;;  %v6708_v3 = vld [vmem:[#allocation2 + $0x588] ss:$28 sps:$4 sm:$0xff]  }
 0x1a4   :  { %6082 = vmatprep.subr.bf16.mxu1 %v6637_v52  ;;  %v6710_v52 = vld [vmem:[#allocation2 + $0x58c] ss:$28 sps:$4 sm:$0xff]  }
 0x1a6   :  { %2741 = vmatpush1.bf16.msra.mxu0 %v6638_v4  ;;  %v6711_v4 = vld [vmem:[#allocation2 + $0x7c0] ss:$28 sps:$4 sm:$0xff]  }
 0x1a7   :  { %6083 = vmatpush3.bf16.msra.mxu1 %v6641_v5  ;;  %2742 = vmatprep.subr.bf16.mxu0 %v6645_v7  ;;  %v6712_v5 = vld [vmem:[#allocation2 + $0x9b8] ss:$28 sps:$4 sm:$0xff]   ;;  %v6713_v7 = vld [vmem:[#allocation2 + $0x5c0] ss:$28 sps:$4 sm:$0xff]  }
 0x1a8   :  { %6084 = vmatprep.subr.bf16.mxu1 %v6642_v6  ;;  %v6715_v6 = vld [vmem:[#allocation2 + $0x5c4] ss:$28 sps:$4 sm:$0xff]  }
 0x1aa   :  { %2743 = vmatpush1.bf16.msra.mxu0 %v6643_v9  ;;  %v6716_v9 = vld [vmem:[#allocation2 + $0x7f8] ss:$28 sps:$4 sm:$0xff]  }
 0x1ab   :  { %6085 = vmatpush3.bf16.msra.mxu1 %v6646_v10  ;;  %2744 = vmatprep.subr.bf16.mxu0 %v6650_v12  ;;  %v6717_v10 = vld [vmem:[#allocation2 + $0x9f0] ss:$28 sps:$4 sm:$0xff]   ;;  %v6718_v12 = vld [vmem:[#allocation2 + $0x5f8] ss:$28 sps:$4 sm:$0xff]  }
 0x1ac   :  { %6086 = vmatprep.subr.bf16.mxu1 %v6647_v11  ;;  %v6720_v11 = vld [vmem:[#allocation2 + $0x5fc] ss:$28 sps:$4 sm:$0xff]  }
 0x1ae   :  { %2745 = vmatpush1.bf16.msra.mxu0 %v6648_v13  ;;  %v6721_v13 = vld [vmem:[#allocation2 + $0x830] ss:$28 sps:$4 sm:$0xff]  }
 0x1af   :  { %6087 = vmatpush3.bf16.msra.mxu1 %v6651_v14  ;;  %2746 = vmatprep.subr.bf16.mxu0 %v6655_v17  ;;  %v6722_v14 = vld [vmem:[#allocation2 + $0xa28] ss:$28 sps:$4 sm:$0xff]   ;;  %v6723_v17 = vld [vmem:[#allocation2 + $0x630] ss:$28 sps:$4 sm:$0xff]  }
 0x1b0   :  { %6094 = vmatprep.subr.bf16.mxu1 %v6652_v16  ;;  %v6725_v16 = vld [vmem:[#allocation2 + $0x634] ss:$28 sps:$4 sm:$0xff]  }
 0x1b2   :  { %2915 = vmatmul.mubr.bf16.vlgmr.msra.gmra.mrb[12].mxu1 %v7675_v8  ;;  %2747 = vmatpush1.bf16.msra.mxu0 %v6653_v20  ;;  %v6726_v20 = vld [vmem:[#allocation2 + $0x868] ss:$28 sps:$4 sm:$0xff]  }
 0x1b3   :  { %6095 = vmatpush3.bf16.msra.mxu1 %v6656_v21  ;;  %2748 = vmatprep.subr.bf16.mxu0 %v6660_v24  ;;  %v6727_v21 = vld [vmem:[#allocation2 + $0xa60] ss:$28 sps:$4 sm:$0xff]   ;;  %v6728_v24 = vld [vmem:[#allocation2 + $0x668] ss:$28 sps:$4 sm:$0xff]  }
 0x1b4   :  { %6096 = vmatprep.subr.bf16.mxu1 %v6657_v22  ;;  %2954 = vmatprep.mubr.bf16.mxu1 %v7686_v35  ;;  %v6730_v22 = vld [vmem:[#allocation2 + $0x66c] ss:$28 sps:$4 sm:$0xff]  }
 0x1b6   :  { %2749 = vmatpush1.bf16.msra.mxu0 %v6658_v25  ;;  %v6731_v25 = vld [vmem:[#allocation2 + $0x8a0] ss:$28 sps:$4 sm:$0xff]  }
 0x1b7   :  { %6097 = vmatpush3.bf16.msra.mxu1 %v6661_v26  ;;  %2759 = vmatprep.subr.bf16.mxu0 %v6665_v28  ;;  %v6734_v26 = vld [vmem:[#allocation2 + $0x6a4] ss:$28 sps:$4 sm:$0xff]   ;;  %v6738_v28 = vld [vmem:[#allocation2 + $0xa98] ss:$28 sps:$4 sm:$0xff]  }
 0x1b8   :  { %6098 = vmatprep.subr.bf16.mxu1 %v6662_v27  ;;  %v6732_v27 = vld [vmem:[#allocation2 + $0x6a0] ss:$28 sps:$4 sm:$0xff]  }
 0x1b9   :  { %2751 = vmatmul.mubr.bf16.vlgmr.msra.gmra.mrb[4].mxu0 %v7675_v8  ;;  %v6681_v8 = vld [vmem:[#allocation2 + $0x4b0] ss:$28 sps:$4 sm:$0xff]  }
 0x1ba   :  { %2760 = vmatpush1.bf16.msra.mxu0 %v6663_v29  ;;  %2791 = vmatprep.mubr.bf16.mxu0 %v7686_v35  ;;  %v6686_v35 = vld [vmem:[#allocation2 + $0x4e8] ss:$28 sps:$4 sm:$0xff]   ;;  %v7481_v29 = vmov 0.0  }
 0x1bb   :  { %6099 = vmatpush3.bf16.msra.mxu1 %v6666_v30  ;;  %2761 = vmatprep.subr.bf16.mxu0 %v6670_v18  ;;  %v6737_v30 = vld [vmem:[#allocation2 + $0x6dc] ss:$28 sps:$4 sm:$0xff]  }
 0x1bc   :  { %6100 = vmatprep.subr.bf16.mxu1 %v6667_v31  ;;  %v6777_v31 = vld [vmem:[#allocation6 + $0x4] ss:$16 sps:$4 sm:$0xff]  }
 0x1bd   :  { %v6735_v18 = vld [vmem:[#allocation2 + $0x6d8] ss:$28 sps:$4 sm:$0xff]  }
 0x1be   :  { %2762 = vmatpush1.bf16.msra.mxu0 %v6668_v32  ;;  %v6741_v32 = vld [vmem:[#allocation2 + $0x714] ss:$28 sps:$4 sm:$0xff]  }
 0x1bf   :  { %6101 = vmatpush3.bf16.msra.mxu1 %v6671_v33  ;;  %2763 = vmatprep.subr.bf16.mxu0 %v6675_v36  ;;  %v6739_v33 = vld [vmem:[#allocation2 + $0x710] ss:$28 sps:$4 sm:$0xff]  }
 0x1c0   :  { %6102 = vmatprep.subr.bf16.mxu1 %v6672_v34  ;;  %v6744_v34 = vld [vmem:[#allocation2 + $0x74c] ss:$28 sps:$4 sm:$0xff]   ;;  %v6775_v36 = vld [vmem:[#allocation6] ss:$16 sps:$4 sm:$0xff]  }
 0x1c2   :  { %2764 = vmatpush1.bf16.msra.mxu0 %v6673_v37  ;;  %v6783_v37 = vld [vmem:[#allocation6 + $0x24] ss:$16 sps:$4 sm:$0xff]  }
 0x1c3   :  { %6103 = vmatpush3.bf16.msra.mxu1 %v6676_v38  ;;  %2765 = vmatprep.subr.bf16.mxu0 %v6680_v41  ;;  %v6742_v38 = vld [vmem:[#allocation2 + $0x748] ss:$28 sps:$4 sm:$0xff]   ;;  %v6781_v41 = vld [vmem:[#allocation6 + $0x20] ss:$16 sps:$4 sm:$0xff]  }
 0x1c4   :  { %6104 = vmatprep.subr.bf16.mxu1 %v6677_v39  ;;  %v6747_v39 = vld [vmem:[#allocation2 + $0x784] ss:$28 sps:$4 sm:$0xff]  }
 0x1c6   :  { %2766 = vmatpush1.bf16.msra.mxu0 %v6678_v42  ;;  %v6789_v42 = vld [vmem:[#allocation6 + $0x44] ss:$16 sps:$4 sm:$0xff]  }
 0x1c7   :  { %6105 = vmatpush3.bf16.msra.mxu1 %v6681_v8  ;;  %2767 = vmatprep.subr.bf16.mxu0 %v6685_v44  ;;  %v6745_v8 = vld [vmem:[#allocation2 + $0x780] ss:$28 sps:$4 sm:$0xff]  }
 0x1c8   :  { %6106 = vmatprep.subr.bf16.mxu1 %v6682_v43  ;;  %v6750_v43 = vld [vmem:[#allocation2 + $0x7bc] ss:$28 sps:$4 sm:$0xff]   ;;  %v6787_v44 = vld [vmem:[#allocation6 + $0x40] ss:$16 sps:$4 sm:$0xff]  }
 0x1ca   :  { %2768 = vmatpush1.bf16.msra.mxu0 %v6683_v45  ;;  %v6795_v45 = vld [vmem:[#allocation6 + $0x64] ss:$16 sps:$4 sm:$0xff]  }
 0x1cb   :  { %6107 = vmatpush3.bf16.msra.mxu1 %v6686_v35  ;;  %2769 = vmatprep.subr.bf16.mxu0 %v6690_v47  ;;  %v6753_v35 = vld [vmem:[#allocation2 + $0x7f4] ss:$28 sps:$4 sm:$0xff]  }
 0x1cc   :  { %6108 = vmatprep.subr.bf16.mxu1 %v6687_v46  ;;  %v6801_v46 = vld [vmem:[#allocation6 + $0x84] ss:$16 sps:$4 sm:$0xff]   ;;  %v6751_v47 = vld [vmem:[#allocation2 + $0x7f0] ss:$28 sps:$4 sm:$0xff]  }
 0x1ce   :  { %2770 = vmatpush1.bf16.msra.mxu0 %v6688_v49  ;;  %v6756_v49 = vld [vmem:[#allocation2 + $0x82c] ss:$28 sps:$4 sm:$0xff]  }
 0x1cf   :  { %6109 = vmatpush3.bf16.msra.mxu1 %v6691_v51  ;;  %2771 = vmatprep.subr.bf16.mxu0 %v6695_v54  ;;  %v6807_v51 = vld [vmem:[#allocation6 + $0xa4] ss:$16 sps:$4 sm:$0xff]  }
 0x1d0   :  { %6116 = vmatprep.subr.bf16.mxu1 %v6692_v53  ;;  %v6754_v53 = vld [vmem:[#allocation2 + $0x828] ss:$28 sps:$4 sm:$0xff]  }
 0x1d1   :  { %v6759_v54 = vld [vmem:[#allocation2 + $0x864] ss:$28 sps:$4 sm:$0xff]  }
 0x1d2   :  { %2955 = vmatmul.mubr.bf16.vlgmr.msra.gmra.mrb[16].mxu1 %v7692_v15  ;;  %2772 = vmatpush1.bf16.msra.mxu0 %v6693_v55  ;;  %v6805_v55 = vld [vmem:[#allocation6 + $0xa0] ss:$16 sps:$4 sm:$0xff]  }
 0x1d3   :  { %6117 = vmatpush3.bf16.msra.mxu1 %v6696_v56  ;;  %2773 = vmatprep.subr.bf16.mxu0 %v6700_v58  ;;  %v6813_v56 = vld [vmem:[#allocation6 + $0xc4] ss:$16 sps:$4 sm:$0xff]   ;;  %v6762_v58 = vld [vmem:[#allocation2 + $0x89c] ss:$28 sps:$4 sm:$0xff]  }
 0x1d4   :  { %6118 = vmatprep.subr.bf16.mxu1 %v6697_v57  ;;  %2994 = vmatprep.mubr.bf16.mxu1 %v7701_v19  ;;  %v6757_v57 = vld [vmem:[#allocation2 + $0x860] ss:$28 sps:$4 sm:$0xff]  }
 0x1d6   :  { %2774 = vmatpush1.bf16.msra.mxu0 %v6698_v59  ;;  %v6811_v59 = vld [vmem:[#allocation6 + $0xc0] ss:$16 sps:$4 sm:$0xff]  }
 0x1d7   :  { %6119 = vmatpush3.bf16.msra.mxu1 %v6701_v60  ;;  %2775 = vmatprep.subr.bf16.mxu0 %v6705_v62  ;;  %v6819_v60 = vld [vmem:[#allocation6 + $0xe4] ss:$16 sps:$4 sm:$0xff]  }
 0x1d8   :  { %6120 = vmatprep.subr.bf16.mxu1 %v6702_v61  ;;  %v6760_v61 = vld [vmem:[#allocation2 + $0x898] ss:$28 sps:$4 sm:$0xff]  }
 0x1d9   :  { %v6765_v62 = vld [vmem:[#allocation2 + $0x8d4] ss:$28 sps:$4 sm:$0xff]  }
 0x1da   :  { %2776 = vmatpush1.bf16.msra.mxu0 %v6703_v63  ;;  %v6817_v63 = vld [vmem:[#allocation6 + $0xe0] ss:$16 sps:$4 sm:$0xff]  }
 0x1db   :  { %6121 = vmatpush3.bf16.msra.mxu1 %v6706_v1  ;;  %2777 = vmatprep.subr.bf16.mxu0 %v6710_v52  ;;  %v6825_v1 = vld [vmem:[#allocation6 + $0x104] ss:$16 sps:$4 sm:$0xff]   ;;  %v6768_v52 = vld [vmem:[#allocation2 + $0x90c] ss:$28 sps:$4 sm:$0xff]  }
 0x1dc   :  { %6122 = vmatprep.subr.bf16.mxu1 %v6707_v2  ;;  %v6763_v2 = vld [vmem:[#allocation2 + $0x8d0] ss:$28 sps:$4 sm:$0xff]  }
 0x1de   :  { %2778 = vmatpush1.bf16.msra.mxu0 %v6708_v3  ;;  %v6823_v3 = vld [vmem:[#allocation6 + $0x100] ss:$16 sps:$4 sm:$0xff]  }
 0x1df   :  { %6123 = vmatpush3.bf16.msra.mxu1 %v6711_v4  ;;  %2779 = vmatprep.subr.bf16.mxu0 %v6715_v6  ;;  %v6831_v4 = vld [vmem:[#allocation6 + $0x124] ss:$16 sps:$4 sm:$0xff]  }
 0x1e0   :  { %6124 = vmatprep.subr.bf16.mxu1 %v6712_v5  ;;  %v6766_v5 = vld [vmem:[#allocation2 + $0x908] ss:$28 sps:$4 sm:$0xff]  }
 0x1e1   :  { %v6771_v6 = vld [vmem:[#allocation2 + $0x944] ss:$28 sps:$4 sm:$0xff]  }
 0x1e2   :  { %2780 = vmatpush1.bf16.msra.mxu0 %v6713_v7  ;;  %v6829_v7 = vld [vmem:[#allocation6 + $0x120] ss:$16 sps:$4 sm:$0xff]  }
 0x1e3   :  { %6125 = vmatpush3.bf16.msra.mxu1 %v6716_v9  ;;  %2781 = vmatprep.subr.bf16.mxu0 %v6720_v11  ;;  %v6837_v9 = vld [vmem:[#allocation6 + $0x144] ss:$16 sps:$4 sm:$0xff]   ;;  %v6774_v11 = vld [vmem:[#allocation2 + $0x97c] ss:$28 sps:$4 sm:$0xff]  }
 0x1e4   :  { %6126 = vmatprep.subr.bf16.mxu1 %v6717_v10  ;;  %v6769_v10 = vld [vmem:[#allocation2 + $0x940] ss:$28 sps:$4 sm:$0xff]  }
 0x1e6   :  { %2782 = vmatpush1.bf16.msra.mxu0 %v6718_v12  ;;  %v6835_v12 = vld [vmem:[#allocation6 + $0x140] ss:$16 sps:$4 sm:$0xff]  }
 0x1e7   :  { %6127 = vmatpush3.bf16.msra.mxu1 %v6721_v13  ;;  %2783 = vmatprep.subr.bf16.mxu0 %v6725_v16  ;;  %v6843_v13 = vld [vmem:[#allocation6 + $0x164] ss:$16 sps:$4 sm:$0xff]  }
 0x1e8   :  { %6128 = vmatprep.subr.bf16.mxu1 %v6722_v14  ;;  %v6772_v14 = vld [vmem:[#allocation2 + $0x978] ss:$28 sps:$4 sm:$0xff]  }
 0x1e9   :  { %v6780_v16 = vld [vmem:[#allocation2 + $0x9b4] ss:$28 sps:$4 sm:$0xff]  }
 0x1ea   :  { %2784 = vmatpush1.bf16.msra.mxu0 %v6723_v17  ;;  %v6841_v17 = vld [vmem:[#allocation6 + $0x160] ss:$16 sps:$4 sm:$0xff]  }
 0x1eb   :  { %6129 = vmatpush3.bf16.msra.mxu1 %v6726_v20  ;;  %2785 = vmatprep.subr.bf16.mxu0 %v6730_v22  ;;  %v6849_v20 = vld [vmem:[#allocation6 + $0x184] ss:$16 sps:$4 sm:$0xff]   ;;  %v6847_v22 = vld [vmem:[#allocation6 + $0x180] ss:$16 sps:$4 sm:$0xff]  }
 0x1ec   :  { %6130 = vmatprep.subr.bf16.mxu1 %v6727_v21  ;;  %v6778_v21 = vld [vmem:[#allocation2 + $0x9b0] ss:$28 sps:$4 sm:$0xff]  }
 0x1ee   :  { %2786 = vmatpush1.bf16.msra.mxu0 %v6728_v24  ;;  %v6786_v24 = vld [vmem:[#allocation2 + $0x9ec] ss:$28 sps:$4 sm:$0xff]  }
 0x1ef   :  { %6131 = vmatpush3.bf16.msra.mxu1 %v6731_v25  ;;  %2787 = vmatprep.subr.bf16.mxu0 %v6734_v26  ;;  %v6855_v25 = vld [vmem:[#allocation6 + $0x1a4] ss:$16 sps:$4 sm:$0xff]  }
 0x1f0   :  { %6171 = vmatprep.subr.bf16.mxu1 %v7481_v29  ;;  %v6784_v26 = vld [vmem:[#allocation2 + $0x9e8] ss:$28 sps:$4 sm:$0xff]  }
 0x1f2   :  { %2995 = vmatmul.mubr.bf16.vlgmr.msra.gmra.mrb[20].mxu1 %v7709_v23  ;;  %2788 = vmatpush1.bf16.msra.mxu0 %v6732_v27  ;;  %v6792_v27 = vld [vmem:[#allocation2 + $0xa24] ss:$28 sps:$4 sm:$0xff]  }
 0x1f3   :  { %6172 = vmatpush3.bf16.msra.mxu1 %v6738_v28  ;;  %2789 = vmatprep.subr.bf16.mxu0 %v6737_v30  ;;  %v6853_v28 = vld [vmem:[#allocation6 + $0x1a0] ss:$16 sps:$4 sm:$0xff]   ;;  %v6861_v30 = vld [vmem:[#allocation6 + $0x1c4] ss:$16 sps:$4 sm:$0xff]  }
 0x1f4   :  { %6173 = vmatprep.mubr.msk.bf16.mxu1 %vm7482_vm1, %v7481_v29  ;;  %4285 = vmatprep.subr.bf16.mxu1 %v6777_v31  ;;  %v6790_v31 = vld [vmem:[#allocation2 + $0xa20] ss:$28 sps:$4 sm:$0xff]  }
 0x1f6   :  { %2790 = vmatpush1.bf16.msra.mxu0 %v6735_v18  ;;  %v6798_v18 = vld [vmem:[#allocation2 + $0xa5c] ss:$28 sps:$4 sm:$0xff]  }
 0x1f7   :  { %2800 = vmatprep.subr.bf16.mxu0 %v6741_v32  ;;  %v6859_v32 = vld [vmem:[#allocation6 + $0x1c0] ss:$16 sps:$4 sm:$0xff]  }
 0x1f9   :  { %2792 = vmatmul.mubr.bf16.vlgmr.msra.gmra.mrb[4].mxu0 %v7692_v15  ;;  %v6793_v15 = vld [vmem:[#allocation6 + $0x60] ss:$16 sps:$4 sm:$0xff]  }
 0x1fa   :  { %6174 = vmatmul.mubr.msk.bf16.vlgmr.msra.gmra.mrb[24].mxu1 %vm2386_vm0, %v7718_v40  ;;  %2801 = vmatpush1.bf16.msra.mxu0 %v6739_v33  ;;  %v6748_v40 = vld [vmem:[#allocation2 + $0x7b8] ss:$28 sps:$4 sm:$0xff]  }
 0x1fb   :  { %4286 = vmatpush1.bf16.msra.mxu1 %v6775_v36  ;;  %2802 = vmatprep.subr.bf16.mxu0 %v6744_v34  ;;  %v6867_v33 = vld [vmem:[#allocation6 + $0x1e4] ss:$16 sps:$4 sm:$0xff]   ;;  %v6804_v36 = vld [vmem:[#allocation6 + $0xc] ss:$16 sps:$4 sm:$0xff]  }
 0x1fc   :  { %4287 = vmatprep.subr.bf16.mxu1 %v6783_v37  ;;  %2832 = vmatprep.mubr.bf16.mxu0 %v7701_v19  ;;  %v6799_v19 = vld [vmem:[#allocation6 + $0x80] ss:$16 sps:$4 sm:$0xff]   ;;  %v6796_v34 = vld [vmem:[#allocation2 + $0xa58] ss:$28 sps:$4 sm:$0xff]  }
 0x1fd   :  { %v6865_v37 = vld [vmem:[#allocation6 + $0x1e0] ss:$16 sps:$4 sm:$0xff]  }
 0x1fe   :  { %2803 = vmatpush1.bf16.msra.mxu0 %v6742_v38  ;;  %v6873_v38 = vld [vmem:[#allocation6 + $0x204] ss:$16 sps:$4 sm:$0xff]  }
 0x1ff   :  { %4288 = vmatpush1.bf16.msra.mxu1 %v6781_v41  ;;  %2804 = vmatprep.subr.bf16.mxu0 %v6747_v39  ;;  %v6802_v39 = vld [vmem:[#allocation6 + $0x8] ss:$16 sps:$4 sm:$0xff]   ;;  %v6810_v41 = vld [vmem:[#allocation6 + $0x2c] ss:$16 sps:$4 sm:$0xff]  }
 0x200   :  { %4289 = vmatprep.subr.bf16.mxu1 %v6789_v42  ;;  %v6808_v42 = vld [vmem:[#allocation6 + $0x28] ss:$16 sps:$4 sm:$0xff]  }
 0x202   :  { %2805 = vmatpush1.bf16.msra.mxu0 %v6745_v8  ;;  %v6816_v8 = vld [vmem:[#allocation6 + $0x4c] ss:$16 sps:$4 sm:$0xff]  }
 0x203   :  { %4290 = vmatpush1.bf16.msra.mxu1 %v6787_v44  ;;  %2806 = vmatprep.subr.bf16.mxu0 %v6750_v43  ;;  %v563_v43 = vlaneseq  ;;  %v6814_v44 = vld [vmem:[#allocation6 + $0x48] ss:$16 sps:$4 sm:$0xff]  }
 0x204   :  { %4291 = vmatprep.subr.bf16.mxu1 %v6795_v45  ;;  %v6822_v45 = vld [vmem:[#allocation6 + $0x6c] ss:$16 sps:$4 sm:$0xff]  }
 0x206   :  { %2807 = vmatpush1.bf16.msra.mxu0 %v6748_v40  ;;  %v7745_v40 = vshrl.u32 %v563_v43, 7 }
 0x207   :  { %4292 = vmatpush1.bf16.msra.mxu1 %v6793_v15  ;;  %2808 = vmatprep.subr.bf16.mxu0 %v6753_v35  ;;  %v6820_v35 = vld [vmem:[#allocation6 + $0x68] ss:$16 sps:$4 sm:$0xff]   ;;  %v6828_v15 = vld [vmem:[#allocation6 + $0x8c] ss:$16 sps:$4 sm:$0xff]  }
 0x208   :  { %4293 = vmatprep.subr.bf16.mxu1 %v6801_v46  ;;  %v7748_v46 = vsub.s32 0, %v7745_v40 }
 0x20a   :  { %2809 = vmatpush1.bf16.msra.mxu0 %v6751_v47  ;;  %v6826_v47 = vld [vmem:[#allocation6 + $0x88] ss:$16 sps:$4 sm:$0xff]  }
 0x20b   :  { %4294 = vmatpush1.bf16.msra.mxu1 %v6799_v19  ;;  %2810 = vmatprep.subr.bf16.mxu0 %v6756_v49  ;;  %v7753_v49 = vsub.s32 1, %v7745_v40  ;;  %v6834_v19 = vld [vmem:[#allocation6 + $0xac] ss:$16 sps:$4 sm:$0xff]  }
 0x20c   :  { %4295 = vmatprep.subr.bf16.mxu1 %v6807_v51 }
 0x20e   :  { %2811 = vmatpush1.bf16.msra.mxu0 %v6754_v53 }
 0x20f   :  { %4296 = vmatpush1.bf16.msra.mxu1 %v6805_v55  ;;  %2812 = vmatprep.subr.bf16.mxu0 %v6759_v54  ;;  %v6832_v54 = vld [vmem:[#allocation6 + $0xa8] ss:$16 sps:$4 sm:$0xff]   ;;  %v6840_v55 = vld [vmem:[#allocation6 + $0xcc] ss:$16 sps:$4 sm:$0xff]  }
 0x210   :  { %4297 = vmatprep.subr.bf16.mxu1 %v6813_v56 }
 0x212   :  { %2813 = vmatpush1.bf16.msra.mxu0 %v6757_v57 }
 0x213   :  { %4298 = vmatpush1.bf16.msra.mxu1 %v6811_v59  ;;  %2814 = vmatprep.subr.bf16.mxu0 %v6762_v58 }
 0x214   :  { %4299 = vmatprep.subr.bf16.mxu1 %v6819_v60 }
 0x216   :  { %2815 = vmatpush1.bf16.msra.mxu0 %v6760_v61  ;;  %v6838_v61 = vld [vmem:[#allocation6 + $0xc8] ss:$16 sps:$4 sm:$0xff]  }
 0x217   :  { %4300 = vmatpush1.bf16.msra.mxu1 %v6817_v63  ;;  %2816 = vmatprep.subr.bf16.mxu0 %v6765_v62 }
 0x218   :  { %4301 = vmatprep.subr.bf16.mxu1 %v6825_v1  ;;  %v6846_v1 = vld [vmem:[#allocation6 + $0xec] ss:$16 sps:$4 sm:$0xff]  }
 0x21a   :  { %2817 = vmatpush1.bf16.msra.mxu0 %v6763_v2 }
 0x21b   :  { %4302 = vmatpush1.bf16.msra.mxu1 %v6823_v3  ;;  %2818 = vmatprep.subr.bf16.mxu0 %v6768_v52 }
 0x21c   :  { %4303 = vmatprep.subr.bf16.mxu1 %v6831_v4  ;;  %v6844_v4 = vld [vmem:[#allocation6 + $0xe8] ss:$16 sps:$4 sm:$0xff]  }
 0x21e   :  { %2819 = vmatpush1.bf16.msra.mxu0 %v6766_v5  ;;  %v6852_v5 = vld [vmem:[#allocation6 + $0x10c] ss:$16 sps:$4 sm:$0xff]  }
 0x21f   :  { %4304 = vmatpush1.bf16.msra.mxu1 %v6829_v7  ;;  %2820 = vmatprep.subr.bf16.mxu0 %v6771_v6  ;;  %v6850_v6 = vld [vmem:[#allocation6 + $0x108] ss:$16 sps:$4 sm:$0xff]   ;;  %v577_v7 = vsub.s32 3, %v7745_v40 }
 0x220   :  { %4305 = vmatprep.subr.bf16.mxu1 %v6837_v9  ;;  %v6858_v9 = vld [vmem:[#allocation6 + $0x12c] ss:$16 sps:$4 sm:$0xff]  }
 0x222   :  { %2821 = vmatpush1.bf16.msra.mxu0 %v6769_v10  ;;  %v6864_v10 = vld [vmem:[#allocation6 + $0x14c] ss:$16 sps:$4 sm:$0xff]  }
 0x223   :  { %4306 = vmatpush1.bf16.msra.mxu1 %v6835_v12  ;;  %2822 = vmatprep.subr.bf16.mxu0 %v6774_v11 }
 0x224   :  { %4307 = vmatprep.subr.bf16.mxu1 %v6843_v13 }
 0x226   :  { %2823 = vmatpush1.bf16.msra.mxu0 %v6772_v14 }
 0x227   :  { %4308 = vmatpush1.bf16.msra.mxu1 %v6841_v17  ;;  %2824 = vmatprep.subr.bf16.mxu0 %v6780_v16 }
 0x228   :  { %4309 = vmatprep.subr.bf16.mxu1 %v6849_v20 }
 0x22a   :  { %2825 = vmatpush1.bf16.msra.mxu0 %v6778_v21  ;;  %v6862_v21 = vld [vmem:[#allocation6 + $0x148] ss:$16 sps:$4 sm:$0xff]  }
 0x22b   :  { %4310 = vmatpush1.bf16.msra.mxu1 %v6847_v22  ;;  %2826 = vmatprep.subr.bf16.mxu0 %v6786_v24  ;;  %v6870_v24 = vld [vmem:[#allocation6 + $0x16c] ss:$16 sps:$4 sm:$0xff]  }
 0x22c   :  { %4311 = vmatprep.subr.bf16.mxu1 %v6855_v25 }
 0x22e   :  { %2827 = vmatpush1.bf16.msra.mxu0 %v6784_v26 }
 0x22f   :  { %4312 = vmatpush1.bf16.msra.mxu1 %v6853_v28  ;;  %2828 = vmatprep.subr.bf16.mxu0 %v6792_v27 }
 0x230   :  { %4313 = vmatprep.subr.bf16.mxu1 %v6861_v30 }
 0x232   :  { %2829 = vmatpush1.bf16.msra.mxu0 %v6790_v31  ;;  %v6868_v31 = vld [vmem:[#allocation6 + $0x168] ss:$16 sps:$4 sm:$0xff]  }
 0x233   :  { %4314 = vmatpush1.bf16.msra.mxu1 %v6859_v32  ;;  %2830 = vmatprep.subr.bf16.mxu0 %v6798_v18  ;;  %v6876_v32 = vld [vmem:[#allocation6 + $0x18c] ss:$16 sps:$4 sm:$0xff]  }
 0x234   :  { %4315 = vmatprep.subr.bf16.mxu1 %v6867_v33 }
 0x236   :  { %2831 = vmatpush1.bf16.msra.mxu0 %v6796_v34 }
 0x237   :  { %4316 = vmatpush1.bf16.msra.mxu1 %v6865_v37  ;;  %4449 = vmatprep.subr.bf16.mxu0 %v6804_v36  ;;  %v6871_v36 = vld [vmem:[#allocation6 + $0x200] ss:$16 sps:$4 sm:$0xff]  }
 0x238   :  { %4326 = vmatprep.subr.bf16.mxu1 %v6873_v38 }
 0x239   :  { %2833 = vmatmul.mubr.bf16.vlgmr.msra.gmra.mrb[4].mxu0 %v7709_v23  ;;  %v7750_v23 = vld [vmem:[#allocation4] sm:$0x7f] }
 0x23a   :  { %4450 = vmatpush1.bf16.msra.mxu0 %v6802_v39  ;;  %v566_v51 = vrot.slane %v7750_v23, %v7748_v46  ;;  %v570_v53 = vrot.slane %v7750_v23, %v7753_v49  ;;  %v6874_v39 = vld [vmem:[#allocation6 + $0x188] ss:$16 sps:$4 sm:$0xff]  }
 0x23b   :  { %4451 = vmatprep.subr.bf16.mxu0 %v6810_v41  ;;  %v6879_v41 = vld [vmem:[#allocation6 + $0x224] ss:$16 sps:$4 sm:$0xff]  }
 0x23e   :  { %4452 = vmatpush1.bf16.msra.mxu0 %v6808_v42 }
 0x23f   :  { %4453 = vmatprep.subr.bf16.mxu0 %v6816_v8  ;;  %v6882_v8 = vld [vmem:[#allocation6 + $0x1ac] ss:$16 sps:$4 sm:$0xff]  }
 0x242   :  { %4454 = vmatpush1.bf16.msra.mxu0 %v6814_v44  ;;  %v6877_v44 = vld [vmem:[#allocation6 + $0x220] ss:$16 sps:$4 sm:$0xff]  }
 0x243   :  { %4455 = vmatprep.subr.bf16.mxu0 %v6822_v45  ;;  %v6880_v45 = vld [vmem:[#allocation6 + $0x1a8] ss:$16 sps:$4 sm:$0xff]  }
 0x246   :  { %4456 = vmatpush1.bf16.msra.mxu0 %v6820_v35  ;;  %v6885_v35 = vld [vmem:[#allocation6 + $0x244] ss:$16 sps:$4 sm:$0xff]  }
 0x247   :  { %4457 = vmatprep.subr.bf16.mxu0 %v6828_v15  ;;  %v6888_v15 = vld [vmem:[#allocation6 + $0x1cc] ss:$16 sps:$4 sm:$0xff]  }
 0x24a   :  { %4458 = vmatpush1.bf16.msra.mxu0 %v6826_v47 }
 0x24b   :  { %4459 = vmatprep.subr.bf16.mxu0 %v6834_v19 }
 0x24c   :  { %v2506_v56 = vpop.f32.mrb[0].mxu0 }
 0x24d   :  { %v6197_v57 = vadd.f32 %v2506_v56, %v566_v51  ;;  %v2508_v58 = vpop.f32.mrb[1].mxu0  ;;  %v6883_v51 = vld [vmem:[#allocation6 + $0x240] ss:$16 sps:$4 sm:$0xff]   ;;  %v6894_v56 = vld [vmem:[#allocation6 + $0x1ec] ss:$16 sps:$4 sm:$0xff]  }
 0x24e   :  { %v6199_v59 = vadd.f32 %v2508_v58, %v570_v53  ;;  %v2510_v60 = vpop.f32.mrb[2].mxu0  ;;  %4460 = vmatpush1.bf16.msra.mxu0 %v6832_v54  ;;  %v6886_v53 = vld [vmem:[#allocation6 + $0x1c8] ss:$16 sps:$4 sm:$0xff]   ;;  %v6891_v54 = vld [vmem:[#allocation6 + $0x264] ss:$16 sps:$4 sm:$0xff]  }
 0x24f   :  { %v6198_v62 = vadd.f32 %v6197_v57, %v7723_v48  ;;  %v2511_v63 = vpop.f32.mrb[3].mxu0  ;;  %4461 = vmatprep.subr.bf16.mxu0 %v6840_v55  ;;  %v578_v48 = vrot.slane %v7750_v23, %v577_v7  ;;  %v6889_v58 = vld [vmem:[#allocation6 + $0x260] ss:$16 sps:$4 sm:$0xff]   ;;  %v6897_v60 = vld [vmem:[#allocation6 + $0x284] ss:$16 sps:$4 sm:$0xff]  }
 0x250   :  { %v6200_v2 = vadd.f32 %v6199_v59, %v7727_v50  ;;  %v6856_v50 = vld [vmem:[#allocation6 + $0x128] ss:$16 sps:$4 sm:$0xff]   ;;  %v6895_v63 = vld [vmem:[#allocation6 + $0x280] ss:$16 sps:$4 sm:$0xff]  }
 0x251   :  { %v3042_v52 = vmul.f32 0.5, %v6198_v62  ;;  %v6892_v59 = vld [vmem:[#allocation6 + $0x1e8] ss:$16 sps:$4 sm:$0xff]  }
 0x252   :  { %v3043_v3 = vmul.f32 0.5, %v6200_v2  ;;  %4462 = vmatpush1.bf16.msra.mxu0 %v6838_v61 }
 0x253   :  { %7201 = vtanh.f32 %v3042_v52  ;;  %4463 = vmatprep.subr.bf16.mxu0 %v6846_v1  ;;  %v6898_v1 = vld [vmem:[#allocation6 + $0x208] ss:$16 sps:$4 sm:$0xff]   ;;  %v6906_v52 = vld [vmem:[#allocation6 + $0x22c] ss:$16 sps:$4 sm:$0xff]  }
 0x254   :  { %7203 = vtanh.f32 %v3043_v3  ;;  %v6901_v3 = vld [vmem:[#allocation6 + $0x2a0] ss:$16 sps:$4 sm:$0xff]  }
 0x256   :  { %4464 = vmatpush1.bf16.msra.mxu0 %v6844_v4  ;;  %v6904_v4 = vld [vmem:[#allocation6 + $0x228] ss:$16 sps:$4 sm:$0xff]  }
 0x257   :  { %4465 = vmatprep.subr.bf16.mxu0 %v6852_v5  ;;  %v6909_v5 = vld [vmem:[#allocation6 + $0x2c4] ss:$16 sps:$4 sm:$0xff]  }
 0x25a   :  { %4466 = vmatpush1.bf16.msra.mxu0 %v6850_v6  ;;  %v6912_v6 = vld [vmem:[#allocation6 + $0x24c] ss:$16 sps:$4 sm:$0xff]  }
 0x25b   :  { %4467 = vmatprep.subr.bf16.mxu0 %v6858_v9  ;;  %v573_v9 = vsub.s32 2, %v7745_v40 }
 0x25d   :  { %v7765_v11 = vpop.f32.mrb[4].mxu1  ;;  %v7202_v12 = vpop.eup %7201 }
 0x25e   :  { %v2713_v13 = vpop.f32.mrb[5].mxu1  ;;  %v7204_v14 = vpop.eup %7203  ;;  %v3056_v16 = vmul.f32 0.5, %v7202_v12  ;;  %4468 = vmatpush1.bf16.msra.mxu0 %v6856_v50  ;;  %v6910_v50 = vld [vmem:[#allocation6 + $0x248] ss:$16 sps:$4 sm:$0xff]   ;;  %v6918_v12 = vld [vmem:[#allocation6 + $0x26c] ss:$16 sps:$4 sm:$0xff]  }
 0x25f   :  { %v6202_v17 = vadd.f32 %v2713_v13, %v578_v48  ;;  %v2715_v20 = vpop.f32.mrb[6].mxu1  ;;  %4469 = vmatprep.subr.bf16.mxu0 %v6864_v10  ;;  %v3057_v25 = vmul.f32 0.5, %v7204_v14  ;;  %v6907_v48 = vld [vmem:[#allocation6 + $0x2c0] ss:$16 sps:$4 sm:$0xff]   ;;  %v6915_v10 = vld [vmem:[#allocation6 + $0x2e4] ss:$16 sps:$4 sm:$0xff]   ;;  %v574_v13 = vrot.slane %v7750_v23, %v573_v9 }
 0x260   :  { %v2716_v22 = vpop.f32.mrb[7].mxu1  ;;  %v3063_v26 = vadd.f32 0.5, %v3056_v16  ;;  %v6913_v14 = vld [vmem:[#allocation6 + $0x2e0] ss:$16 sps:$4 sm:$0xff]   ;;  %v6916_v16 = vld [vmem:[#allocation6 + $0x268] ss:$16 sps:$4 sm:$0xff]  }
 0x261   :  { %v3045_v27 = vmul.f32 0.5, %v6202_v17  ;;  %v3064_v28 = vadd.f32 0.5, %v3057_v25  ;;  %v6924_v20 = vld [vmem:[#allocation6 + $0x28c] ss:$16 sps:$4 sm:$0xff]   ;;  %v7776_v22 = vadd.f32 %v7765_v11, %v574_v13  ;;  %v6928_v11 = vld [vmem:[#allocation6 + $0x2a8] ss:$16 sps:$4 sm:$0xff]  }
 0x262   :  { %v3070_v30 = vmul.f32 %v6198_v62, %v3063_v26  ;;  %4470 = vmatpush1.bf16.msra.mxu0 %v6862_v21  ;;  %v6900_v62 = vld [vmem:[#allocation6 + $0x20c] ss:$16 sps:$4 sm:$0xff]   ;;  %v6922_v26 = vld [vmem:[#allocation6 + $0x288] ss:$16 sps:$4 sm:$0xff]  }
 0x263   :  { %7205 = vtanh.f32 %v3045_v27  ;;  %4471 = vmatprep.subr.bf16.mxu0 %v6870_v24  ;;  %v3071_v18 = vmul.f32 %v6200_v2, %v3064_v28  ;;  %v6903_v2 = vld [vmem:[#allocation6 + $0x2a4] ss:$16 sps:$4 sm:$0xff]   ;;  %v6919_v24 = vld [vmem:[#allocation6 + $0x300] ss:$16 sps:$4 sm:$0xff]  }
 0x264   :  { %v3077_v38 = vpack.c.bf16 %v3070_v30, %v3070_v30  ;;  %v6927_v27 = vld [vmem:[#allocation6 + $0x324] ss:$16 sps:$4 sm:$0xff]  }
 0x265   :  { %v7767_v33 = vpop.f32.mrb[8].mxu1  ;;  %v3078_v34 = vpack.c.bf16 %v3071_v18, %v3071_v18 }
 0x266   :  { %v7769_v37 = vpop.f32.mrb[9].mxu1  ;;  %4472 = vmatpush1.bf16.msra.mxu0 %v6868_v31  ;;  %v6930_v31 = vld [vmem:[#allocation6 + $0x2ac] ss:$16 sps:$4 sm:$0xff]  }
 0x267   :  { %v2879_v42 = vpop.f32.mrb[10].mxu1  ;;  %4317 = vmatprep.mubr.bf16.mxu1 %v3078_v34  ;;  %4481 = vmatprep.mubr.bf16.mxu0 %v3078_v34  ;;  %v6925_v34 = vld [vmem:[#allocation6 + $0x320] ss:$16 sps:$4 sm:$0xff]  }
 0x268   :  { %v2880_v43 = vpop.f32.mrb[11].mxu1  ;;  %4318 = vmatmul.mubr.bf16.vlgmr.msra.gmra.mrb[28].mxu1 %v3077_v38  ;;  %4473 = vmatprep.subr.bf16.mxu0 %v6876_v32  ;;  %v3044_v32 = vmul.f32 0.5, %v7776_v22  ;;  %v6939_v42 = vld [vmem:[#allocation6 + $0x364] ss:$16 sps:$4 sm:$0xff]  }
 0x269   :  { %4327 = vmatpush1.bf16.msra.mxu1 %v6871_v36  ;;  %v6933_v36 = vld [vmem:[#allocation6 + $0x344] ss:$16 sps:$4 sm:$0xff]   ;;  %v6937_v43 = vld [vmem:[#allocation6 + $0x360] ss:$16 sps:$4 sm:$0xff]  }
 0x26a   :  { %4474 = vmatpush1.bf16.msra.mxu0 %v6874_v39  ;;  %4328 = vmatprep.subr.bf16.mxu1 %v6879_v41  ;;  %7207 = vtanh.f32 %v3044_v32  ;;  %v6931_v39 = vld [vmem:[#allocation6 + $0x340] ss:$16 sps:$4 sm:$0xff]   ;;  %v6934_v41 = vld [vmem:[#allocation6 + $0x2c8] ss:$16 sps:$4 sm:$0xff]   ;;  %v6978_v32 = vld [vmem:[#allocation6 + $0x3ec] ss:$16 sps:$4 sm:$0xff]  }
 0x26b   :  { %4475 = vmatprep.subr.bf16.mxu0 %v6882_v8  ;;  %v6942_v8 = vld [vmem:[#allocation6 + $0x2ec] ss:$16 sps:$4 sm:$0xff]  }
 0x26d   :  { %v7206_v47 = vpop.eup %7205  ;;  %4329 = vmatpush1.bf16.msra.mxu1 %v6877_v44  ;;  %v6940_v44 = vld [vmem:[#allocation6 + $0x2e8] ss:$16 sps:$4 sm:$0xff]  }
 0x26e   :  { %v3059_v19 = vmul.f32 0.5, %v7206_v47  ;;  %4476 = vmatpush1.bf16.msra.mxu0 %v6880_v45  ;;  %4330 = vmatprep.subr.bf16.mxu1 %v6885_v35  ;;  %v6945_v45 = vld [vmem:[#allocation6 + $0x384] ss:$16 sps:$4 sm:$0xff]   ;;  %v6948_v35 = vld [vmem:[#allocation6 + $0x30c] ss:$16 sps:$4 sm:$0xff]  }
 0x26f   :  { %4477 = vmatprep.subr.bf16.mxu0 %v6888_v15  ;;  %v6943_v15 = vld [vmem:[#allocation6 + $0x380] ss:$16 sps:$4 sm:$0xff]   ;;  %v6946_v47 = vld [vmem:[#allocation6 + $0x308] ss:$16 sps:$4 sm:$0xff]  }
 0x270   :  { %v3066_v55 = vadd.f32 0.5, %v3059_v19  ;;  %v6951_v19 = vld [vmem:[#allocation6 + $0x3a4] ss:$16 sps:$4 sm:$0xff]  }
 0x271   :  { %4331 = vmatpush1.bf16.msra.mxu1 %v6883_v51 }
 0x272   :  { %v3073_v57 = vmul.f32 %v6202_v17, %v3066_v55  ;;  %4478 = vmatpush1.bf16.msra.mxu0 %v6886_v53  ;;  %4332 = vmatprep.subr.bf16.mxu1 %v6891_v54  ;;  %v6921_v17 = vld [vmem:[#allocation6 + $0x304] ss:$16 sps:$4 sm:$0xff]   ;;  %v6954_v53 = vld [vmem:[#allocation6 + $0x32c] ss:$16 sps:$4 sm:$0xff]   ;;  %v6949_v54 = vld [vmem:[#allocation6 + $0x3a0] ss:$16 sps:$4 sm:$0xff]  }
 0x273   :  { %4479 = vmatprep.subr.bf16.mxu0 %v6894_v56  ;;  %v6952_v56 = vld [vmem:[#allocation6 + $0x328] ss:$16 sps:$4 sm:$0xff]  }
 0x274   :  { %v3080_v61 = vpack.c.bf16 %v3073_v57, %v3073_v57  ;;  %v7208_v51 = vpop.eup %7207  ;;  %v6957_v57 = vld [vmem:[#allocation6 + $0x3c4] ss:$16 sps:$4 sm:$0xff]  }
 0x275   :  { %4333 = vmatpush1.bf16.msra.mxu1 %v6889_v58  ;;  %v3058_v55 = vmul.f32 0.5, %v7208_v51  ;;  %v6960_v58 = vld [vmem:[#allocation6 + $0x34c] ss:$16 sps:$4 sm:$0xff]  }
 0x276   :  { %4358 = vmatprep.mubr.bf16.mxu1 %v3080_v61  ;;  %4480 = vmatpush1.bf16.msra.mxu0 %v6892_v59  ;;  %v589_v59 = vsub.s32 6, %v7745_v40  ;;  %v7002_v51 = vld [vmem:[#allocation6 + $0x46c] ss:$16 sps:$4 sm:$0xff]  }
 0x277   :  { %4334 = vmatprep.subr.bf16.mxu1 %v6897_v60  ;;  %4490 = vmatprep.subr.bf16.mxu0 %v6900_v62  ;;  %v6955_v60 = vld [vmem:[#allocation6 + $0x3c0] ss:$16 sps:$4 sm:$0xff]   ;;  %v6958_v62 = vld [vmem:[#allocation6 + $0x348] ss:$16 sps:$4 sm:$0xff]  }
 0x279   :  { %4335 = vmatpush1.bf16.msra.mxu1 %v6895_v63  ;;  %4482 = vmatmul.mubr.bf16.vlgmr.msra.gmra.mrb[8].mxu0 %v3077_v38  ;;  %v6936_v38 = vld [vmem:[#allocation6 + $0x2cc] ss:$16 sps:$4 sm:$0xff]   ;;  %v6963_v63 = vld [vmem:[#allocation6 + $0x3e4] ss:$16 sps:$4 sm:$0xff]  }
 0x27a   :  { %4491 = vmatpush1.bf16.msra.mxu0 %v6898_v1  ;;  %4522 = vmatprep.mubr.bf16.mxu0 %v3080_v61  ;;  %v3065_v61 = vadd.f32 0.5, %v3058_v55  ;;  %v6966_v1 = vld [vmem:[#allocation6 + $0x36c] ss:$16 sps:$4 sm:$0xff]   ;;  %v7029_v55 = vld [vmem:[#allocation6 + $0x504] ss:$16 sps:$4 sm:$0xff]  }
 0x27b   :  { %4336 = vmatprep.subr.bf16.mxu1 %v6903_v2  ;;  %4492 = vmatprep.subr.bf16.mxu0 %v6906_v52  ;;  %v590_v2 = vrot.slane %v7750_v23, %v589_v59  ;;  %v6961_v52 = vld [vmem:[#allocation6 + $0x3e0] ss:$16 sps:$4 sm:$0xff]  }
 0x27c   :  { %v7027_v59 = vld [vmem:[#allocation6 + $0x500] ss:$16 sps:$4 sm:$0xff]  }
 0x27d   :  { %4337 = vmatpush1.bf16.msra.mxu1 %v6901_v3  ;;  %v3072_v3 = vmul.f32 %v7776_v22, %v3065_v61 }
 0x27e   :  { %4493 = vmatpush1.bf16.msra.mxu0 %v6904_v4  ;;  %4338 = vmatprep.subr.bf16.mxu1 %v6909_v5  ;;  %v6964_v4 = vld [vmem:[#allocation6 + $0x368] ss:$16 sps:$4 sm:$0xff]   ;;  %v6981_v5 = vld [vmem:[#allocation6 + $0x404] ss:$16 sps:$4 sm:$0xff]  }
 0x27f   :  { %4494 = vmatprep.subr.bf16.mxu0 %v6912_v6  ;;  %v6969_v6 = vld [vmem:[#allocation6 + $0x38c] ss:$16 sps:$4 sm:$0xff]   ;;  %v3079_v13 = vpack.c.bf16 %v3072_v3, %v3072_v3  ;;  %v7033_v3 = vld [vmem:[#allocation6 + $0x520] ss:$16 sps:$4 sm:$0xff]  }
 0x281   :  { %4339 = vmatpush1.bf16.msra.mxu1 %v6907_v48 }
 0x282   :  { %4495 = vmatpush1.bf16.msra.mxu0 %v6910_v50  ;;  %4340 = vmatprep.subr.bf16.mxu1 %v6915_v10 }
 0x283   :  { %4496 = vmatprep.subr.bf16.mxu0 %v6918_v12  ;;  %v6979_v12 = vld [vmem:[#allocation6 + $0x400] ss:$16 sps:$4 sm:$0xff]  }
 0x285   :  { %v6088_v21 = vpop.f32.mrb[12].mxu1  ;;  %4341 = vmatpush1.bf16.msra.mxu1 %v6913_v14  ;;  %v6967_v14 = vld [vmem:[#allocation6 + $0x388] ss:$16 sps:$4 sm:$0xff]  }
 0x286   :  { %v6089_v25 = vpop.f32.mrb[13].mxu1  ;;  %4497 = vmatpush1.bf16.msra.mxu0 %v6916_v16  ;;  %4342 = vmatprep.subr.bf16.mxu1 %v6921_v17 }
 0x287   :  { %v7778_v28 = vadd.f32 %v6089_v25, %v6088_v21  ;;  %v6091_v30 = vpop.f32.mrb[14].mxu1  ;;  %4498 = vmatprep.subr.bf16.mxu0 %v6924_v20  ;;  %v6987_v20 = vld [vmem:[#allocation6 + $0x424] ss:$16 sps:$4 sm:$0xff]   ;;  %v6972_v21 = vld [vmem:[#allocation6 + $0x3ac] ss:$16 sps:$4 sm:$0xff]  }
 0x288   :  { %v6092_v18 = vpop.f32.mrb[15].mxu1  ;;  %v6985_v25 = vld [vmem:[#allocation6 + $0x420] ss:$16 sps:$4 sm:$0xff]  }
 0x289   :  { %4343 = vmatpush1.bf16.msra.mxu1 %v6919_v24  ;;  %v2917_v48 = vadd.f32 %v7778_v28, %v590_v2  ;;  %v6975_v28 = vld [vmem:[#allocation6 + $0x3cc] ss:$16 sps:$4 sm:$0xff]   ;;  %v6991_v30 = vld [vmem:[#allocation6 + $0x440] ss:$16 sps:$4 sm:$0xff]   ;;  %v6999_v18 = vld [vmem:[#allocation6 + $0x464] ss:$16 sps:$4 sm:$0xff]  }
 0x28a   :  { %4499 = vmatpush1.bf16.msra.mxu0 %v6922_v26  ;;  %4344 = vmatprep.subr.bf16.mxu1 %v6927_v27  ;;  %v6970_v26 = vld [vmem:[#allocation6 + $0x3a8] ss:$16 sps:$4 sm:$0xff]   ;;  %v6993_v27 = vld [vmem:[#allocation6 + $0x444] ss:$16 sps:$4 sm:$0xff]   ;;  %v7014_v2 = vld [vmem:[#allocation6 + $0x4ac] ss:$16 sps:$4 sm:$0xff]  }
 0x28b   :  { %4500 = vmatprep.subr.bf16.mxu0 %v6930_v31  ;;  %v6973_v31 = vld [vmem:[#allocation6 + $0x3c8] ss:$16 sps:$4 sm:$0xff]  }
 0x28d   :  { %4345 = vmatpush1.bf16.msra.mxu1 %v6925_v34  ;;  %v6997_v34 = vld [vmem:[#allocation6 + $0x460] ss:$16 sps:$4 sm:$0xff]  }
 0x28e   :  { %4501 = vmatpush1.bf16.msra.mxu0 %v6928_v11  ;;  %4346 = vmatprep.subr.bf16.mxu1 %v6933_v36  ;;  %v6976_v11 = vld [vmem:[#allocation6 + $0x3e8] ss:$16 sps:$4 sm:$0xff]   ;;  %v7005_v36 = vld [vmem:[#allocation6 + $0x484] ss:$16 sps:$4 sm:$0xff]  }
 0x28f   :  { %4502 = vmatprep.subr.bf16.mxu0 %v6936_v38  ;;  %v6984_v38 = vld [vmem:[#allocation6 + $0x40c] ss:$16 sps:$4 sm:$0xff]  }
 0x291   :  { %4347 = vmatpush1.bf16.msra.mxu1 %v6931_v39  ;;  %v7003_v39 = vld [vmem:[#allocation6 + $0x480] ss:$16 sps:$4 sm:$0xff]  }
 0x292   :  { %4503 = vmatpush1.bf16.msra.mxu0 %v6934_v41  ;;  %4348 = vmatprep.subr.bf16.mxu1 %v6939_v42  ;;  %v6982_v41 = vld [vmem:[#allocation6 + $0x408] ss:$16 sps:$4 sm:$0xff]   ;;  %v7011_v42 = vld [vmem:[#allocation6 + $0x4a4] ss:$16 sps:$4 sm:$0xff]  }
 0x293   :  { %4504 = vmatprep.subr.bf16.mxu0 %v6942_v8  ;;  %v6990_v8 = vld [vmem:[#allocation6 + $0x42c] ss:$16 sps:$4 sm:$0xff]  }
 0x295   :  { %4349 = vmatpush1.bf16.msra.mxu1 %v6937_v43  ;;  %v7009_v43 = vld [vmem:[#allocation6 + $0x4a0] ss:$16 sps:$4 sm:$0xff]  }
 0x296   :  { %4505 = vmatpush1.bf16.msra.mxu0 %v6940_v44  ;;  %4350 = vmatprep.subr.bf16.mxu1 %v6945_v45  ;;  %v6988_v44 = vld [vmem:[#allocation6 + $0x428] ss:$16 sps:$4 sm:$0xff]   ;;  %v7017_v45 = vld [vmem:[#allocation6 + $0x4c4] ss:$16 sps:$4 sm:$0xff]  }
 0x297   :  { %4506 = vmatprep.subr.bf16.mxu0 %v6948_v35  ;;  %v6996_v35 = vld [vmem:[#allocation6 + $0x44c] ss:$16 sps:$4 sm:$0xff]  }
 0x299   :  { %4351 = vmatpush1.bf16.msra.mxu1 %v6943_v15  ;;  %v7015_v15 = vld [vmem:[#allocation6 + $0x4c0] ss:$16 sps:$4 sm:$0xff]  }
 0x29a   :  { %4507 = vmatpush1.bf16.msra.mxu0 %v6946_v47  ;;  %4352 = vmatprep.subr.bf16.mxu1 %v6951_v19  ;;  %v6994_v47 = vld [vmem:[#allocation6 + $0x448] ss:$16 sps:$4 sm:$0xff]   ;;  %v7023_v19 = vld [vmem:[#allocation6 + $0x4e4] ss:$16 sps:$4 sm:$0xff]  }
 0x29b   :  { %4508 = vmatprep.subr.bf16.mxu0 %v6954_v53  ;;  %v7021_v53 = vld [vmem:[#allocation6 + $0x4e0] ss:$16 sps:$4 sm:$0xff]  }
 0x29d   :  { %4353 = vmatpush1.bf16.msra.mxu1 %v6949_v54  ;;  %v7000_v54 = vld [vmem:[#allocation6 + $0x468] ss:$16 sps:$4 sm:$0xff]  }
 0x29e   :  { %4509 = vmatpush1.bf16.msra.mxu0 %v6952_v56  ;;  %4354 = vmatprep.subr.bf16.mxu1 %v6957_v57  ;;  %v7008_v56 = vld [vmem:[#allocation6 + $0x48c] ss:$16 sps:$4 sm:$0xff]  }
 0x29f   :  { %4510 = vmatprep.subr.bf16.mxu0 %v6960_v58 }
 0x2a1   :  { %4355 = vmatpush1.bf16.msra.mxu1 %v6955_v60 }
 0x2a2   :  { %4511 = vmatpush1.bf16.msra.mxu0 %v6958_v62  ;;  %4356 = vmatprep.subr.bf16.mxu1 %v6963_v63  ;;  %v7006_v62 = vld [vmem:[#allocation6 + $0x488] ss:$16 sps:$4 sm:$0xff]   ;;  %v7035_v63 = vld [vmem:[#allocation6 + $0x524] ss:$16 sps:$4 sm:$0xff]  }
 0x2a3   :  { %4512 = vmatprep.subr.bf16.mxu0 %v6966_v1 }
 0x2a5   :  { %v6110_v50 = vpop.f32.mrb[16].mxu1  ;;  %4357 = vmatpush1.bf16.msra.mxu1 %v6961_v52 }
 0x2a6   :  { %v6111_v10 = vpop.f32.mrb[17].mxu1  ;;  %4513 = vmatpush1.bf16.msra.mxu0 %v6964_v4  ;;  %4367 = vmatprep.subr.bf16.mxu1 %v6981_v5  ;;  %v7012_v4 = vld [vmem:[#allocation6 + $0x4a8] ss:$16 sps:$4 sm:$0xff]   ;;  %v7041_v5 = vld [vmem:[#allocation6 + $0x544] ss:$16 sps:$4 sm:$0xff]  }
 0x2a7   :  { %v6112_v16 = vadd.f32 %v6111_v10, %v6110_v50  ;;  %v6113_v17 = vpop.f32.mrb[18].mxu1  ;;  %4514 = vmatprep.subr.bf16.mxu0 %v6969_v6  ;;  %v7020_v6 = vld [vmem:[#allocation6 + $0x4cc] ss:$16 sps:$4 sm:$0xff]   ;;  %v7039_v10 = vld [vmem:[#allocation6 + $0x540] ss:$16 sps:$4 sm:$0xff]  }
 0x2a8   :  { %v6114_v22 = vpop.f32.mrb[19].mxu1  ;;  %4359 = vmatmul.mubr.bf16.vlgmr.msra.gmra.mrb[28].mxu1 %v3079_v13  ;;  %v7026_v17 = vld [vmem:[#allocation6 + $0x4ec] ss:$16 sps:$4 sm:$0xff]  }
 0x2a9   :  { %v7785_v24 = vadd.f32 %v6112_v16, %v2917_v48  ;;  %4368 = vmatpush1.bf16.msra.mxu1 %v6979_v12  ;;  %v7024_v22 = vld [vmem:[#allocation6 + $0x4e8] ss:$16 sps:$4 sm:$0xff]  }
 0x2aa   :  { %4515 = vmatpush1.bf16.msra.mxu0 %v6967_v14  ;;  %4369 = vmatprep.subr.bf16.mxu1 %v6987_v20  ;;  %v7047_v14 = vld [vmem:[#allocation6 + $0x564] ss:$16 sps:$4 sm:$0xff]  }
 0x2ab   :  { %4516 = vmatprep.subr.bf16.mxu0 %v6972_v21  ;;  %v7045_v21 = vld [vmem:[#allocation6 + $0x560] ss:$16 sps:$4 sm:$0xff]  }
 0x2ad   :  { %4370 = vmatpush1.bf16.msra.mxu1 %v6985_v25  ;;  %v7032_v25 = vld [vmem:[#allocation6 + $0x50c] ss:$16 sps:$4 sm:$0xff]  }
 0x2ae   :  { %4517 = vmatpush1.bf16.msra.mxu0 %v6970_v26  ;;  %4371 = vmatprep.subr.bf16.mxu1 %v6993_v27  ;;  %v7051_v26 = vld [vmem:[#allocation6 + $0x580] ss:$16 sps:$4 sm:$0xff]   ;;  %v7030_v27 = vld [vmem:[#allocation6 + $0x508] ss:$16 sps:$4 sm:$0xff]  }
 0x2af   :  { %4518 = vmatprep.subr.bf16.mxu0 %v6975_v28  ;;  %v7059_v28 = vld [vmem:[#allocation6 + $0x5a4] ss:$16 sps:$4 sm:$0xff]  }
 0x2b1   :  { %4372 = vmatpush1.bf16.msra.mxu1 %v6991_v30  ;;  %v7038_v30 = vld [vmem:[#allocation6 + $0x52c] ss:$16 sps:$4 sm:$0xff]  }
 0x2b2   :  { %4519 = vmatpush1.bf16.msra.mxu0 %v6973_v31  ;;  %4373 = vmatprep.subr.bf16.mxu1 %v6999_v18  ;;  %v7057_v31 = vld [vmem:[#allocation6 + $0x5a0] ss:$16 sps:$4 sm:$0xff]   ;;  %v7036_v18 = vld [vmem:[#allocation6 + $0x528] ss:$16 sps:$4 sm:$0xff]  }
 0x2b3   :  { %4520 = vmatprep.subr.bf16.mxu0 %v6978_v32  ;;  %v7065_v32 = vld [vmem:[#allocation6 + $0x5c4] ss:$16 sps:$4 sm:$0xff]  }
 0x2b5   :  { %4374 = vmatpush1.bf16.msra.mxu1 %v6997_v34  ;;  %v7044_v34 = vld [vmem:[#allocation6 + $0x54c] ss:$16 sps:$4 sm:$0xff]  }
 0x2b6   :  { %4521 = vmatpush1.bf16.msra.mxu0 %v6976_v11  ;;  %4375 = vmatprep.subr.bf16.mxu1 %v7005_v36  ;;  %v7063_v11 = vld [vmem:[#allocation6 + $0x5c0] ss:$16 sps:$4 sm:$0xff]   ;;  %v7042_v36 = vld [vmem:[#allocation6 + $0x548] ss:$16 sps:$4 sm:$0xff]  }
 0x2b7   :  { %4531 = vmatprep.subr.bf16.mxu0 %v6984_v38  ;;  %v7071_v38 = vld [vmem:[#allocation6 + $0x5e4] ss:$16 sps:$4 sm:$0xff]  }
 0x2b9   :  { %4523 = vmatmul.mubr.bf16.vlgmr.msra.gmra.mrb[8].mxu0 %v3079_v13  ;;  %4376 = vmatpush1.bf16.msra.mxu1 %v7003_v39  ;;  %v7018_v13 = vld [vmem:[#allocation6 + $0x4c8] ss:$16 sps:$4 sm:$0xff]   ;;  %v7050_v39 = vld [vmem:[#allocation6 + $0x56c] ss:$16 sps:$4 sm:$0xff]  }
 0x2ba   :  { %4532 = vmatpush1.bf16.msra.mxu0 %v6982_v41  ;;  %4377 = vmatprep.subr.bf16.mxu1 %v7011_v42  ;;  %v7069_v41 = vld [vmem:[#allocation6 + $0x5e0] ss:$16 sps:$4 sm:$0xff]   ;;  %v7048_v42 = vld [vmem:[#allocation6 + $0x568] ss:$16 sps:$4 sm:$0xff]  }
 0x2bb   :  { %4533 = vmatprep.subr.bf16.mxu0 %v6990_v8  ;;  %v7077_v8 = vld [vmem:[#allocation6 + $0x604] ss:$16 sps:$4 sm:$0xff]  }
 0x2bd   :  { %4378 = vmatpush1.bf16.msra.mxu1 %v7009_v43  ;;  %v7056_v43 = vld [vmem:[#allocation6 + $0x58c] ss:$16 sps:$4 sm:$0xff]  }
 0x2be   :  { %4534 = vmatpush1.bf16.msra.mxu0 %v6988_v44  ;;  %4379 = vmatprep.subr.bf16.mxu1 %v7017_v45  ;;  %v7054_v44 = vld [vmem:[#allocation6 + $0x588] ss:$16 sps:$4 sm:$0xff]   ;;  %v7062_v45 = vld [vmem:[#allocation6 + $0x5ac] ss:$16 sps:$4 sm:$0xff]  }
 0x2bf   :  { %4535 = vmatprep.subr.bf16.mxu0 %v6996_v35  ;;  %v7060_v35 = vld [vmem:[#allocation6 + $0x5a8] ss:$16 sps:$4 sm:$0xff]  }
 0x2c1   :  { %4380 = vmatpush1.bf16.msra.mxu1 %v7015_v15  ;;  %v7068_v15 = vld [vmem:[#allocation6 + $0x5cc] ss:$16 sps:$4 sm:$0xff]  }
 0x2c2   :  { %4536 = vmatpush1.bf16.msra.mxu0 %v6994_v47  ;;  %4381 = vmatprep.subr.bf16.mxu1 %v7023_v19  ;;  %v7066_v47 = vld [vmem:[#allocation6 + $0x5c8] ss:$16 sps:$4 sm:$0xff]   ;;  %v7074_v19 = vld [vmem:[#allocation6 + $0x5ec] ss:$16 sps:$4 sm:$0xff]  }
 0x2c3   :  { %4537 = vmatprep.subr.bf16.mxu0 %v7002_v51  ;;  %v7072_v51 = vld [vmem:[#allocation6 + $0x5e8] ss:$16 sps:$4 sm:$0xff]  }
 0x2c5   :  { %v6132_v57 = vpop.f32.mrb[20].mxu1  ;;  %4382 = vmatpush1.bf16.msra.mxu1 %v7021_v53  ;;  %v7080_v53 = vld [vmem:[#allocation6 + $0x60c] ss:$16 sps:$4 sm:$0xff]  }
 0x2c6   :  { %v6133_v58 = vpop.f32.mrb[21].mxu1  ;;  %4538 = vmatpush1.bf16.msra.mxu0 %v7000_v54  ;;  %4383 = vmatprep.subr.bf16.mxu1 %v7029_v55  ;;  %v581_v54 = vsub.s32 4, %v7745_v40  ;;  %v585_v55 = vsub.s32 5, %v7745_v40  ;;  %v7159_v40 = vld [vmem:[#allocation9 + $0x1a0] ss:$8 sps:$4 sm:$0xff]  }
 0x2c7   :  { %v6134_v60 = vadd.f32 %v6133_v58, %v6132_v57  ;;  %v6135_v61 = vpop.f32.mrb[22].mxu1  ;;  %4539 = vmatprep.subr.bf16.mxu0 %v7008_v56 }
 0x2c8   :  { %v6136_v1 = vpop.f32.mrb[23].mxu1  ;;  %v582_v56 = vrot.slane %v7750_v23, %v581_v54  ;;  %v586_v57 = vrot.slane %v7750_v23, %v585_v55  ;;  %v7122_v54 = vld [vmem:[#allocation9 + $0xd4] ss:$8 sps:$4 sm:$0xff]   ;;  %v7120_v55 = vld [vmem:[#allocation9 + $0xd0] ss:$8 sps:$4 sm:$0xff]  }
 0x2c9   :  { %v2997_v52 = vadd.f32 %v6134_v60, %v7785_v24  ;;  %4384 = vmatpush1.bf16.msra.mxu1 %v7027_v59  ;;  %v7053_v24 = vld [vmem:[#allocation6 + $0x584] ss:$16 sps:$4 sm:$0xff]  }
 0x2ca   :  { %4540 = vmatpush1.bf16.msra.mxu0 %v7006_v62  ;;  %4385 = vmatprep.subr.bf16.mxu1 %v7035_v63 }
 0x2cb   :  { %4541 = vmatprep.subr.bf16.mxu0 %v7014_v2 }
 0x2cd   :  { %v3036_v48 = vpop.f32.mrb[24].mxu1  ;;  %4386 = vmatpush1.bf16.msra.mxu1 %v7033_v3 }
 0x2ce   :  { %v7788_v50 = vadd.f32 %v3036_v48, %v2997_v52  ;;  %v6175_v12 = vpop.f32.mrb[25].mxu1  ;;  %4542 = vmatpush1.bf16.msra.mxu0 %v7012_v4  ;;  %4387 = vmatprep.subr.bf16.mxu1 %v7041_v5 }
 0x2cf   :  { %v3039_v16 = vpop.f32.mrb[26].mxu1  ;;  %4543 = vmatprep.subr.bf16.mxu0 %v7020_v6 }
 0x2d0   :  { %v6176_v20 = vpop.f32.mrb[27].mxu1  ;;  %v3048_v4 = vmul.f32 0.5, %v7788_v50 }
 0x2d1   :  { %4388 = vmatpush1.bf16.msra.mxu1 %v7039_v10  ;;  %v7078_v20 = vld [vmem:[#allocation6 + $0x608] ss:$16 sps:$4 sm:$0xff]  }
 0x2d2   :  { %4544 = vmatpush1.bf16.msra.mxu0 %v7018_v13  ;;  %4389 = vmatprep.subr.bf16.mxu1 %v7047_v14 }
 0x2d3   :  { %4545 = vmatprep.subr.bf16.mxu0 %v7026_v17  ;;  %v7075_v17 = vld [vmem:[#allocation6 + $0x600] ss:$16 sps:$4 sm:$0xff]  }
 0x2d5   :  { %4390 = vmatpush1.bf16.msra.mxu1 %v7045_v21 }
 0x2d6   :  { %4546 = vmatpush1.bf16.msra.mxu0 %v7024_v22  ;;  %4391 = vmatprep.subr.bf16.mxu1 %v7053_v24  ;;  %v7083_v22 = vld [vmem:[#allocation9 + $0x4] ss:$8 sps:$4 sm:$0xff]  }
 0x2d7   :  { %4547 = vmatprep.subr.bf16.mxu0 %v7032_v25 }
 0x2d9   :  { %4392 = vmatpush1.bf16.msra.mxu1 %v7051_v26  ;;  %v7081_v26 = vld [vmem:[#allocation9] ss:$8 sps:$4 sm:$0xff]  }
 0x2da   :  { %4548 = vmatpush1.bf16.msra.mxu0 %v7030_v27  ;;  %4393 = vmatprep.subr.bf16.mxu1 %v7059_v28  ;;  %v7086_v28 = vld [vmem:[#allocation9 + $0x14] ss:$8 sps:$4 sm:$0xff]  }
 0x2db   :  { %4549 = vmatprep.subr.bf16.mxu0 %v7038_v30  ;;  %v7084_v30 = vld [vmem:[#allocation9 + $0x10] ss:$8 sps:$4 sm:$0xff]  }
 0x2dd   :  { %4394 = vmatpush1.bf16.msra.mxu1 %v7057_v31  ;;  %v7089_v31 = vld [vmem:[#allocation9 + $0x24] ss:$8 sps:$4 sm:$0xff]  }
 0x2de   :  { %4550 = vmatpush1.bf16.msra.mxu0 %v7036_v18  ;;  %4395 = vmatprep.subr.bf16.mxu1 %v7065_v32  ;;  %v7087_v18 = vld [vmem:[#allocation9 + $0x20] ss:$8 sps:$4 sm:$0xff]   ;;  %v7092_v32 = vld [vmem:[#allocation9 + $0x34] ss:$8 sps:$4 sm:$0xff]  }
 0x2df   :  { %4551 = vmatprep.subr.bf16.mxu0 %v7044_v34  ;;  %v7095_v34 = vld [vmem:[#allocation9 + $0x44] ss:$8 sps:$4 sm:$0xff]  }
 0x2e1   :  { %4396 = vmatpush1.bf16.msra.mxu1 %v7063_v11  ;;  %v7098_v11 = vld [vmem:[#allocation9 + $0x54] ss:$8 sps:$4 sm:$0xff]  }
 0x2e2   :  { %4552 = vmatpush1.bf16.msra.mxu0 %v7042_v36  ;;  %4397 = vmatprep.subr.bf16.mxu1 %v7071_v38  ;;  %v7096_v36 = vld [vmem:[#allocation9 + $0x50] ss:$8 sps:$4 sm:$0xff]   ;;  %v7101_v38 = vld [vmem:[#allocation9 + $0x64] ss:$8 sps:$4 sm:$0xff]  }
 0x2e3   :  { %4553 = vmatprep.subr.bf16.mxu0 %v7050_v39  ;;  %v7099_v39 = vld [vmem:[#allocation9 + $0x60] ss:$8 sps:$4 sm:$0xff]  }
 0x2e5   :  { %4398 = vmatpush1.bf16.msra.mxu1 %v7069_v41  ;;  %v7104_v41 = vld [vmem:[#allocation9 + $0x74] ss:$8 sps:$4 sm:$0xff]  }
 0x2e6   :  { %4554 = vmatpush1.bf16.msra.mxu0 %v7048_v42  ;;  %4408 = vmatprep.subr.bf16.mxu1 %v7077_v8  ;;  %v7102_v42 = vld [vmem:[#allocation9 + $0x70] ss:$8 sps:$4 sm:$0xff]   ;;  %v7107_v8 = vld [vmem:[#allocation9 + $0x84] ss:$8 sps:$4 sm:$0xff]  }
 0x2e7   :  { %4555 = vmatprep.subr.bf16.mxu0 %v7056_v43  ;;  %v7105_v43 = vld [vmem:[#allocation9 + $0x80] ss:$8 sps:$4 sm:$0xff]  }
 0x2ea   :  { %4556 = vmatpush1.bf16.msra.mxu0 %v7054_v44  ;;  %v7110_v44 = vld [vmem:[#allocation9 + $0x94] ss:$8 sps:$4 sm:$0xff]  }
 0x2eb   :  { %4557 = vmatprep.subr.bf16.mxu0 %v7062_v45  ;;  %v7108_v45 = vld [vmem:[#allocation9 + $0x90] ss:$8 sps:$4 sm:$0xff]  }
 0x2ee   :  { %4558 = vmatpush1.bf16.msra.mxu0 %v7060_v35  ;;  %v7113_v35 = vld [vmem:[#allocation9 + $0xa4] ss:$8 sps:$4 sm:$0xff]  }
 0x2ef   :  { %4559 = vmatprep.subr.bf16.mxu0 %v7068_v15  ;;  %v7111_v15 = vld [vmem:[#allocation9 + $0xa0] ss:$8 sps:$4 sm:$0xff]  }
 0x2f2   :  { %4560 = vmatpush1.bf16.msra.mxu0 %v7066_v47  ;;  %v7116_v47 = vld [vmem:[#allocation9 + $0xb4] ss:$8 sps:$4 sm:$0xff]  }
 0x2f3   :  { %4561 = vmatprep.subr.bf16.mxu0 %v7074_v19  ;;  %v7114_v19 = vld [vmem:[#allocation9 + $0xb0] ss:$8 sps:$4 sm:$0xff]  }
 0x2f6   :  { %4562 = vmatpush1.bf16.msra.mxu0 %v7072_v51  ;;  %v7119_v51 = vld [vmem:[#allocation9 + $0xc4] ss:$8 sps:$4 sm:$0xff]  }
 0x2f7   :  { %4572 = vmatprep.subr.bf16.mxu0 %v7080_v53  ;;  %v7117_v53 = vld [vmem:[#allocation9 + $0xc0] ss:$8 sps:$4 sm:$0xff]  }
 0x30c   :  { %v2834_v58 = vpop.f32.mrb[4].mxu0 }
 0x30d   :  { %v6203_v59 = vadd.f32 %v2834_v58, %v582_v56  ;;  %v2836_v60 = vpop.f32.mrb[5].mxu0  ;;  %v7125_v56 = vld [vmem:[#allocation9 + $0xe4] ss:$8 sps:$4 sm:$0xff]   ;;  %v7128_v58 = vld [vmem:[#allocation9 + $0xf4] ss:$8 sps:$4 sm:$0xff]  }
 0x30e   :  { %v6205_v61 = vadd.f32 %v2836_v60, %v586_v57  ;;  %v2838_v62 = vpop.f32.mrb[6].mxu0  ;;  %v7123_v57 = vld [vmem:[#allocation9 + $0xe0] ss:$8 sps:$4 sm:$0xff]   ;;  %v7131_v60 = vld [vmem:[#allocation9 + $0x104] ss:$8 sps:$4 sm:$0xff]  }
 0x30f   :  { %v6204_v63 = vadd.f32 %v6203_v59, %v7767_v33  ;;  %v2839_v1 = vpop.f32.mrb[7].mxu0  ;;  %v7126_v59 = vld [vmem:[#allocation9 + $0xf0] ss:$8 sps:$4 sm:$0xff]   ;;  %v7178_v62 = vld [vmem:[#allocation12] sm:$0xff]  }
 0x310   :  { %v6206_v2 = vadd.f32 %v6205_v61, %v7769_v37  ;;  %v7177_v61 = vld [vmem:[#allocation12 + $0x40] sm:$0xff]   ;;  %v7180_v1 = vld [vmem:[#allocation12 + $0x8] sm:$0xff]  }
 0x311   :  { %v3046_v52 = vmul.f32 0.5, %v6204_v63 }
 0x312   :  { %v3047_v3 = vmul.f32 0.5, %v6206_v2 }
 0x313   :  { %7209 = vtanh.f32 %v3046_v52 }
 0x314   :  { %7211 = vtanh.f32 %v3047_v3 }
 0x315   :  { %7213 = vtanh.f32 %v3048_v4 }
 0x31d   :  { %v7210_v5 = vpop.eup %7209 }
 0x31e   :  { %v7212_v6 = vpop.eup %7211  ;;  %v3060_v23 = vmul.f32 0.5, %v7210_v5 }
 0x31f   :  { %v3061_v48 = vmul.f32 0.5, %v7212_v6  ;;  %v7214_v14 = vpop.eup %7213 }
 0x320   :  { %v3067_v10 = vadd.f32 0.5, %v3060_v23  ;;  %v3062_v37 = vmul.f32 0.5, %v7214_v14 }
 0x321   :  { %v3068_v12 = vadd.f32 0.5, %v3061_v48 }
 0x322   :  { %v3074_v13 = vmul.f32 %v6204_v63, %v3067_v10  ;;  %v3069_v24 = vadd.f32 0.5, %v3062_v37  ;;  %v7179_v63 = vld [vmem:[#allocation12 + $0x48] sm:$0xff]  }
 0x323   :  { %v3075_v16 = vmul.f32 %v6206_v2, %v3068_v12  ;;  %v7802_v2 = vld [vmem:[#allocation7] sm:$0xf] }
 0x324   :  { %v3081_v21 = vpack.c.bf16 %v3074_v13, %v3074_v13  ;;  %v3076_v25 = vmul.f32 %v3069_v24, %v7788_v50  ;;  %v7093_v50 = vld [vmem:[#allocation9 + $0x40] ss:$8 sps:$4 sm:$0xff]   ;;  %v3285_v52 = vrot.slane %v7802_v2, %v7748_v46  ;;  %v3289_v3 = vrot.slane %v7802_v2, %v7753_v49 }
 0x325   :  { %v3082_v33 = vpack.c.bf16 %v3075_v16, %v3075_v16  ;;  %v3297_v4 = vrot.slane %v7802_v2, %v577_v7 }
 0x326   :  { %v3083_v27 = vpack.c.bf16 %v3076_v25, %v3076_v25 }
 0x327   :  { %4399 = vmatprep.mubr.bf16.mxu1 %v3082_v33  ;;  %4563 = vmatprep.mubr.bf16.mxu0 %v3082_v33 }
 0x328   :  { %4400 = vmatmul.mubr.bf16.vlgmr.msra.gmra.mrb[28].mxu1 %v3081_v21  ;;  %4564 = vmatmul.mubr.bf16.vlgmr.msra.gmra.mrb[8].mxu0 %v3081_v21 }
 0x329   :  { %4409 = vmatpush1.bf16.msra.mxu1 %v7075_v17  ;;  %4573 = vmatpush1.bf16.msra.mxu0 %v7078_v20 }
 0x32a   :  { %4440 = vmatprep.mubr.bf16.mxu1 %v7480_v0  ;;  %4604 = vmatprep.mubr.bf16.mxu0 %v7480_v0  ;;  %v7090_v0 = vld [vmem:[#allocation9 + $0x30] ss:$8 sps:$4 sm:$0xff]  }
 0x32b   :  { %5033 = vmatprep.subr.bf16.mxu1 %v7083_v22  ;;  %6140 = vmatprep.subr.bf16.mxu0 %v7177_v61  ;;  %v7161_v61 = vld [vmem:[#allocation9 + $0x1a4] ss:$8 sps:$4 sm:$0xff]  }
 0x334   :  { %5980 = vmatmul.mubr.msk.bf16.vlgmr.msra.gmra.mrb[28].mxu1 %vm2386_vm0, %v3083_v27  ;;  %5981 = vmatmul.mubr.msk.bf16.vlgmr.msra.gmra.mrb[8].mxu0 %vm2386_vm0, %v3083_v27 }
 0x335   :  { %5034 = vmatpush1.bf16.msra.mxu1 %v7081_v26  ;;  %6141 = vmatpush3.bf16.msra.mxu0 %v7178_v62  ;;  %v7162_v62 = vld [vmem:[#allocation9 + $0x1b0] ss:$8 sps:$4 sm:$0xff]  }
 0x336   :  { %5035 = vmatprep.subr.bf16.mxu1 %v7086_v28  ;;  %6142 = vmatprep.subr.bf16.mxu0 %v7179_v63  ;;  %v7167_v63 = vld [vmem:[#allocation9 + $0x1c4] ss:$8 sps:$4 sm:$0xff]  }
 0x339   :  { %5036 = vmatpush1.bf16.msra.mxu1 %v7084_v30  ;;  %6143 = vmatpush3.bf16.msra.mxu0 %v7180_v1  ;;  %v7165_v1 = vld [vmem:[#allocation9 + $0x1c0] ss:$8 sps:$4 sm:$0xff]  }
 0x33a   :  { %5037 = vmatprep.subr.bf16.mxu1 %v7089_v31 }
 0x33d   :  { %5038 = vmatpush1.bf16.msra.mxu1 %v7087_v18 }
 0x33e   :  { %5039 = vmatprep.subr.bf16.mxu1 %v7092_v32 }
 0x341   :  { %5040 = vmatpush1.bf16.msra.mxu1 %v7090_v0 }
 0x342   :  { %5041 = vmatprep.subr.bf16.mxu1 %v7095_v34 }
 0x345   :  { %5042 = vmatpush1.bf16.msra.mxu1 %v7093_v50  ;;  %v7129_v50 = vld [vmem:[#allocation9 + $0x100] ss:$8 sps:$4 sm:$0xff]  }
 0x346   :  { %5043 = vmatprep.subr.bf16.mxu1 %v7098_v11 }
 0x349   :  { %5044 = vmatpush1.bf16.msra.mxu1 %v7096_v36  ;;  %v7134_v36 = vld [vmem:[#allocation9 + $0x114] ss:$8 sps:$4 sm:$0xff]  }
 0x34a   :  { %5045 = vmatprep.subr.bf16.mxu1 %v7101_v38 }
 0x34d   :  { %5046 = vmatpush1.bf16.msra.mxu1 %v7099_v39  ;;  %v7132_v39 = vld [vmem:[#allocation9 + $0x110] ss:$8 sps:$4 sm:$0xff]  }
 0x34e   :  { %5047 = vmatprep.subr.bf16.mxu1 %v7104_v41  ;;  %v7137_v41 = vld [vmem:[#allocation9 + $0x124] ss:$8 sps:$4 sm:$0xff]  }
 0x351   :  { %5048 = vmatpush1.bf16.msra.mxu1 %v7102_v42  ;;  %v7135_v42 = vld [vmem:[#allocation9 + $0x120] ss:$8 sps:$4 sm:$0xff]  }
 0x352   :  { %5049 = vmatprep.subr.bf16.mxu1 %v7107_v8  ;;  %v7140_v8 = vld [vmem:[#allocation9 + $0x134] ss:$8 sps:$4 sm:$0xff]  }
 0x355   :  { %5050 = vmatpush1.bf16.msra.mxu1 %v7105_v43  ;;  %v7138_v43 = vld [vmem:[#allocation9 + $0x130] ss:$8 sps:$4 sm:$0xff]  }
 0x356   :  { %5051 = vmatprep.subr.bf16.mxu1 %v7110_v44  ;;  %v7143_v44 = vld [vmem:[#allocation9 + $0x144] ss:$8 sps:$4 sm:$0xff]  }
 0x359   :  { %5052 = vmatpush1.bf16.msra.mxu1 %v7108_v45  ;;  %v7141_v45 = vld [vmem:[#allocation9 + $0x140] ss:$8 sps:$4 sm:$0xff]  }
 0x35a   :  { %5053 = vmatprep.subr.bf16.mxu1 %v7113_v35  ;;  %v7146_v35 = vld [vmem:[#allocation9 + $0x154] ss:$8 sps:$4 sm:$0xff]  }
 0x35d   :  { %5054 = vmatpush1.bf16.msra.mxu1 %v7111_v15  ;;  %v7144_v15 = vld [vmem:[#allocation9 + $0x150] ss:$8 sps:$4 sm:$0xff]  }
 0x35e   :  { %5055 = vmatprep.subr.bf16.mxu1 %v7116_v47  ;;  %v7149_v47 = vld [vmem:[#allocation9 + $0x164] ss:$8 sps:$4 sm:$0xff]  }
 0x361   :  { %5056 = vmatpush1.bf16.msra.mxu1 %v7114_v19  ;;  %v7147_v19 = vld [vmem:[#allocation9 + $0x160] ss:$8 sps:$4 sm:$0xff]  }
 0x362   :  { %5057 = vmatprep.subr.bf16.mxu1 %v7119_v51  ;;  %v7152_v51 = vld [vmem:[#allocation9 + $0x174] ss:$8 sps:$4 sm:$0xff]  }
 0x365   :  { %5058 = vmatpush1.bf16.msra.mxu1 %v7117_v53  ;;  %v3293_v53 = vrot.slane %v7802_v2, %v573_v9  ;;  %v7164_v9 = vld [vmem:[#allocation9 + $0x1b4] ss:$8 sps:$4 sm:$0xff]  }
 0x366   :  { %5059 = vmatprep.subr.bf16.mxu1 %v7122_v54  ;;  %v7150_v54 = vld [vmem:[#allocation9 + $0x170] ss:$8 sps:$4 sm:$0xff]   ;;  %v7170_v2 = vld [vmem:[#allocation9 + $0x1d4] ss:$8 sps:$4 sm:$0xff]  }
 0x369   :  { %5060 = vmatpush1.bf16.msra.mxu1 %v7120_v55  ;;  %v7155_v55 = vld [vmem:[#allocation9 + $0x184] ss:$8 sps:$4 sm:$0xff]  }
 0x36a   :  { %5061 = vmatprep.subr.bf16.mxu1 %v7125_v56 }
 0x36d   :  { %5062 = vmatpush1.bf16.msra.mxu1 %v7123_v57  ;;  %v7153_v57 = vld [vmem:[#allocation9 + $0x180] ss:$8 sps:$4 sm:$0xff]  }
 0x36e   :  { %5063 = vmatprep.subr.bf16.mxu1 %v7128_v58  ;;  %v7158_v58 = vld [vmem:[#allocation9 + $0x194] ss:$8 sps:$4 sm:$0xff]  }
 0x371   :  { %5064 = vmatpush1.bf16.msra.mxu1 %v7126_v59 }
 0x372   :  { %5074 = vmatprep.subr.bf16.mxu1 %v7131_v60  ;;  %v7156_v60 = vld [vmem:[#allocation9 + $0x190] ss:$8 sps:$4 sm:$0xff]  }
 0x407   :  { %v4442_v5 = vpop.f32.mrb[28].mxu1  ;;  %v7811_v6 = vpop.f32.mrb[8].mxu0 }
 0x408   :  { %v6207_v23 = vadd.f32 %v4442_v5, %v3285_v52  ;;  %v4444_v48 = vpop.f32.mrb[29].mxu1  ;;  %v4608_v10 = vpop.f32.mrb[9].mxu0  ;;  %v6209_v56 = vadd.f32 %v7811_v6, %v3293_v53  ;;  %v7173_v5 = vld [vmem:[#allocation9 + $0x1e4] ss:$8 sps:$4 sm:$0xff]   ;;  %v7171_v6 = vld [vmem:[#allocation9 + $0x1e0] ss:$8 sps:$4 sm:$0xff]  }
 0x409   :  { %v6208_v12 = vadd.f32 %v4444_v48, %v3289_v3  ;;  %v6210_v13 = vadd.f32 %v4608_v10, %v3297_v4  ;;  %v4446_v14 = vpop.f32.mrb[30].mxu1  ;;  %v4610_v16 = vpop.f32.mrb[10].mxu0  ;;  %v7168_v3 = vld [vmem:[#allocation9 + $0x1d0] ss:$8 sps:$4 sm:$0xff]   ;;  %v7176_v48 = vld [vmem:[#allocation9 + $0x1f4] ss:$8 sps:$4 sm:$0xff]  }
 0x40a   :  { %v4613_v33 = vmul.f32 0.5, %v6207_v23  ;;  %v4447_v17 = vpop.f32.mrb[31].mxu1  ;;  %v4611_v20 = vpop.f32.mrb[11].mxu0  ;;  %v4615_v59 = vmul.f32 0.5, %v6209_v56  ;;  %v7174_v10 = vld [vmem:[#allocation9 + $0x1f0] ss:$8 sps:$4 sm:$0xff]  }
 0x40b   :  { %v4614_v37 = vmul.f32 0.5, %v6208_v12  ;;  %v4616_v21 = vmul.f32 0.5, %v6210_v13  ;;  %v7181_v14 = vld [vmem:[#allocation12 + $0x50] sm:$0xff]   ;;  %v7184_v17 = vld [vmem:[#allocation12 + $0x18] sm:$0xff]   ;;  %v7185_v20 = vld [vmem:[#allocation12 + $0x60] sm:$0xff]  }
 0x40c   :  { %7215 = vtanh.f32 %v4613_v33  ;;  %v7182_v16 = vld [vmem:[#allocation12 + $0x10] sm:$0xff]   ;;  %6144 = vmatprep.subr.bf16.mxu0 %v7181_v14  ;;  %v7183_v33 = vld [vmem:[#allocation12 + $0x58] sm:$0xff]  }
 0x40d   :  { %7217 = vtanh.f32 %v4614_v37  ;;  %6145 = vmatpush3.bf16.msra.mxu0 %v7182_v16  ;;  %v7186_v37 = vld [vmem:[#allocation12 + $0x20] sm:$0xff]   ;;  %v7198_v53 = vld [vmem:[#allocation15 + $0x28] sm:$0xff]  }
 0x40e   :  { %7219 = vtanh.f32 %v4616_v21  ;;  %6146 = vmatprep.subr.bf16.mxu0 %v7183_v33  ;;  %v7187_v21 = vld [vmem:[#allocation12 + $0x68] sm:$0xff]  }
 0x40f   :  { %7221 = vtanh.f32 %v4615_v59 }
 0x411   :  { %6147 = vmatpush3.bf16.msra.mxu0 %v7184_v17 }
 0x412   :  { %6148 = vmatprep.subr.bf16.mxu0 %v7185_v20 }
 0x415   :  { %6149 = vmatpush3.bf16.msra.mxu0 %v7186_v37 }
 0x416   :  { %v7216_v22 = vpop.eup %7215  ;;  %6150 = vmatprep.subr.bf16.mxu0 %v7187_v21 }
 0x417   :  { %v4621_v7 = vmul.f32 0.5, %v7216_v22  ;;  %v7218_v24 = vpop.eup %7217  ;;  %v7188_v22 = vld [vmem:[#allocation12 + $0x28] sm:$0xff]  }
 0x418   :  { %v7220_v25 = vpop.eup %7219  ;;  %v4622_v27 = vmul.f32 0.5, %v7218_v24  ;;  %v7190_v24 = vld [vmem:[#allocation12 + $0x30] sm:$0xff]  }
 0x419   :  { %v4625_v26 = vadd.f32 0.5, %v4621_v7  ;;  %v4624_v28 = vmul.f32 0.5, %v7220_v25  ;;  %v7222_v52 = vpop.eup %7221  ;;  %6151 = vmatpush3.bf16.msra.mxu0 %v7188_v22  ;;  %v7189_v7 = vld [vmem:[#allocation12 + $0x70] sm:$0xff]   ;;  %v7191_v25 = vld [vmem:[#allocation12 + $0x78] sm:$0xff]  }
 0x41a   :  { %v4626_v30 = vadd.f32 0.5, %v4622_v27  ;;  %v4623_v4 = vmul.f32 0.5, %v7222_v52  ;;  %6152 = vmatprep.subr.bf16.mxu0 %v7189_v7  ;;  %v4701_v27 = vld [vmem:[#allocation10] sm:$0x3] }
 0x41b   :  { %v4629_v31 = vmul.f32 %v6207_v23, %v4625_v26  ;;  %v4628_v18 = vadd.f32 0.5, %v4624_v28  ;;  %v7192_v26 = vld [vmem:[#allocation12 + $0x38] sm:$0xff]   ;;  %v4706_v28 = vrot.slane %v4701_v27, %v7748_v46 }
 0x41c   :  { %v4630_v32 = vmul.f32 %v6208_v12, %v4626_v30  ;;  %v4627_v23 = vadd.f32 0.5, %v4623_v4  ;;  %v4710_v30 = vrot.slane %v4701_v27, %v7753_v49  ;;  %v7193_v49 = vld [vmem:[#allocation15] sm:$0xff]  }
 0x41d   :  { %v4632_v0 = vmul.f32 %v6210_v13, %v4628_v18  ;;  %v4633_v11 = vpack.c.bf16 %v4629_v31, %v4629_v31  ;;  %6153 = vmatpush3.bf16.msra.mxu0 %v7190_v24 }
 0x41e   :  { %v4634_v34 = vpack.c.bf16 %v4630_v32, %v4630_v32  ;;  %v4631_v12 = vmul.f32 %v6209_v56, %v4627_v23  ;;  %6154 = vmatprep.subr.bf16.mxu0 %v7191_v25 }
 0x41f   :  { %v4636_v38 = vpack.c.bf16 %v4632_v0, %v4632_v0 }
 0x420   :  { %5065 = vmatprep.mubr.bf16.mxu1 %v4634_v34  ;;  %v4635_v13 = vpack.c.bf16 %v4631_v12, %v4631_v12 }
 0x421   :  { %5066 = vmatmul.mubr.bf16.vlgmr.msra.gmra.mrb[32].mxu1 %v4633_v11  ;;  %6155 = vmatpush3.bf16.msra.mxu0 %v7192_v26 }
 0x422   :  { %5075 = vmatpush1.bf16.msra.mxu1 %v7129_v50  ;;  %5106 = vmatprep.mubr.bf16.mxu1 %v4636_v38 }
 0x423   :  { %5076 = vmatprep.subr.bf16.mxu1 %v7134_v36  ;;  %6177 = vmatprep.subr.bf16.mxu0 %v7481_v29 }
 0x426   :  { %5077 = vmatpush1.bf16.msra.mxu1 %v7132_v39 }
 0x427   :  { %5078 = vmatprep.subr.bf16.mxu1 %v7137_v41 }
 0x42a   :  { %5079 = vmatpush1.bf16.msra.mxu1 %v7135_v42 }
 0x42b   :  { %5080 = vmatprep.subr.bf16.mxu1 %v7140_v8 }
 0x42e   :  { %5081 = vmatpush1.bf16.msra.mxu1 %v7138_v43 }
 0x42f   :  { %5082 = vmatprep.subr.bf16.mxu1 %v7143_v44 }
 0x432   :  { %5083 = vmatpush1.bf16.msra.mxu1 %v7141_v45 }
 0x433   :  { %5084 = vmatprep.subr.bf16.mxu1 %v7146_v35 }
 0x436   :  { %5085 = vmatpush1.bf16.msra.mxu1 %v7144_v15  ;;  %v7194_v15 = vld [vmem:[#allocation15 + $0x8] sm:$0xff]  }
 0x437   :  { %5086 = vmatprep.subr.bf16.mxu1 %v7149_v47  ;;  %v7195_v47 = vld [vmem:[#allocation15 + $0x10] sm:$0xff]  }
 0x43a   :  { %5087 = vmatpush1.bf16.msra.mxu1 %v7147_v19  ;;  %v7196_v19 = vld [vmem:[#allocation15 + $0x18] sm:$0xff]  }
 0x43b   :  { %5088 = vmatprep.subr.bf16.mxu1 %v7152_v51  ;;  %v7197_v51 = vld [vmem:[#allocation15 + $0x20] sm:$0xff]  }
 0x43e   :  { %5089 = vmatpush1.bf16.msra.mxu1 %v7150_v54  ;;  %v7199_v54 = vld [vmem:[#allocation15 + $0x30] sm:$0xff]  }
 0x43f   :  { %5090 = vmatprep.subr.bf16.mxu1 %v7155_v55  ;;  %v7200_v55 = vld [vmem:[#allocation15 + $0x38] sm:$0xff]  }
 0x442   :  { %5091 = vmatpush1.bf16.msra.mxu1 %v7153_v57  ;;  %v6046_v57 = vld [vmem:[#allocation13] ss:$0 sm:$0xff] }
 0x443   :  { %5092 = vmatprep.subr.bf16.mxu1 %v7158_v58 }
 0x446   :  { %5093 = vmatpush1.bf16.msra.mxu1 %v7156_v60 }
 0x447   :  { %5094 = vmatprep.subr.bf16.mxu1 %v7161_v61 }
 0x44a   :  { %5095 = vmatpush1.bf16.msra.mxu1 %v7159_v40 }
 0x44b   :  { %5096 = vmatprep.subr.bf16.mxu1 %v7164_v9 }
 0x44e   :  { %5097 = vmatpush1.bf16.msra.mxu1 %v7162_v62 }
 0x44f   :  { %5098 = vmatprep.subr.bf16.mxu1 %v7167_v63 }
 0x452   :  { %5099 = vmatpush1.bf16.msra.mxu1 %v7165_v1 }
 0x453   :  { %5100 = vmatprep.subr.bf16.mxu1 %v7170_v2 }
 0x456   :  { %5101 = vmatpush1.bf16.msra.mxu1 %v7168_v3  ;;  %v6063_v3 = vld [vmem:[#allocation16] ss:$0 sm:$0xff] }
 0x457   :  { %5102 = vmatprep.subr.bf16.mxu1 %v7173_v5 }
 0x45a   :  { %5103 = vmatpush1.bf16.msra.mxu1 %v7171_v6 }
 0x45b   :  { %5104 = vmatprep.subr.bf16.mxu1 %v7176_v48 }
 0x45e   :  { %5105 = vmatpush1.bf16.msra.mxu1 %v7174_v10 }
 0x461   :  { %5107 = vmatmul.mubr.bf16.vlgmr.msra.gmra.mrb[32].mxu1 %v4635_v13 }
 0x534   :  { %v5108_v31 = vpop.f32.mrb[32].mxu1 }
 0x535   :  { %v6211_v18 = vadd.f32 %v5108_v31, %v4706_v28  ;;  %v5110_v32 = vpop.f32.mrb[33].mxu1 }
 0x536   :  { %v6212_v0 = vadd.f32 %v5110_v32, %v4710_v30  ;;  %v5112_v34 = vpop.f32.mrb[34].mxu1 }
 0x537   :  { %v5115_v50 = vmul.f32 0.5, %v6211_v18  ;;  %v5113_v11 = vpop.f32.mrb[35].mxu1 }
 0x538   :  { %v5116_v36 = vmul.f32 0.5, %v6212_v0 }
 0x539   :  { %7223 = vtanh.f32 %v5115_v50 }
 0x53a   :  { %7225 = vtanh.f32 %v5116_v36 }
 0x543   :  { %v7224_v38 = vpop.eup %7223 }
 0x544   :  { %v7226_v39 = vpop.eup %7225  ;;  %v5119_v41 = vmul.f32 0.5, %v7224_v38 }
 0x545   :  { %v5120_v42 = vmul.f32 0.5, %v7226_v39 }
 0x546   :  { %v5121_v8 = vadd.f32 0.5, %v5119_v41 }
 0x547   :  { %v5122_v43 = vadd.f32 0.5, %v5120_v42 }
 0x548   :  { %v5123_v44 = vmul.f32 %v6211_v18, %v5121_v8 }
 0x549   :  { %v5124_v46 = vmul.f32 %v6212_v0, %v5122_v43 }
 0x54a   :  { %v5125_v35 = vpack.c.bf16 %v5123_v44, %v5123_v44 }
 0x54b   :  { %v5126_v45 = vpack.c.bf16 %v5124_v46, %v5124_v46 }
 0x54d   :  { %5294 = vmatprep.mubr.bf16.mxu0 %v5126_v45 }
 0x54e   :  { %5295 = vmatmul.mubr.bf16.vlgmr.msra.gmra.mrb[12].mxu0 %v5125_v35 }
 0x54f   :  { %6178 = vmatpush3.bf16.msra.mxu0 %v7193_v49  ;;  %6193 = vmatprep.mubr.msk.bf16.mxu0 %vm7482_vm1, %v7481_v29 }
 0x550   :  { %6179 = vmatprep.subr.bf16.mxu0 %v7481_v29 }
 0x553   :  { %6180 = vmatpush3.bf16.msra.mxu0 %v7194_v15 }
 0x554   :  { %6181 = vmatprep.subr.bf16.mxu0 %v7481_v29 }
 0x557   :  { %6182 = vmatpush3.bf16.msra.mxu0 %v7195_v47 }
 0x558   :  { %6183 = vmatprep.subr.bf16.mxu0 %v7481_v29 }
 0x55b   :  { %6184 = vmatpush3.bf16.msra.mxu0 %v7196_v19 }
 0x55c   :  { %6185 = vmatprep.subr.bf16.mxu0 %v7481_v29 }
 0x55f   :  { %6186 = vmatpush3.bf16.msra.mxu0 %v7197_v51 }
 0x560   :  { %6187 = vmatprep.subr.bf16.mxu0 %v7481_v29 }
 0x563   :  { %6188 = vmatpush3.bf16.msra.mxu0 %v7198_v53 }
 0x564   :  { %6189 = vmatprep.subr.bf16.mxu0 %v7481_v29 }
 0x567   :  { %6190 = vmatpush3.bf16.msra.mxu0 %v7199_v54 }
 0x568   :  { %6191 = vmatprep.subr.bf16.mxu0 %v7481_v29 }
 0x56b   :  { %6192 = vmatpush3.bf16.msra.mxu0 %v7200_v55 }
 0x621   :  { %v6156_v56 = vpop.f32.mrb[12].mxu0 }
 0x622   :  { %v6157_v58 = vpop.f32.mrb[13].mxu0 }
 0x623   :  { %v6158_v59 = vadd.f32 %v6157_v58, %v6156_v56  ;;  %v6159_v60 = vpop.f32.mrb[14].mxu0 }
 0x624   :  { %v6160_v61 = vpop.f32.mrb[15].mxu0 }
 0x625   :  { %v5297_v40 = vadd.f32 %v6158_v59, %v6046_v57 }
 0x627   :  { %v5302_v9 = vmul.f32 0.5, %v5297_v40 }
 0x629   :  { %7227 = vtanh.f32 %v5302_v9 }
 0x633   :  { %v7228_v62 = vpop.eup %7227 }
 0x634   :  { %v5304_v63 = vmul.f32 0.5, %v7228_v62 }
 0x636   :  { %v5305_v1 = vadd.f32 0.5, %v5304_v63 }
 0x638   :  { %v5306_v2 = vmul.f32 %v5305_v1, %v5297_v40 }
 0x63a   :  { %v5307_v52 = vpack.c.bf16 %v5306_v2, %v5306_v2 }
 0x63c   :  { %6194 = vmatmul.mubr.bf16.vlgmr.msra.gmra.mrb[16].mxu0 %v5307_v52 }
 0x70f   :  { %v5413_v4 = vpop.f32.mrb[16].mxu0 }
 0x710   :  { %v5414_v29 = vadd.f32 %v6063_v3, %v5413_v4  ;;  %v6195_v5 = vpop.f32.mrb[17].mxu0 }
 0x711   :  { %v5416_v6 = vpop.f32.mrb[18].mxu0 }
 0x712   :  { %5419 = vst [vmem:[%s7843_s11] sm:$0xff] %v5414_v29  ;;  %v6196_v23 = vpop.f32.mrb[19].mxu0 }
 0x713   :  { %5424 = vsyncpa [#allocation3], 1 }
 0x714   :  { %5425 = vsyncpa [#allocation5], 1 }
 0x715   :  { %5426 = vsyncpa [#allocation8], 1 }
 0x716   :  { %5427 = vsyncpa [#allocation11], 1 }
 0x717   :  { %5428 = vsyncpa [#allocation14], 1 }
 0x718   :  { %5429 = vsyncpa [#allocation17], 1 }

</bundles_post_ra>
